<compile_context>
chip_gen: v5e
topology: v5e:2x2
jax: 0.10.0
libtpu: 0.0.40
codegen_flags: <defaults>
</compile_context>

<pallas_src>
import functools

import numpy as np
import jax
import jax.numpy as jnp
from jax.experimental import pallas as pl
from jax.experimental.pallas import tpu as pltpu

_NUM_ACC = 4  # partial accumulators for the 27-tap MAC chain


def _boundary_masks(D, H, W):
    """0/1 masks (27, D*H*W) and cyclic lane shifts for the 27 conv taps ('same' padding)."""
    d = np.arange(D)[:, None, None]
    h = np.arange(H)[None, :, None]
    w = np.arange(W)[None, None, :]
    masks, shifts = [], []
    for kd in range(3):
        for kh in range(3):
            for kw in range(3):
                dd, dh, dw = kd - 1, kh - 1, kw - 1
                valid = ((d + dd >= 0) & (d + dd < D) &
                         (h + dh >= 0) & (h + dh < H) &
                         (w + dw >= 0) & (w + dw < W))
                masks.append(valid.reshape(-1))
                # want shifted[:, m] == x[:, m + off]  (jnp.roll convention => shift = -off)
                off = dd * H * W + dh * W + dw
                shifts.append((-off) % (D * H * W))
    return np.stack(masks).astype(np.float32), tuple(shifts)


def _block_kernel(x_ref, wtap1_ref, wp1_ref, b1_ref, g1_ref, be1_ref,
                  wtap2_ref, wp2_ref, b2_ref, g2_ref, be2_ref,
                  o_ref, *, shifts, n_batch, apply_relu, eps):
    """Fused Block forward on one lane-dense slab.

    x_ref    : (N*Cin,  M)   input, M = D*H*W flattened on the lane axis
    wtap*_ref: (27, N*C, M)  mask_k * depthwise weight wd[c,k], tiled over samples
    wp*_ref  : (N*Cout, N*C) block-diagonal pointwise weight
    b*_ref   : (N*Cout, 1)   fused bias (pointwise bias + wp @ depthwise bias), tiled over N
    g*/be*   : (N*Cout, 1)   BatchNorm gamma / beta, tiled over N
    o_ref    : (N*Cout, M)   output slab
    """

    def stage(x, wtap_ref, wp_ref, b_ref, g_ref, be_ref):
        NC, M = x.shape

        # Depthwise 3x3x3 ('same' pad): 27 masked cyclic lane rolls (XLU) + lane-dense MACs.
        # Mask and per-channel tap weight are pre-combined in wtap; 4 partial accumulators
        # break the serial add dependency so the LLO scheduler can co-issue roll/mul/add.
        accs = [jnp.zeros((NC, M), jnp.float32) for _ in range(_NUM_ACC)]
        for k, s in enumerate(shifts):
            shifted = pltpu.roll(x, s, 1) if s else x
            accs[k % _NUM_ACC] = accs[k % _NUM_ACC] + shifted * wtap_ref[k]
        while len(accs) > 1:  # tree-sum the partials
            nxt = [accs[i] + accs[i + 1] for i in range(0, len(accs) - 1, 2)]
            if len(accs) % 2:
                nxt.append(accs[-1])
            accs = nxt
        acc = accs[0]

        # Pointwise 1x1x1: one block-diagonal MXU matmul over the merged (N*C) axis.
        y = jnp.dot(wp_ref[...], acc, preferred_element_type=jnp.float32) + b_ref[...]
        if apply_relu:                              # skipped when lastLayer=True
            y = jnp.maximum(y, 0.0)

        # BatchNorm (training mode, biased stats over all N*M positions), two-pass
        # (mean, then E[(y-mean)^2]) to avoid the E[x^2]-mean^2 cancellation.
        ncout = y.shape[0]
        cout = ncout // n_batch
        inv_cnt = 1.0 / (n_batch * M)

        row_sum = jnp.sum(y, axis=1, keepdims=True)          # (N*Cout, 1)
        ch_sum = row_sum[0:cout]
        for i in range(1, n_batch):
            ch_sum = ch_sum + row_sum[i * cout:(i + 1) * cout]
        mean = jnp.tile(ch_sum * inv_cnt, (n_batch, 1))      # per-channel mean, tiled over N

        d = y - mean
        row_sq = jnp.sum(d * d, axis=1, keepdims=True)       # (N*Cout, 1)
        ch_sq = row_sq[0:cout]
        for i in range(1, n_batch):
            ch_sq = ch_sq + row_sq[i * cout:(i + 1) * cout]
        var = jnp.tile(ch_sq * inv_cnt, (n_batch, 1))

        scale = g_ref[...] * jax.lax.rsqrt(var + eps)
        return jnp.maximum(d * scale + be_ref[...], 0.0)     # BN + .clamp(0)

    h = stage(x_ref[...], wtap1_ref, wp1_ref, b1_ref, g1_ref, be1_ref)
    o_ref[...] = stage(h, wtap2_ref, wp2_ref, b2_ref, g2_ref, be2_ref)


def block_forward(x_ncdhw, p, last_layer=False):
    """PyTorch-equivalent forward.  x_ncdhw: (N, Cin, D, H, W) -> (N, Cout, D, H, W)."""
    N, Cin, D, H, W = x_ncdhw.shape
    Cout = p["w_d1"].shape[0]
    M = D * H * W

    masks_np, shifts = _boundary_masks(D, H, W)
    masks = jnp.asarray(masks_np)                            # (27, M)

    def col_tiled(v, c):   # per-channel column vector tiled over the N samples -> (N*c, 1)
        return jnp.tile(v.reshape(c, 1), (N, 1)).astype(jnp.float32)

    def wtap(wd, c):       # mask_k * wd[c, k], tiled over samples -> (27, N*c, M)
        w = jnp.transpose(wd.reshape(c, 27))[:, :, None] * masks[:, None, :]   # (27, c, M)
        return jnp.tile(w, (1, N, 1)).astype(jnp.float32)

    def blkdiag(w):        # (Cout, Cin) -> block-diagonal (N*Cout, N*Cin)
        return jax.scipy.linalg.block_diag(*([w.astype(jnp.float32)] * N))

    # Stage-1 params (depthwise bias folded into the pointwise bias: b_eff = b_p + W_p @ b_d).
    wp1 = p["w_d1"].reshape(Cout, Cin)
    wtap1 = wtap(p["w_s1"], Cin)
    wpb1 = blkdiag(wp1)
    b1 = col_tiled(p["b_d1"].reshape(Cout, 1) + wp1 @ p["b_s1"].reshape(Cin, 1), Cout)
    g1, be1 = col_tiled(p["g1"], Cout), col_tiled(p["be1"], Cout)
    # Stage-2 params.
    wp2 = p["w_d2"].reshape(Cout, Cout)
    wtap2 = wtap(p["w_s2"], Cout)
    wpb2 = blkdiag(wp2)
    b2 = col_tiled(p["b_d2"].reshape(Cout, 1) + wp2 @ p["b_s2"].reshape(Cout, 1), Cout)
    g2, be2 = col_tiled(p["g2"], Cout), col_tiled(p["be2"], Cout)

    # Free reshape (no transpose): rows ordered (n, c), lanes are the flattened spatial axis.
    x = x_ncdhw.reshape(N * Cin, M).astype(jnp.float32)

    kern = functools.partial(_block_kernel, shifts=shifts, n_batch=N,
                             apply_relu=not last_layer, eps=1e-5)
    vmem = pl.BlockSpec(memory_space=pltpu.MemorySpace.VMEM)

    out = pl.pallas_call(
        kern,
        out_shape=jax.ShapeDtypeStruct((N * Cout, M), jnp.float32),
        in_specs=[vmem] * 11,
        out_specs=vmem,
    )(x, wtap1, wpb1, b1, g1, be1, wtap2, wpb2, b2, g2, be2)

    return out.reshape(N, Cout, D, H, W)                     # free reshape back to NCDHW


def init_params(key, Cin, Cout):
    """Deterministic synthetic parameters with the same shapes as the PyTorch module."""
    ks = jax.random.split(key, 8)
    return {
        "w_s1": 0.2 * jax.random.normal(ks[0], (Cin, 1, 3, 3, 3), jnp.float32),
        "b_s1": 0.1 * jax.random.normal(ks[1], (Cin,), jnp.float32),
        "w_d1": 0.2 * jax.random.normal(ks[2], (Cout, Cin, 1, 1, 1), jnp.float32),
        "b_d1": 0.1 * jax.random.normal(ks[3], (Cout,), jnp.float32),
        "w_s2": 0.2 * jax.random.normal(ks[4], (Cout, 1, 3, 3, 3), jnp.float32),
        "b_s2": 0.1 * jax.random.normal(ks[5], (Cout,), jnp.float32),
        "w_d2": 0.2 * jax.random.normal(ks[6], (Cout, Cout, 1, 1, 1), jnp.float32),
        "b_d2": 0.1 * jax.random.normal(ks[7], (Cout,), jnp.float32),
        "g1": jnp.ones((Cout,), jnp.float32), "be1": jnp.zeros((Cout,), jnp.float32),
        "g2": jnp.ones((Cout,), jnp.float32), "be2": jnp.zeros((Cout,), jnp.float32),
    }


def _ref_block(x, p, last_layer=False):
    """Pure-JAX reference (lax conv) mirroring the PyTorch forward, for validation."""
    Cin = p["w_s1"].shape[0]

    def conv(x, w, b, groups, pad):
        y = jax.lax.conv_general_dilated(
            x, w, (1, 1, 1), [(pad, pad)] * 3,
            dimension_numbers=("NCDHW", "OIDHW", "NCDHW"),
            feature_group_count=groups,
            precision=jax.lax.Precision.HIGHEST)
        return y + b.reshape(1, -1, 1, 1, 1)

    def bn(x, g, b, eps=1e-5):
        m = jnp.mean(x, axis=(0, 2, 3, 4), keepdims=True)
        v = jnp.mean((x - m) ** 2, axis=(0, 2, 3, 4), keepdims=True)
        return (x - m) * jax.lax.rsqrt(v + eps) * g.reshape(1, -1, 1, 1, 1) + b.reshape(1, -1, 1, 1, 1)

    act = (lambda z: z) if last_layer else (lambda z: jnp.maximum(z, 0.0))

    h = conv(conv(x, p["w_s1"], p["b_s1"], Cin, 1), p["w_d1"], p["b_d1"], 1, 0)
    h = jnp.maximum(bn(act(h), p["g1"], p["be1"]), 0.0)
    Cout = p["w_s2"].shape[0]
    h = conv(conv(h, p["w_s2"], p["b_s2"], Cout, 1), p["w_d2"], p["b_d2"], 1, 0)
    h = jnp.maximum(bn(act(h), p["g2"], p["be2"]), 0.0)
    return h


if __name__ == "__main__":
    N, Cin, Cout, D, H, W = 2, 4, 8, 8, 8, 8

    key = jax.random.PRNGKey(0)
    kx, kp = jax.random.split(key)
    x = jax.random.normal(kx, (N, Cin, D, H, W), jnp.float32)
    params = init_params(kp, Cin, Cout)

    out = jax.block_until_ready(block_forward(x, params, last_layer=False))
    ref = jax.block_until_ready(_ref_block(x, params, last_layer=False))

    assert out.shape == (N, Cout, D, H, W), out.shape
    assert jnp.allclose(out, ref, atol=1e-2, rtol=1e-2), float(jnp.max(jnp.abs(out - ref)))

    print("KERNEL_OK")
</pallas_src>

<mosaic_0001>
module attributes {stable_mosaic.version = 11 : i64} {
  func.func @_block_kernel(%arg0: memref<8x512xf32, #tpu.memory_space<vmem>>, %arg1: memref<27x8x512xf32, #tpu.memory_space<vmem>>, %arg2: memref<16x8xf32, #tpu.memory_space<vmem>>, %arg3: memref<16x1xf32, #tpu.memory_space<vmem>>, %arg4: memref<16x1xf32, #tpu.memory_space<vmem>>, %arg5: memref<16x1xf32, #tpu.memory_space<vmem>>, %arg6: memref<27x16x512xf32, #tpu.memory_space<vmem>>, %arg7: memref<16x16xf32, #tpu.memory_space<vmem>>, %arg8: memref<16x1xf32, #tpu.memory_space<vmem>>, %arg9: memref<16x1xf32, #tpu.memory_space<vmem>>, %arg10: memref<16x1xf32, #tpu.memory_space<vmem>>, %arg11: memref<16x512xf32, #tpu.memory_space<vmem>>) attributes {dimension_semantics = [], scalar_prefetch = 0 : i64, scratch_operands = 0 : i64, tpu.core_type = #tpu.core_type<tc>} {
    %c0 = arith.constant 0 : index
    %c0_0 = arith.constant 0 : index
    %0 = vector.load %arg0[%c0, %c0_0] : memref<8x512xf32, #tpu.memory_space<vmem>>, vector<8x512xf32>
    %cst = arith.constant 0.000000e+00 : f32
    %1 = vector.broadcast %cst : f32 to vector<8x512xf32>
    %cst_1 = arith.constant 0.000000e+00 : f32
    %2 = vector.broadcast %cst_1 : f32 to vector<8x512xf32>
    %cst_2 = arith.constant 0.000000e+00 : f32
    %3 = vector.broadcast %cst_2 : f32 to vector<8x512xf32>
    %cst_3 = arith.constant 0.000000e+00 : f32
    %4 = vector.broadcast %cst_3 : f32 to vector<8x512xf32>
    %c73_i32 = arith.constant 73 : i32
    %5 = tpu.dynamic_rotate %0 by %c73_i32 dim 1 : vector<8x512xf32>, i32 -> vector<8x512xf32>
    %c0_4 = arith.constant 0 : index
    %c0_5 = arith.constant 0 : index
    %c0_6 = arith.constant 0 : index
    %6 = vector.load %arg1[%c0_4, %c0_5, %c0_6] : memref<27x8x512xf32, #tpu.memory_space<vmem>>, vector<1x8x512xf32>
    %7 = vector.shape_cast %6 : vector<1x8x512xf32> to vector<8x512xf32>
    %8 = arith.mulf %5, %7 : vector<8x512xf32>
    %9 = arith.addf %1, %8 : vector<8x512xf32>
    %c72_i32 = arith.constant 72 : i32
    %10 = tpu.dynamic_rotate %0 by %c72_i32 dim 1 : vector<8x512xf32>, i32 -> vector<8x512xf32>
    %c1 = arith.constant 1 : index
    %c0_7 = arith.constant 0 : index
    %c0_8 = arith.constant 0 : index
    %11 = vector.load %arg1[%c1, %c0_7, %c0_8] : memref<27x8x512xf32, #tpu.memory_space<vmem>>, vector<1x8x512xf32>
    %12 = vector.shape_cast %11 : vector<1x8x512xf32> to vector<8x512xf32>
    %13 = arith.mulf %10, %12 : vector<8x512xf32>
    %14 = arith.addf %2, %13 : vector<8x512xf32>
    %c71_i32 = arith.constant 71 : i32
    %15 = tpu.dynamic_rotate %0 by %c71_i32 dim 1 : vector<8x512xf32>, i32 -> vector<8x512xf32>
    %c2 = arith.constant 2 : index
    %c0_9 = arith.constant 0 : index
    %c0_10 = arith.constant 0 : index
    %16 = vector.load %arg1[%c2, %c0_9, %c0_10] : memref<27x8x512xf32, #tpu.memory_space<vmem>>, vector<1x8x512xf32>
    %17 = vector.shape_cast %16 : vector<1x8x512xf32> to vector<8x512xf32>
    %18 = arith.mulf %15, %17 : vector<8x512xf32>
    %19 = arith.addf %3, %18 : vector<8x512xf32>
    %c65_i32 = arith.constant 65 : i32
    %20 = tpu.dynamic_rotate %0 by %c65_i32 dim 1 : vector<8x512xf32>, i32 -> vector<8x512xf32>
    %c3 = arith.constant 3 : index
    %c0_11 = arith.constant 0 : index
    %c0_12 = arith.constant 0 : index
    %21 = vector.load %arg1[%c3, %c0_11, %c0_12] : memref<27x8x512xf32, #tpu.memory_space<vmem>>, vector<1x8x512xf32>
    %22 = vector.shape_cast %21 : vector<1x8x512xf32> to vector<8x512xf32>
    %23 = arith.mulf %20, %22 : vector<8x512xf32>
    %24 = arith.addf %4, %23 : vector<8x512xf32>
    %c64_i32 = arith.constant 64 : i32
    %25 = tpu.dynamic_rotate %0 by %c64_i32 dim 1 : vector<8x512xf32>, i32 -> vector<8x512xf32>
    %c4 = arith.constant 4 : index
    %c0_13 = arith.constant 0 : index
    %c0_14 = arith.constant 0 : index
    %26 = vector.load %arg1[%c4, %c0_13, %c0_14] : memref<27x8x512xf32, #tpu.memory_space<vmem>>, vector<1x8x512xf32>
    %27 = vector.shape_cast %26 : vector<1x8x512xf32> to vector<8x512xf32>
    %28 = arith.mulf %25, %27 : vector<8x512xf32>
    %29 = arith.addf %9, %28 : vector<8x512xf32>
    %c63_i32 = arith.constant 63 : i32
    %30 = tpu.dynamic_rotate %0 by %c63_i32 dim 1 : vector<8x512xf32>, i32 -> vector<8x512xf32>
    %c5 = arith.constant 5 : index
    %c0_15 = arith.constant 0 : index
    %c0_16 = arith.constant 0 : index
    %31 = vector.load %arg1[%c5, %c0_15, %c0_16] : memref<27x8x512xf32, #tpu.memory_space<vmem>>, vector<1x8x512xf32>
    %32 = vector.shape_cast %31 : vector<1x8x512xf32> to vector<8x512xf32>
    %33 = arith.mulf %30, %32 : vector<8x512xf32>
    %34 = arith.addf %14, %33 : vector<8x512xf32>
    %c57_i32 = arith.constant 57 : i32
    %35 = tpu.dynamic_rotate %0 by %c57_i32 dim 1 : vector<8x512xf32>, i32 -> vector<8x512xf32>
    %c6 = arith.constant 6 : index
    %c0_17 = arith.constant 0 : index
    %c0_18 = arith.constant 0 : index
    %36 = vector.load %arg1[%c6, %c0_17, %c0_18] : memref<27x8x512xf32, #tpu.memory_space<vmem>>, vector<1x8x512xf32>
    %37 = vector.shape_cast %36 : vector<1x8x512xf32> to vector<8x512xf32>
    %38 = arith.mulf %35, %37 : vector<8x512xf32>
    %39 = arith.addf %19, %38 : vector<8x512xf32>
    %c56_i32 = arith.constant 56 : i32
    %40 = tpu.dynamic_rotate %0 by %c56_i32 dim 1 : vector<8x512xf32>, i32 -> vector<8x512xf32>
    %c7 = arith.constant 7 : index
    %c0_19 = arith.constant 0 : index
    %c0_20 = arith.constant 0 : index
    %41 = vector.load %arg1[%c7, %c0_19, %c0_20] : memref<27x8x512xf32, #tpu.memory_space<vmem>>, vector<1x8x512xf32>
    %42 = vector.shape_cast %41 : vector<1x8x512xf32> to vector<8x512xf32>
    %43 = arith.mulf %40, %42 : vector<8x512xf32>
    %44 = arith.addf %24, %43 : vector<8x512xf32>
    %c55_i32 = arith.constant 55 : i32
    %45 = tpu.dynamic_rotate %0 by %c55_i32 dim 1 : vector<8x512xf32>, i32 -> vector<8x512xf32>
    %c8 = arith.constant 8 : index
    %c0_21 = arith.constant 0 : index
    %c0_22 = arith.constant 0 : index
    %46 = vector.load %arg1[%c8, %c0_21, %c0_22] : memref<27x8x512xf32, #tpu.memory_space<vmem>>, vector<1x8x512xf32>
    %47 = vector.shape_cast %46 : vector<1x8x512xf32> to vector<8x512xf32>
    %48 = arith.mulf %45, %47 : vector<8x512xf32>
    %49 = arith.addf %29, %48 : vector<8x512xf32>
    %c9_i32 = arith.constant 9 : i32
    %50 = tpu.dynamic_rotate %0 by %c9_i32 dim 1 : vector<8x512xf32>, i32 -> vector<8x512xf32>
    %c9 = arith.constant 9 : index
    %c0_23 = arith.constant 0 : index
    %c0_24 = arith.constant 0 : index
    %51 = vector.load %arg1[%c9, %c0_23, %c0_24] : memref<27x8x512xf32, #tpu.memory_space<vmem>>, vector<1x8x512xf32>
    %52 = vector.shape_cast %51 : vector<1x8x512xf32> to vector<8x512xf32>
    %53 = arith.mulf %50, %52 : vector<8x512xf32>
    %54 = arith.addf %34, %53 : vector<8x512xf32>
    %c8_i32 = arith.constant 8 : i32
    %55 = tpu.dynamic_rotate %0 by %c8_i32 dim 1 : vector<8x512xf32>, i32 -> vector<8x512xf32>
    %c10 = arith.constant 10 : index
    %c0_25 = arith.constant 0 : index
    %c0_26 = arith.constant 0 : index
    %56 = vector.load %arg1[%c10, %c0_25, %c0_26] : memref<27x8x512xf32, #tpu.memory_space<vmem>>, vector<1x8x512xf32>
    %57 = vector.shape_cast %56 : vector<1x8x512xf32> to vector<8x512xf32>
    %58 = arith.mulf %55, %57 : vector<8x512xf32>
    %59 = arith.addf %39, %58 : vector<8x512xf32>
    %c7_i32 = arith.constant 7 : i32
    %60 = tpu.dynamic_rotate %0 by %c7_i32 dim 1 : vector<8x512xf32>, i32 -> vector<8x512xf32>
    %c11 = arith.constant 11 : index
    %c0_27 = arith.constant 0 : index
    %c0_28 = arith.constant 0 : index
    %61 = vector.load %arg1[%c11, %c0_27, %c0_28] : memref<27x8x512xf32, #tpu.memory_space<vmem>>, vector<1x8x512xf32>
    %62 = vector.shape_cast %61 : vector<1x8x512xf32> to vector<8x512xf32>
    %63 = arith.mulf %60, %62 : vector<8x512xf32>
    %64 = arith.addf %44, %63 : vector<8x512xf32>
    %c1_i32 = arith.constant 1 : i32
    %65 = tpu.dynamic_rotate %0 by %c1_i32 dim 1 : vector<8x512xf32>, i32 -> vector<8x512xf32>
    %c12 = arith.constant 12 : index
    %c0_29 = arith.constant 0 : index
    %c0_30 = arith.constant 0 : index
    %66 = vector.load %arg1[%c12, %c0_29, %c0_30] : memref<27x8x512xf32, #tpu.memory_space<vmem>>, vector<1x8x512xf32>
    %67 = vector.shape_cast %66 : vector<1x8x512xf32> to vector<8x512xf32>
    %68 = arith.mulf %65, %67 : vector<8x512xf32>
    %69 = arith.addf %49, %68 : vector<8x512xf32>
    %c13 = arith.constant 13 : index
    %c0_31 = arith.constant 0 : index
    %c0_32 = arith.constant 0 : index
    %70 = vector.load %arg1[%c13, %c0_31, %c0_32] : memref<27x8x512xf32, #tpu.memory_space<vmem>>, vector<1x8x512xf32>
    %71 = vector.shape_cast %70 : vector<1x8x512xf32> to vector<8x512xf32>
    %72 = arith.mulf %0, %71 : vector<8x512xf32>
    %73 = arith.addf %54, %72 : vector<8x512xf32>
    %c511_i32 = arith.constant 511 : i32
    %74 = tpu.dynamic_rotate %0 by %c511_i32 dim 1 : vector<8x512xf32>, i32 -> vector<8x512xf32>
    %c14 = arith.constant 14 : index
    %c0_33 = arith.constant 0 : index
    %c0_34 = arith.constant 0 : index
    %75 = vector.load %arg1[%c14, %c0_33, %c0_34] : memref<27x8x512xf32, #tpu.memory_space<vmem>>, vector<1x8x512xf32>
    %76 = vector.shape_cast %75 : vector<1x8x512xf32> to vector<8x512xf32>
    %77 = arith.mulf %74, %76 : vector<8x512xf32>
    %78 = arith.addf %59, %77 : vector<8x512xf32>
    %c505_i32 = arith.constant 505 : i32
    %79 = tpu.dynamic_rotate %0 by %c505_i32 dim 1 : vector<8x512xf32>, i32 -> vector<8x512xf32>
    %c15 = arith.constant 15 : index
    %c0_35 = arith.constant 0 : index
    %c0_36 = arith.constant 0 : index
    %80 = vector.load %arg1[%c15, %c0_35, %c0_36] : memref<27x8x512xf32, #tpu.memory_space<vmem>>, vector<1x8x512xf32>
    %81 = vector.shape_cast %80 : vector<1x8x512xf32> to vector<8x512xf32>
    %82 = arith.mulf %79, %81 : vector<8x512xf32>
    %83 = arith.addf %64, %82 : vector<8x512xf32>
    %c504_i32 = arith.constant 504 : i32
    %84 = tpu.dynamic_rotate %0 by %c504_i32 dim 1 : vector<8x512xf32>, i32 -> vector<8x512xf32>
    %c16 = arith.constant 16 : index
    %c0_37 = arith.constant 0 : index
    %c0_38 = arith.constant 0 : index
    %85 = vector.load %arg1[%c16, %c0_37, %c0_38] : memref<27x8x512xf32, #tpu.memory_space<vmem>>, vector<1x8x512xf32>
    %86 = vector.shape_cast %85 : vector<1x8x512xf32> to vector<8x512xf32>
    %87 = arith.mulf %84, %86 : vector<8x512xf32>
    %88 = arith.addf %69, %87 : vector<8x512xf32>
    %c503_i32 = arith.constant 503 : i32
    %89 = tpu.dynamic_rotate %0 by %c503_i32 dim 1 : vector<8x512xf32>, i32 -> vector<8x512xf32>
    %c17 = arith.constant 17 : index
    %c0_39 = arith.constant 0 : index
    %c0_40 = arith.constant 0 : index
    %90 = vector.load %arg1[%c17, %c0_39, %c0_40] : memref<27x8x512xf32, #tpu.memory_space<vmem>>, vector<1x8x512xf32>
    %91 = vector.shape_cast %90 : vector<1x8x512xf32> to vector<8x512xf32>
    %92 = arith.mulf %89, %91 : vector<8x512xf32>
    %93 = arith.addf %73, %92 : vector<8x512xf32>
    %c457_i32 = arith.constant 457 : i32
    %94 = tpu.dynamic_rotate %0 by %c457_i32 dim 1 : vector<8x512xf32>, i32 -> vector<8x512xf32>
    %c18 = arith.constant 18 : index
    %c0_41 = arith.constant 0 : index
    %c0_42 = arith.constant 0 : index
    %95 = vector.load %arg1[%c18, %c0_41, %c0_42] : memref<27x8x512xf32, #tpu.memory_space<vmem>>, vector<1x8x512xf32>
    %96 = vector.shape_cast %95 : vector<1x8x512xf32> to vector<8x512xf32>
    %97 = arith.mulf %94, %96 : vector<8x512xf32>
    %98 = arith.addf %78, %97 : vector<8x512xf32>
    %c456_i32 = arith.constant 456 : i32
    %99 = tpu.dynamic_rotate %0 by %c456_i32 dim 1 : vector<8x512xf32>, i32 -> vector<8x512xf32>
    %c19 = arith.constant 19 : index
    %c0_43 = arith.constant 0 : index
    %c0_44 = arith.constant 0 : index
    %100 = vector.load %arg1[%c19, %c0_43, %c0_44] : memref<27x8x512xf32, #tpu.memory_space<vmem>>, vector<1x8x512xf32>
    %101 = vector.shape_cast %100 : vector<1x8x512xf32> to vector<8x512xf32>
    %102 = arith.mulf %99, %101 : vector<8x512xf32>
    %103 = arith.addf %83, %102 : vector<8x512xf32>
    %c455_i32 = arith.constant 455 : i32
    %104 = tpu.dynamic_rotate %0 by %c455_i32 dim 1 : vector<8x512xf32>, i32 -> vector<8x512xf32>
    %c20 = arith.constant 20 : index
    %c0_45 = arith.constant 0 : index
    %c0_46 = arith.constant 0 : index
    %105 = vector.load %arg1[%c20, %c0_45, %c0_46] : memref<27x8x512xf32, #tpu.memory_space<vmem>>, vector<1x8x512xf32>
    %106 = vector.shape_cast %105 : vector<1x8x512xf32> to vector<8x512xf32>
    %107 = arith.mulf %104, %106 : vector<8x512xf32>
    %108 = arith.addf %88, %107 : vector<8x512xf32>
    %c449_i32 = arith.constant 449 : i32
    %109 = tpu.dynamic_rotate %0 by %c449_i32 dim 1 : vector<8x512xf32>, i32 -> vector<8x512xf32>
    %c21 = arith.constant 21 : index
    %c0_47 = arith.constant 0 : index
    %c0_48 = arith.constant 0 : index
    %110 = vector.load %arg1[%c21, %c0_47, %c0_48] : memref<27x8x512xf32, #tpu.memory_space<vmem>>, vector<1x8x512xf32>
    %111 = vector.shape_cast %110 : vector<1x8x512xf32> to vector<8x512xf32>
    %112 = arith.mulf %109, %111 : vector<8x512xf32>
    %113 = arith.addf %93, %112 : vector<8x512xf32>
    %c448_i32 = arith.constant 448 : i32
    %114 = tpu.dynamic_rotate %0 by %c448_i32 dim 1 : vector<8x512xf32>, i32 -> vector<8x512xf32>
    %c22 = arith.constant 22 : index
    %c0_49 = arith.constant 0 : index
    %c0_50 = arith.constant 0 : index
    %115 = vector.load %arg1[%c22, %c0_49, %c0_50] : memref<27x8x512xf32, #tpu.memory_space<vmem>>, vector<1x8x512xf32>
    %116 = vector.shape_cast %115 : vector<1x8x512xf32> to vector<8x512xf32>
    %117 = arith.mulf %114, %116 : vector<8x512xf32>
    %118 = arith.addf %98, %117 : vector<8x512xf32>
    %c447_i32 = arith.constant 447 : i32
    %119 = tpu.dynamic_rotate %0 by %c447_i32 dim 1 : vector<8x512xf32>, i32 -> vector<8x512xf32>
    %c23 = arith.constant 23 : index
    %c0_51 = arith.constant 0 : index
    %c0_52 = arith.constant 0 : index
    %120 = vector.load %arg1[%c23, %c0_51, %c0_52] : memref<27x8x512xf32, #tpu.memory_space<vmem>>, vector<1x8x512xf32>
    %121 = vector.shape_cast %120 : vector<1x8x512xf32> to vector<8x512xf32>
    %122 = arith.mulf %119, %121 : vector<8x512xf32>
    %123 = arith.addf %103, %122 : vector<8x512xf32>
    %c441_i32 = arith.constant 441 : i32
    %124 = tpu.dynamic_rotate %0 by %c441_i32 dim 1 : vector<8x512xf32>, i32 -> vector<8x512xf32>
    %c24 = arith.constant 24 : index
    %c0_53 = arith.constant 0 : index
    %c0_54 = arith.constant 0 : index
    %125 = vector.load %arg1[%c24, %c0_53, %c0_54] : memref<27x8x512xf32, #tpu.memory_space<vmem>>, vector<1x8x512xf32>
    %126 = vector.shape_cast %125 : vector<1x8x512xf32> to vector<8x512xf32>
    %127 = arith.mulf %124, %126 : vector<8x512xf32>
    %128 = arith.addf %108, %127 : vector<8x512xf32>
    %c440_i32 = arith.constant 440 : i32
    %129 = tpu.dynamic_rotate %0 by %c440_i32 dim 1 : vector<8x512xf32>, i32 -> vector<8x512xf32>
    %c25 = arith.constant 25 : index
    %c0_55 = arith.constant 0 : index
    %c0_56 = arith.constant 0 : index
    %130 = vector.load %arg1[%c25, %c0_55, %c0_56] : memref<27x8x512xf32, #tpu.memory_space<vmem>>, vector<1x8x512xf32>
    %131 = vector.shape_cast %130 : vector<1x8x512xf32> to vector<8x512xf32>
    %132 = arith.mulf %129, %131 : vector<8x512xf32>
    %133 = arith.addf %113, %132 : vector<8x512xf32>
    %c439_i32 = arith.constant 439 : i32
    %134 = tpu.dynamic_rotate %0 by %c439_i32 dim 1 : vector<8x512xf32>, i32 -> vector<8x512xf32>
    %c26 = arith.constant 26 : index
    %c0_57 = arith.constant 0 : index
    %c0_58 = arith.constant 0 : index
    %135 = vector.load %arg1[%c26, %c0_57, %c0_58] : memref<27x8x512xf32, #tpu.memory_space<vmem>>, vector<1x8x512xf32>
    %136 = vector.shape_cast %135 : vector<1x8x512xf32> to vector<8x512xf32>
    %137 = arith.mulf %134, %136 : vector<8x512xf32>
    %138 = arith.addf %118, %137 : vector<8x512xf32>
    %139 = arith.addf %128, %133 : vector<8x512xf32>
    %140 = arith.addf %138, %123 : vector<8x512xf32>
    %141 = arith.addf %139, %140 : vector<8x512xf32>
    %c0_59 = arith.constant 0 : index
    %c0_60 = arith.constant 0 : index
    %142 = vector.load %arg2[%c0_59, %c0_60] : memref<16x8xf32, #tpu.memory_space<vmem>>, vector<16x8xf32>
    %cst_61 = arith.constant dense<0.000000e+00> : vector<16x512xf32>
    %143 = tpu.matmul %142, %141, %cst_61 {dimension_numbers = #tpu.dot_dimension_numbers<[1], [0], [0], [1], [0, 0, 1, 1], [], []>} : vector<16x8xf32>, vector<8x512xf32>, vector<16x512xf32> -> vector<16x512xf32>
    %c0_62 = arith.constant 0 : index
    %c0_63 = arith.constant 0 : index
    %144 = vector.load %arg3[%c0_62, %c0_63] : memref<16x1xf32, #tpu.memory_space<vmem>>, vector<16x1xf32>
    %145 = vector.broadcast %144 : vector<16x1xf32> to vector<16x512xf32>
    %146 = arith.addf %143, %145 : vector<16x512xf32>
    %cst_64 = arith.constant 0.000000e+00 : f32
    %147 = vector.broadcast %cst_64 : f32 to vector<16x512xf32>
    %148 = arith.maximumf %146, %147 : vector<16x512xf32>
    %cst_65 = arith.constant dense<0.000000e+00> : vector<16xf32>
    %149 = vector.multi_reduction <add>, %148, %cst_65 [1] : vector<16x512xf32> to vector<16xf32>
    %150 = vector.shape_cast %149 : vector<16xf32> to vector<16x1xf32>
    %151 = vector.extract_strided_slice %150 {offsets = [0, 0], sizes = [8, 1], strides = [1, 1]} : vector<16x1xf32> to vector<8x1xf32>
    %152 = vector.extract_strided_slice %150 {offsets = [8, 0], sizes = [8, 1], strides = [1, 1]} : vector<16x1xf32> to vector<8x1xf32>
    %153 = arith.addf %151, %152 : vector<8x1xf32>
    %cst_66 = arith.constant 9.765625E-4 : f32
    %154 = vector.broadcast %cst_66 : f32 to vector<8x1xf32>
    %155 = arith.mulf %153, %154 : vector<8x1xf32>
    %156 = tpu.concatenate %155, %155 in 0 : vector<8x1xf32>, vector<8x1xf32> -> vector<16x1xf32>
    %157 = vector.broadcast %156 : vector<16x1xf32> to vector<16x512xf32>
    %158 = arith.subf %148, %157 : vector<16x512xf32>
    %159 = arith.mulf %158, %158 : vector<16x512xf32>
    %cst_67 = arith.constant dense<0.000000e+00> : vector<16xf32>
    %160 = vector.multi_reduction <add>, %159, %cst_67 [1] : vector<16x512xf32> to vector<16xf32>
    %161 = vector.shape_cast %160 : vector<16xf32> to vector<16x1xf32>
    %162 = vector.extract_strided_slice %161 {offsets = [0, 0], sizes = [8, 1], strides = [1, 1]} : vector<16x1xf32> to vector<8x1xf32>
    %163 = vector.extract_strided_slice %161 {offsets = [8, 0], sizes = [8, 1], strides = [1, 1]} : vector<16x1xf32> to vector<8x1xf32>
    %164 = arith.addf %162, %163 : vector<8x1xf32>
    %cst_68 = arith.constant 9.765625E-4 : f32
    %165 = vector.broadcast %cst_68 : f32 to vector<8x1xf32>
    %166 = arith.mulf %164, %165 : vector<8x1xf32>
    %167 = tpu.concatenate %166, %166 in 0 : vector<8x1xf32>, vector<8x1xf32> -> vector<16x1xf32>
    %c0_69 = arith.constant 0 : index
    %c0_70 = arith.constant 0 : index
    %168 = vector.load %arg4[%c0_69, %c0_70] : memref<16x1xf32, #tpu.memory_space<vmem>>, vector<16x1xf32>
    %cst_71 = arith.constant 9.99999974E-6 : f32
    %169 = vector.broadcast %cst_71 : f32 to vector<16x1xf32>
    %170 = arith.addf %167, %169 : vector<16x1xf32>
    %171 = math.rsqrt %170 : vector<16x1xf32>
    %172 = arith.mulf %168, %171 : vector<16x1xf32>
    %173 = vector.broadcast %172 : vector<16x1xf32> to vector<16x512xf32>
    %174 = arith.mulf %158, %173 : vector<16x512xf32>
    %c0_72 = arith.constant 0 : index
    %c0_73 = arith.constant 0 : index
    %175 = vector.load %arg5[%c0_72, %c0_73] : memref<16x1xf32, #tpu.memory_space<vmem>>, vector<16x1xf32>
    %176 = vector.broadcast %175 : vector<16x1xf32> to vector<16x512xf32>
    %177 = arith.addf %174, %176 : vector<16x512xf32>
    %cst_74 = arith.constant 0.000000e+00 : f32
    %178 = vector.broadcast %cst_74 : f32 to vector<16x512xf32>
    %179 = arith.maximumf %177, %178 : vector<16x512xf32>
    %cst_75 = arith.constant 0.000000e+00 : f32
    %180 = vector.broadcast %cst_75 : f32 to vector<16x512xf32>
    %cst_76 = arith.constant 0.000000e+00 : f32
    %181 = vector.broadcast %cst_76 : f32 to vector<16x512xf32>
    %cst_77 = arith.constant 0.000000e+00 : f32
    %182 = vector.broadcast %cst_77 : f32 to vector<16x512xf32>
    %cst_78 = arith.constant 0.000000e+00 : f32
    %183 = vector.broadcast %cst_78 : f32 to vector<16x512xf32>
    %c73_i32_79 = arith.constant 73 : i32
    %184 = tpu.dynamic_rotate %179 by %c73_i32_79 dim 1 : vector<16x512xf32>, i32 -> vector<16x512xf32>
    %c0_80 = arith.constant 0 : index
    %c0_81 = arith.constant 0 : index
    %c0_82 = arith.constant 0 : index
    %185 = vector.load %arg6[%c0_80, %c0_81, %c0_82] : memref<27x16x512xf32, #tpu.memory_space<vmem>>, vector<1x16x512xf32>
    %186 = vector.shape_cast %185 : vector<1x16x512xf32> to vector<16x512xf32>
    %187 = arith.mulf %184, %186 : vector<16x512xf32>
    %188 = arith.addf %180, %187 : vector<16x512xf32>
    %c72_i32_83 = arith.constant 72 : i32
    %189 = tpu.dynamic_rotate %179 by %c72_i32_83 dim 1 : vector<16x512xf32>, i32 -> vector<16x512xf32>
    %c1_84 = arith.constant 1 : index
    %c0_85 = arith.constant 0 : index
    %c0_86 = arith.constant 0 : index
    %190 = vector.load %arg6[%c1_84, %c0_85, %c0_86] : memref<27x16x512xf32, #tpu.memory_space<vmem>>, vector<1x16x512xf32>
    %191 = vector.shape_cast %190 : vector<1x16x512xf32> to vector<16x512xf32>
    %192 = arith.mulf %189, %191 : vector<16x512xf32>
    %193 = arith.addf %181, %192 : vector<16x512xf32>
    %c71_i32_87 = arith.constant 71 : i32
    %194 = tpu.dynamic_rotate %179 by %c71_i32_87 dim 1 : vector<16x512xf32>, i32 -> vector<16x512xf32>
    %c2_88 = arith.constant 2 : index
    %c0_89 = arith.constant 0 : index
    %c0_90 = arith.constant 0 : index
    %195 = vector.load %arg6[%c2_88, %c0_89, %c0_90] : memref<27x16x512xf32, #tpu.memory_space<vmem>>, vector<1x16x512xf32>
    %196 = vector.shape_cast %195 : vector<1x16x512xf32> to vector<16x512xf32>
    %197 = arith.mulf %194, %196 : vector<16x512xf32>
    %198 = arith.addf %182, %197 : vector<16x512xf32>
    %c65_i32_91 = arith.constant 65 : i32
    %199 = tpu.dynamic_rotate %179 by %c65_i32_91 dim 1 : vector<16x512xf32>, i32 -> vector<16x512xf32>
    %c3_92 = arith.constant 3 : index
    %c0_93 = arith.constant 0 : index
    %c0_94 = arith.constant 0 : index
    %200 = vector.load %arg6[%c3_92, %c0_93, %c0_94] : memref<27x16x512xf32, #tpu.memory_space<vmem>>, vector<1x16x512xf32>
    %201 = vector.shape_cast %200 : vector<1x16x512xf32> to vector<16x512xf32>
    %202 = arith.mulf %199, %201 : vector<16x512xf32>
    %203 = arith.addf %183, %202 : vector<16x512xf32>
    %c64_i32_95 = arith.constant 64 : i32
    %204 = tpu.dynamic_rotate %179 by %c64_i32_95 dim 1 : vector<16x512xf32>, i32 -> vector<16x512xf32>
    %c4_96 = arith.constant 4 : index
    %c0_97 = arith.constant 0 : index
    %c0_98 = arith.constant 0 : index
    %205 = vector.load %arg6[%c4_96, %c0_97, %c0_98] : memref<27x16x512xf32, #tpu.memory_space<vmem>>, vector<1x16x512xf32>
    %206 = vector.shape_cast %205 : vector<1x16x512xf32> to vector<16x512xf32>
    %207 = arith.mulf %204, %206 : vector<16x512xf32>
    %208 = arith.addf %188, %207 : vector<16x512xf32>
    %c63_i32_99 = arith.constant 63 : i32
    %209 = tpu.dynamic_rotate %179 by %c63_i32_99 dim 1 : vector<16x512xf32>, i32 -> vector<16x512xf32>
    %c5_100 = arith.constant 5 : index
    %c0_101 = arith.constant 0 : index
    %c0_102 = arith.constant 0 : index
    %210 = vector.load %arg6[%c5_100, %c0_101, %c0_102] : memref<27x16x512xf32, #tpu.memory_space<vmem>>, vector<1x16x512xf32>
    %211 = vector.shape_cast %210 : vector<1x16x512xf32> to vector<16x512xf32>
    %212 = arith.mulf %209, %211 : vector<16x512xf32>
    %213 = arith.addf %193, %212 : vector<16x512xf32>
    %c57_i32_103 = arith.constant 57 : i32
    %214 = tpu.dynamic_rotate %179 by %c57_i32_103 dim 1 : vector<16x512xf32>, i32 -> vector<16x512xf32>
    %c6_104 = arith.constant 6 : index
    %c0_105 = arith.constant 0 : index
    %c0_106 = arith.constant 0 : index
    %215 = vector.load %arg6[%c6_104, %c0_105, %c0_106] : memref<27x16x512xf32, #tpu.memory_space<vmem>>, vector<1x16x512xf32>
    %216 = vector.shape_cast %215 : vector<1x16x512xf32> to vector<16x512xf32>
    %217 = arith.mulf %214, %216 : vector<16x512xf32>
    %218 = arith.addf %198, %217 : vector<16x512xf32>
    %c56_i32_107 = arith.constant 56 : i32
    %219 = tpu.dynamic_rotate %179 by %c56_i32_107 dim 1 : vector<16x512xf32>, i32 -> vector<16x512xf32>
    %c7_108 = arith.constant 7 : index
    %c0_109 = arith.constant 0 : index
    %c0_110 = arith.constant 0 : index
    %220 = vector.load %arg6[%c7_108, %c0_109, %c0_110] : memref<27x16x512xf32, #tpu.memory_space<vmem>>, vector<1x16x512xf32>
    %221 = vector.shape_cast %220 : vector<1x16x512xf32> to vector<16x512xf32>
    %222 = arith.mulf %219, %221 : vector<16x512xf32>
    %223 = arith.addf %203, %222 : vector<16x512xf32>
    %c55_i32_111 = arith.constant 55 : i32
    %224 = tpu.dynamic_rotate %179 by %c55_i32_111 dim 1 : vector<16x512xf32>, i32 -> vector<16x512xf32>
    %c8_112 = arith.constant 8 : index
    %c0_113 = arith.constant 0 : index
    %c0_114 = arith.constant 0 : index
    %225 = vector.load %arg6[%c8_112, %c0_113, %c0_114] : memref<27x16x512xf32, #tpu.memory_space<vmem>>, vector<1x16x512xf32>
    %226 = vector.shape_cast %225 : vector<1x16x512xf32> to vector<16x512xf32>
    %227 = arith.mulf %224, %226 : vector<16x512xf32>
    %228 = arith.addf %208, %227 : vector<16x512xf32>
    %c9_i32_115 = arith.constant 9 : i32
    %229 = tpu.dynamic_rotate %179 by %c9_i32_115 dim 1 : vector<16x512xf32>, i32 -> vector<16x512xf32>
    %c9_116 = arith.constant 9 : index
    %c0_117 = arith.constant 0 : index
    %c0_118 = arith.constant 0 : index
    %230 = vector.load %arg6[%c9_116, %c0_117, %c0_118] : memref<27x16x512xf32, #tpu.memory_space<vmem>>, vector<1x16x512xf32>
    %231 = vector.shape_cast %230 : vector<1x16x512xf32> to vector<16x512xf32>
    %232 = arith.mulf %229, %231 : vector<16x512xf32>
    %233 = arith.addf %213, %232 : vector<16x512xf32>
    %c8_i32_119 = arith.constant 8 : i32
    %234 = tpu.dynamic_rotate %179 by %c8_i32_119 dim 1 : vector<16x512xf32>, i32 -> vector<16x512xf32>
    %c10_120 = arith.constant 10 : index
    %c0_121 = arith.constant 0 : index
    %c0_122 = arith.constant 0 : index
    %235 = vector.load %arg6[%c10_120, %c0_121, %c0_122] : memref<27x16x512xf32, #tpu.memory_space<vmem>>, vector<1x16x512xf32>
    %236 = vector.shape_cast %235 : vector<1x16x512xf32> to vector<16x512xf32>
    %237 = arith.mulf %234, %236 : vector<16x512xf32>
    %238 = arith.addf %218, %237 : vector<16x512xf32>
    %c7_i32_123 = arith.constant 7 : i32
    %239 = tpu.dynamic_rotate %179 by %c7_i32_123 dim 1 : vector<16x512xf32>, i32 -> vector<16x512xf32>
    %c11_124 = arith.constant 11 : index
    %c0_125 = arith.constant 0 : index
    %c0_126 = arith.constant 0 : index
    %240 = vector.load %arg6[%c11_124, %c0_125, %c0_126] : memref<27x16x512xf32, #tpu.memory_space<vmem>>, vector<1x16x512xf32>
    %241 = vector.shape_cast %240 : vector<1x16x512xf32> to vector<16x512xf32>
    %242 = arith.mulf %239, %241 : vector<16x512xf32>
    %243 = arith.addf %223, %242 : vector<16x512xf32>
    %c1_i32_127 = arith.constant 1 : i32
    %244 = tpu.dynamic_rotate %179 by %c1_i32_127 dim 1 : vector<16x512xf32>, i32 -> vector<16x512xf32>
    %c12_128 = arith.constant 12 : index
    %c0_129 = arith.constant 0 : index
    %c0_130 = arith.constant 0 : index
    %245 = vector.load %arg6[%c12_128, %c0_129, %c0_130] : memref<27x16x512xf32, #tpu.memory_space<vmem>>, vector<1x16x512xf32>
    %246 = vector.shape_cast %245 : vector<1x16x512xf32> to vector<16x512xf32>
    %247 = arith.mulf %244, %246 : vector<16x512xf32>
    %248 = arith.addf %228, %247 : vector<16x512xf32>
    %c13_131 = arith.constant 13 : index
    %c0_132 = arith.constant 0 : index
    %c0_133 = arith.constant 0 : index
    %249 = vector.load %arg6[%c13_131, %c0_132, %c0_133] : memref<27x16x512xf32, #tpu.memory_space<vmem>>, vector<1x16x512xf32>
    %250 = vector.shape_cast %249 : vector<1x16x512xf32> to vector<16x512xf32>
    %251 = arith.mulf %179, %250 : vector<16x512xf32>
    %252 = arith.addf %233, %251 : vector<16x512xf32>
    %c511_i32_134 = arith.constant 511 : i32
    %253 = tpu.dynamic_rotate %179 by %c511_i32_134 dim 1 : vector<16x512xf32>, i32 -> vector<16x512xf32>
    %c14_135 = arith.constant 14 : index
    %c0_136 = arith.constant 0 : index
    %c0_137 = arith.constant 0 : index
    %254 = vector.load %arg6[%c14_135, %c0_136, %c0_137] : memref<27x16x512xf32, #tpu.memory_space<vmem>>, vector<1x16x512xf32>
    %255 = vector.shape_cast %254 : vector<1x16x512xf32> to vector<16x512xf32>
    %256 = arith.mulf %253, %255 : vector<16x512xf32>
    %257 = arith.addf %238, %256 : vector<16x512xf32>
    %c505_i32_138 = arith.constant 505 : i32
    %258 = tpu.dynamic_rotate %179 by %c505_i32_138 dim 1 : vector<16x512xf32>, i32 -> vector<16x512xf32>
    %c15_139 = arith.constant 15 : index
    %c0_140 = arith.constant 0 : index
    %c0_141 = arith.constant 0 : index
    %259 = vector.load %arg6[%c15_139, %c0_140, %c0_141] : memref<27x16x512xf32, #tpu.memory_space<vmem>>, vector<1x16x512xf32>
    %260 = vector.shape_cast %259 : vector<1x16x512xf32> to vector<16x512xf32>
    %261 = arith.mulf %258, %260 : vector<16x512xf32>
    %262 = arith.addf %243, %261 : vector<16x512xf32>
    %c504_i32_142 = arith.constant 504 : i32
    %263 = tpu.dynamic_rotate %179 by %c504_i32_142 dim 1 : vector<16x512xf32>, i32 -> vector<16x512xf32>
    %c16_143 = arith.constant 16 : index
    %c0_144 = arith.constant 0 : index
    %c0_145 = arith.constant 0 : index
    %264 = vector.load %arg6[%c16_143, %c0_144, %c0_145] : memref<27x16x512xf32, #tpu.memory_space<vmem>>, vector<1x16x512xf32>
    %265 = vector.shape_cast %264 : vector<1x16x512xf32> to vector<16x512xf32>
    %266 = arith.mulf %263, %265 : vector<16x512xf32>
    %267 = arith.addf %248, %266 : vector<16x512xf32>
    %c503_i32_146 = arith.constant 503 : i32
    %268 = tpu.dynamic_rotate %179 by %c503_i32_146 dim 1 : vector<16x512xf32>, i32 -> vector<16x512xf32>
    %c17_147 = arith.constant 17 : index
    %c0_148 = arith.constant 0 : index
    %c0_149 = arith.constant 0 : index
    %269 = vector.load %arg6[%c17_147, %c0_148, %c0_149] : memref<27x16x512xf32, #tpu.memory_space<vmem>>, vector<1x16x512xf32>
    %270 = vector.shape_cast %269 : vector<1x16x512xf32> to vector<16x512xf32>
    %271 = arith.mulf %268, %270 : vector<16x512xf32>
    %272 = arith.addf %252, %271 : vector<16x512xf32>
    %c457_i32_150 = arith.constant 457 : i32
    %273 = tpu.dynamic_rotate %179 by %c457_i32_150 dim 1 : vector<16x512xf32>, i32 -> vector<16x512xf32>
    %c18_151 = arith.constant 18 : index
    %c0_152 = arith.constant 0 : index
    %c0_153 = arith.constant 0 : index
    %274 = vector.load %arg6[%c18_151, %c0_152, %c0_153] : memref<27x16x512xf32, #tpu.memory_space<vmem>>, vector<1x16x512xf32>
    %275 = vector.shape_cast %274 : vector<1x16x512xf32> to vector<16x512xf32>
    %276 = arith.mulf %273, %275 : vector<16x512xf32>
    %277 = arith.addf %257, %276 : vector<16x512xf32>
    %c456_i32_154 = arith.constant 456 : i32
    %278 = tpu.dynamic_rotate %179 by %c456_i32_154 dim 1 : vector<16x512xf32>, i32 -> vector<16x512xf32>
    %c19_155 = arith.constant 19 : index
    %c0_156 = arith.constant 0 : index
    %c0_157 = arith.constant 0 : index
    %279 = vector.load %arg6[%c19_155, %c0_156, %c0_157] : memref<27x16x512xf32, #tpu.memory_space<vmem>>, vector<1x16x512xf32>
    %280 = vector.shape_cast %279 : vector<1x16x512xf32> to vector<16x512xf32>
    %281 = arith.mulf %278, %280 : vector<16x512xf32>
    %282 = arith.addf %262, %281 : vector<16x512xf32>
    %c455_i32_158 = arith.constant 455 : i32
    %283 = tpu.dynamic_rotate %179 by %c455_i32_158 dim 1 : vector<16x512xf32>, i32 -> vector<16x512xf32>
    %c20_159 = arith.constant 20 : index
    %c0_160 = arith.constant 0 : index
    %c0_161 = arith.constant 0 : index
    %284 = vector.load %arg6[%c20_159, %c0_160, %c0_161] : memref<27x16x512xf32, #tpu.memory_space<vmem>>, vector<1x16x512xf32>
    %285 = vector.shape_cast %284 : vector<1x16x512xf32> to vector<16x512xf32>
    %286 = arith.mulf %283, %285 : vector<16x512xf32>
    %287 = arith.addf %267, %286 : vector<16x512xf32>
    %c449_i32_162 = arith.constant 449 : i32
    %288 = tpu.dynamic_rotate %179 by %c449_i32_162 dim 1 : vector<16x512xf32>, i32 -> vector<16x512xf32>
    %c21_163 = arith.constant 21 : index
    %c0_164 = arith.constant 0 : index
    %c0_165 = arith.constant 0 : index
    %289 = vector.load %arg6[%c21_163, %c0_164, %c0_165] : memref<27x16x512xf32, #tpu.memory_space<vmem>>, vector<1x16x512xf32>
    %290 = vector.shape_cast %289 : vector<1x16x512xf32> to vector<16x512xf32>
    %291 = arith.mulf %288, %290 : vector<16x512xf32>
    %292 = arith.addf %272, %291 : vector<16x512xf32>
    %c448_i32_166 = arith.constant 448 : i32
    %293 = tpu.dynamic_rotate %179 by %c448_i32_166 dim 1 : vector<16x512xf32>, i32 -> vector<16x512xf32>
    %c22_167 = arith.constant 22 : index
    %c0_168 = arith.constant 0 : index
    %c0_169 = arith.constant 0 : index
    %294 = vector.load %arg6[%c22_167, %c0_168, %c0_169] : memref<27x16x512xf32, #tpu.memory_space<vmem>>, vector<1x16x512xf32>
    %295 = vector.shape_cast %294 : vector<1x16x512xf32> to vector<16x512xf32>
    %296 = arith.mulf %293, %295 : vector<16x512xf32>
    %297 = arith.addf %277, %296 : vector<16x512xf32>
    %c447_i32_170 = arith.constant 447 : i32
    %298 = tpu.dynamic_rotate %179 by %c447_i32_170 dim 1 : vector<16x512xf32>, i32 -> vector<16x512xf32>
    %c23_171 = arith.constant 23 : index
    %c0_172 = arith.constant 0 : index
    %c0_173 = arith.constant 0 : index
    %299 = vector.load %arg6[%c23_171, %c0_172, %c0_173] : memref<27x16x512xf32, #tpu.memory_space<vmem>>, vector<1x16x512xf32>
    %300 = vector.shape_cast %299 : vector<1x16x512xf32> to vector<16x512xf32>
    %301 = arith.mulf %298, %300 : vector<16x512xf32>
    %302 = arith.addf %282, %301 : vector<16x512xf32>
    %c441_i32_174 = arith.constant 441 : i32
    %303 = tpu.dynamic_rotate %179 by %c441_i32_174 dim 1 : vector<16x512xf32>, i32 -> vector<16x512xf32>
    %c24_175 = arith.constant 24 : index
    %c0_176 = arith.constant 0 : index
    %c0_177 = arith.constant 0 : index
    %304 = vector.load %arg6[%c24_175, %c0_176, %c0_177] : memref<27x16x512xf32, #tpu.memory_space<vmem>>, vector<1x16x512xf32>
    %305 = vector.shape_cast %304 : vector<1x16x512xf32> to vector<16x512xf32>
    %306 = arith.mulf %303, %305 : vector<16x512xf32>
    %307 = arith.addf %287, %306 : vector<16x512xf32>
    %c440_i32_178 = arith.constant 440 : i32
    %308 = tpu.dynamic_rotate %179 by %c440_i32_178 dim 1 : vector<16x512xf32>, i32 -> vector<16x512xf32>
    %c25_179 = arith.constant 25 : index
    %c0_180 = arith.constant 0 : index
    %c0_181 = arith.constant 0 : index
    %309 = vector.load %arg6[%c25_179, %c0_180, %c0_181] : memref<27x16x512xf32, #tpu.memory_space<vmem>>, vector<1x16x512xf32>
    %310 = vector.shape_cast %309 : vector<1x16x512xf32> to vector<16x512xf32>
    %311 = arith.mulf %308, %310 : vector<16x512xf32>
    %312 = arith.addf %292, %311 : vector<16x512xf32>
    %c439_i32_182 = arith.constant 439 : i32
    %313 = tpu.dynamic_rotate %179 by %c439_i32_182 dim 1 : vector<16x512xf32>, i32 -> vector<16x512xf32>
    %c26_183 = arith.constant 26 : index
    %c0_184 = arith.constant 0 : index
    %c0_185 = arith.constant 0 : index
    %314 = vector.load %arg6[%c26_183, %c0_184, %c0_185] : memref<27x16x512xf32, #tpu.memory_space<vmem>>, vector<1x16x512xf32>
    %315 = vector.shape_cast %314 : vector<1x16x512xf32> to vector<16x512xf32>
    %316 = arith.mulf %313, %315 : vector<16x512xf32>
    %317 = arith.addf %297, %316 : vector<16x512xf32>
    %318 = arith.addf %307, %312 : vector<16x512xf32>
    %319 = arith.addf %317, %302 : vector<16x512xf32>
    %320 = arith.addf %318, %319 : vector<16x512xf32>
    %c0_186 = arith.constant 0 : index
    %c0_187 = arith.constant 0 : index
    %321 = vector.load %arg7[%c0_186, %c0_187] : memref<16x16xf32, #tpu.memory_space<vmem>>, vector<16x16xf32>
    %cst_188 = arith.constant dense<0.000000e+00> : vector<16x512xf32>
    %322 = tpu.matmul %321, %320, %cst_188 {dimension_numbers = #tpu.dot_dimension_numbers<[1], [0], [0], [1], [0, 0, 1, 1], [], []>} : vector<16x16xf32>, vector<16x512xf32>, vector<16x512xf32> -> vector<16x512xf32>
    %c0_189 = arith.constant 0 : index
    %c0_190 = arith.constant 0 : index
    %323 = vector.load %arg8[%c0_189, %c0_190] : memref<16x1xf32, #tpu.memory_space<vmem>>, vector<16x1xf32>
    %324 = vector.broadcast %323 : vector<16x1xf32> to vector<16x512xf32>
    %325 = arith.addf %322, %324 : vector<16x512xf32>
    %cst_191 = arith.constant 0.000000e+00 : f32
    %326 = vector.broadcast %cst_191 : f32 to vector<16x512xf32>
    %327 = arith.maximumf %325, %326 : vector<16x512xf32>
    %cst_192 = arith.constant dense<0.000000e+00> : vector<16xf32>
    %328 = vector.multi_reduction <add>, %327, %cst_192 [1] : vector<16x512xf32> to vector<16xf32>
    %329 = vector.shape_cast %328 : vector<16xf32> to vector<16x1xf32>
    %330 = vector.extract_strided_slice %329 {offsets = [0, 0], sizes = [8, 1], strides = [1, 1]} : vector<16x1xf32> to vector<8x1xf32>
    %331 = vector.extract_strided_slice %329 {offsets = [8, 0], sizes = [8, 1], strides = [1, 1]} : vector<16x1xf32> to vector<8x1xf32>
    %332 = arith.addf %330, %331 : vector<8x1xf32>
    %cst_193 = arith.constant 9.765625E-4 : f32
    %333 = vector.broadcast %cst_193 : f32 to vector<8x1xf32>
    %334 = arith.mulf %332, %333 : vector<8x1xf32>
    %335 = tpu.concatenate %334, %334 in 0 : vector<8x1xf32>, vector<8x1xf32> -> vector<16x1xf32>
    %336 = vector.broadcast %335 : vector<16x1xf32> to vector<16x512xf32>
    %337 = arith.subf %327, %336 : vector<16x512xf32>
    %338 = arith.mulf %337, %337 : vector<16x512xf32>
    %cst_194 = arith.constant dense<0.000000e+00> : vector<16xf32>
    %339 = vector.multi_reduction <add>, %338, %cst_194 [1] : vector<16x512xf32> to vector<16xf32>
    %340 = vector.shape_cast %339 : vector<16xf32> to vector<16x1xf32>
    %341 = vector.extract_strided_slice %340 {offsets = [0, 0], sizes = [8, 1], strides = [1, 1]} : vector<16x1xf32> to vector<8x1xf32>
    %342 = vector.extract_strided_slice %340 {offsets = [8, 0], sizes = [8, 1], strides = [1, 1]} : vector<16x1xf32> to vector<8x1xf32>
    %343 = arith.addf %341, %342 : vector<8x1xf32>
    %cst_195 = arith.constant 9.765625E-4 : f32
    %344 = vector.broadcast %cst_195 : f32 to vector<8x1xf32>
    %345 = arith.mulf %343, %344 : vector<8x1xf32>
    %346 = tpu.concatenate %345, %345 in 0 : vector<8x1xf32>, vector<8x1xf32> -> vector<16x1xf32>
    %c0_196 = arith.constant 0 : index
    %c0_197 = arith.constant 0 : index
    %347 = vector.load %arg9[%c0_196, %c0_197] : memref<16x1xf32, #tpu.memory_space<vmem>>, vector<16x1xf32>
    %cst_198 = arith.constant 9.99999974E-6 : f32
    %348 = vector.broadcast %cst_198 : f32 to vector<16x1xf32>
    %349 = arith.addf %346, %348 : vector<16x1xf32>
    %350 = math.rsqrt %349 : vector<16x1xf32>
    %351 = arith.mulf %347, %350 : vector<16x1xf32>
    %352 = vector.broadcast %351 : vector<16x1xf32> to vector<16x512xf32>
    %353 = arith.mulf %337, %352 : vector<16x512xf32>
    %c0_199 = arith.constant 0 : index
    %c0_200 = arith.constant 0 : index
    %354 = vector.load %arg10[%c0_199, %c0_200] : memref<16x1xf32, #tpu.memory_space<vmem>>, vector<16x1xf32>
    %355 = vector.broadcast %354 : vector<16x1xf32> to vector<16x512xf32>
    %356 = arith.addf %353, %355 : vector<16x512xf32>
    %cst_201 = arith.constant 0.000000e+00 : f32
    %357 = vector.broadcast %cst_201 : f32 to vector<16x512xf32>
    %358 = arith.maximumf %356, %357 : vector<16x512xf32>
    %c0_202 = arith.constant 0 : index
    %c0_203 = arith.constant 0 : index
    %359 = vector.load %arg11[%c0_202, %c0_203] : memref<16x512xf32, #tpu.memory_space<vmem>>, vector<16x512xf32>
    tpu.vector_store %arg11[%c0_202, %c0_203], %358 {strides = array<i32>} : memref<16x512xf32, #tpu.memory_space<vmem>>, vector<16x512xf32>,
    return
  }
}

</mosaic_0001>

<bundles_post_ra>
// kernel: tpu_custom_call.1
= control target key start
LH: loop header
LB: loop body
LE: loop exit
PB: predicated region body
PF: predicated region fallthrough
CT: control target
= control target key end

     0   :  { %16 = vsyncpa [#allocation3], 0  ;;  %s4916_s0 = inlined_call_operand.vmem [shape: f32[8,512], index: 0, kind: input, shape index: {}]   ;;  %s4917_s1 = inlined_call_operand.hbm [shape: f32[27,8,512], index: 1, kind: input, shape index: {}]   ;;  %s4918_s2 = inlined_call_operand.vmem [shape: f32[16,8], index: 2, kind: input, shape index: {}]   ;;  %s4919_s3 = inlined_call_operand.vmem [shape: f32[16,1], index: 3, kind: input, shape index: {}]   ;;  %s4920_s4 = inlined_call_operand.vmem [shape: f32[16,1], index: 4, kind: input, shape index: {}]   ;;  %s4921_s5 = inlined_call_operand.vmem [shape: f32[16,1], index: 5, kind: input, shape index: {}]   ;;  %s4922_s6 = inlined_call_operand.hbm [shape: f32[27,16,512], index: 6, kind: input, shape index: {}]   ;;  %s4923_s7 = inlined_call_operand.vmem [shape: f32[16,16], index: 7, kind: input, shape index: {}]   ;;  %s4924_s8 = inlined_call_operand.vmem [shape: f32[16,1], index: 8, kind: input, shape index: {}]   ;;  %s4925_s9 = inlined_call_operand.vmem [shape: f32[16,1], index: 9, kind: input, shape index: {}]   ;;  %s4926_s10 = inlined_call_operand.vmem [shape: f32[16,1], index: 10, kind: input, shape index: {}]   ;;  %s4927_s11 = inlined_call_operand.hbm [shape: f32[16,512], index: 11, kind: output, shape index: {}]  }
   0x1   :  { %17 = vsyncpa [#allocation6], 0 }
   0x2   :  { %18 = vsyncpa [#allocation4], 0  ;;  %s25_s19 = sshll.u32 %s4917_s1, 4  ;;  %s2372_s20 = smov [#allocation2]   ;;  %s26_s19 = int_to_ptr.hbm [resolvable:$true] %s25_s19 }
   0x3   :  { %s27_s21 = sshll.u32 %s2372_s20, 4  ;;  %s46_s24 = sshll.u32 %s4922_s6, 4  ;;  %s28_s21 = int_to_ptr.vmem [resolvable:$true] %s27_s21  ;;  %s47_s24 = int_to_ptr.hbm [resolvable:$true] %s46_s24 }
   0x4   :  { %s4955_s25 = smov 512   ;;  %s2374_s26 = smov 32  }
   0x5   :  { %33 = dma.hbm_to_vmem [thread:$0]  %s26_s19, 13824, %s28_s21, [#allocation3], %s4955_s25, %s4955_s25, %s2374_s26  }
   0x6   :  { %s2375_s27 = smov [#allocation5]  }
   0x7   :  { %s48_s28 = sshll.u32 %s2375_s27, 4  ;;  %s49_s28 = int_to_ptr.vmem [resolvable:$true] %s48_s28 }
   0x8   :  { %54 = dma.hbm_to_vmem [thread:$0]  %s47_s24, 27648, %s49_s28, [#allocation6], %s4955_s25, %s4955_s25, %s2374_s26  }
   0x9   :  { %2366 = dma.done.wait [#allocation3], 13824  }
   0xa   :  { %2367 = vsyncadd [#allocation3], 4294953472 }
   0xb   :  { %2368 = dma.done.wait [#allocation6], 27648  }
   0xc   :  { %2369 = vsyncadd [#allocation6], 4294939648  ;;  %v2470_v0 = vld [vmem:[%s4916_s0 + $0x8] sm:$0xff]  ;;  %s2376_s29 = smov 71   ;;  %s2377_s30 = smov 72   ;;  %v2481_v1 = vld [vmem:[%s4916_s0 + $0x10] sm:$0xff]  ;;  %v83_v45 = vlaneseq }
   0xd   :  { %5059 = vst [vmem:[#allocation11_spill] sm:$0xff] %v2470_v0  ;;  %130 = vrot.lane.b32.xlu2 %v2470_v0, %s2376_s29  ;;  %104 = vrot.lane.b32.xlu1 %v2470_v0, %s2377_s30  ;;  %s2378_s12 = smov 73   ;;  %s2379_s15 = smov 63   ;;  %v2504_v2 = vld [vmem:[%s4916_s0 + $0x18] sm:$0xff]  ;;  %v2539_v3 = vld [vmem:[%s4916_s0] sm:$0xff]  ;;  %v144_v50 = vld [vmem:[#allocation2 + $0x50] sm:$0xff] }
   0xe   :  { %77 = vrot.lane.b32.xlu0 %v2470_v0, %s2378_s12  ;;  %s2380_s16 = smov 64   ;;  %s2381_s17 = smov 57   ;;  %5060 = vst [vmem:[#allocation12_spill] sm:$0xff] %v2539_v3  ;;  %v2709_v48 = vand.u32 127, %v83_v45  ;;  %v559_v51 = vld [vmem:[#allocation2 + $0x288] sm:$0xff]  ;;  %v145_v53 = vld [vmem:[#allocation2 + $0x58] sm:$0xff] }
   0xf   :  { %s2382_s20 = smov 65   ;;  %s2383_s21 = smov 56   ;;  %v196_v54 = vld [vmem:[#allocation2 + $0x90] sm:$0xff]  ;;  %v546_v60 = vld [vmem:[#allocation2 + $0x268] sm:$0xff] }
  0x10   :  { %s2384_s22 = smov 55   ;;  %s2385_s23 = smov 8   ;;  %vm136_vm0 = vcmp.lt.s32.totalorder %v2709_v48, 71  ;;  %vm188_vm1 = vcmp.lt.s32.totalorder %v2709_v48, 64  ;;  %vm110_vm2 = vcmp.lt.s32.totalorder %v2709_v48, 72  ;;  %vm85_vm3 = vcmp.lt.s32.totalorder %v2709_v48, 73 }
  0x11   :  { %s2386_s24 = smov 9   ;;  %s2387_s0 = smov 1   ;;  %vm240_vm4 = vcmp.lt.s32.totalorder %v2709_v48, 57  ;;  %vm214_vm5 = vcmp.lt.s32.totalorder %v2709_v48, 63  ;;  %v560_v57 = vld [vmem:[#allocation2 + $0x290] sm:$0xff]  ;;  %vm162_vm6 = vcmp.lt.s32.totalorder %v2709_v48, 65 }
  0x12   :  { %s2388_s1 = smov 7   ;;  %s2389_s6 = smov 127   ;;  %v118_v59 = vld [vmem:[#allocation2 + $0x30] sm:$0xff]  ;;  %vm4952_vm7 = vcmp.lt.s32.totalorder %v2709_v48, 55  ;;  %vm266_vm8 = vcmp.lt.s32.totalorder %v2709_v48, 56  ;;  %vm318_vm9 = vcmp.lt.s32.totalorder %v2709_v48, 9 }
  0x13   :  { %s2390_s13 = smov 121   ;;  %s2391_s14 = smov 120   ;;  %v92_v63 = vld [vmem:[#allocation2 + $0x10] sm:$0xff]  ;;  %vm344_vm10 = vcmp.lt.s32.totalorder %v2709_v48, 8  ;;  %vm4954_vm11 = vcmp.lt.s32.totalorder %v2709_v48, 7  ;;  %vm435_vm12 = vcmp.lt.s32.totalorder %v2709_v48, 127 }
  0x14   :  { %s2392_s18 = smov 119   ;;  %vm396_vm13 = vcmp.lt.s32.totalorder %v2709_v48, 1  ;;  %vm461_vm14 = vcmp.lt.s32.totalorder %v2709_v48, 121  ;;  %vm4957_vm15 = vcmp.lt.s32.totalorder %v2709_v48, 120 }
  0x15   :  { %132 = vrot.lane.b32.xlu2 %v2481_v1, %s2376_s29  ;;  %106 = vrot.lane.b32.xlu1 %v2481_v1, %s2377_s30 }
  0x16   :  { %79 = vrot.lane.b32.xlu0 %v2481_v1, %s2378_s12 }
  0x1d   :  { %208 = vrot.lane.b32.xlu2 %v2470_v0, %s2379_s15  ;;  %184 = vrot.lane.b32.xlu1 %v2481_v1, %s2380_s16 }
  0x1e   :  { %182 = vrot.lane.b32.xlu0 %v2470_v0, %s2380_s16 }
  0x25   :  { %236 = vrot.lane.b32.xlu2 %v2481_v1, %s2381_s17  ;;  %234 = vrot.lane.b32.xlu1 %v2470_v0, %s2381_s17 }
  0x26   :  { %210 = vrot.lane.b32.xlu0 %v2481_v1, %s2379_s15 }
  0x2d   :  { %134 = vrot.lane.b32.xlu2 %v2504_v2, %s2376_s29  ;;  %108 = vrot.lane.b32.xlu1 %v2504_v2, %s2377_s30 }
  0x2e   :  { %81 = vrot.lane.b32.xlu0 %v2504_v2, %s2378_s12 }
  0x35   :  { %186 = vrot.lane.b32.xlu2 %v2504_v2, %s2380_s16  ;;  %158 = vrot.lane.b32.xlu1 %v2481_v1, %s2382_s20 }
  0x36   :  { %156 = vrot.lane.b32.xlu0 %v2470_v0, %s2382_s20 }
  0x3d   :  { %260 = vrot.lane.b32.xlu2 %v2470_v0, %s2383_s21  ;;  %238 = vrot.lane.b32.xlu1 %v2504_v2, %s2381_s17 }
  0x3e   :  { %212 = vrot.lane.b32.xlu0 %v2504_v2, %s2379_s15 }
  0x45   :  { %288 = vrot.lane.b32.xlu2 %v2481_v1, %s2384_s22  ;;  %286 = vrot.lane.b32.xlu1 %v2470_v0, %s2384_s22 }
  0x46   :  { %262 = vrot.lane.b32.xlu0 %v2481_v1, %s2383_s21 }
  0x4d   :  { %338 = vrot.lane.b32.xlu2 %v2470_v0, %s2385_s23  ;;  %314 = vrot.lane.b32.xlu1 %v2481_v1, %s2386_s24 }
  0x4e   :  { %312 = vrot.lane.b32.xlu0 %v2470_v0, %s2386_s24 }
  0x55   :  { %102 = vrot.lane.b32.xlu2 %v2539_v3, %s2377_s30  ;;  %75 = vrot.lane.b32.xlu1 %v2539_v3, %s2378_s12 }
  0x56   :  { %340 = vrot.lane.b32.xlu0 %v2481_v1, %s2385_s23 }
  0x5d   :  { %180 = vrot.lane.b32.xlu2 %v2539_v3, %s2380_s16  ;;  %160 = vrot.lane.b32.xlu1 %v2504_v2, %s2382_s20 }
  0x5e   :  { %128 = vrot.lane.b32.xlu0 %v2539_v3, %s2376_s29 }
  0x65   :  { %264 = vrot.lane.b32.xlu2 %v2504_v2, %s2383_s21  ;;  %232 = vrot.lane.b32.xlu1 %v2539_v3, %s2381_s17 }
  0x66   :  { %206 = vrot.lane.b32.xlu0 %v2539_v3, %s2379_s15 }
  0x67   :  { %v2559_v4 = vpop.permute.xlu2 %130 }
  0x68   :  { %5061 = vst [vmem:[#allocation13_spill] sm:$0xff] %v2559_v4 }
  0x6d   :  { %342 = vrot.lane.b32.xlu2 %v2504_v2, %s2385_s23  ;;  %316 = vrot.lane.b32.xlu1 %v2504_v2, %s2386_s24 }
  0x6e   :  { %290 = vrot.lane.b32.xlu0 %v2504_v2, %s2384_s22 }
  0x6f   :  { %v2567_v5 = vpop.permute.xlu2 %132 }
  0x70   :  { %v138_v52 = vsel %vm136_vm0, %v2559_v4, %v2567_v5  ;;  %v598_v4 = vld [vmem:[#allocation2 + $0x2e8] sm:$0xff] }
  0x75   :  { %390 = vrot.lane.b32.xlu2 %v2470_v0, %s2387_s0  ;;  %366 = vrot.lane.b32.xlu1 %v2481_v1, %s2388_s1 }
  0x76   :  { %364 = vrot.lane.b32.xlu0 %v2470_v0, %s2388_s1 }
  0x77   :  { %v2575_v6 = vpop.permute.xlu2 %208 }
  0x78   :  { %5062 = vst [vmem:[#allocation14_spill] sm:$0xff] %v2575_v6 }
  0x7d   :  { %433 = vrot.lane.b32.xlu2 %v2504_v2, %s2389_s6  ;;  %431 = vrot.lane.b32.xlu1 %v2481_v1, %s2389_s6 }
  0x7e   :  { %392 = vrot.lane.b32.xlu0 %v2481_v1, %s2387_s0 }
  0x7f   :  { %v2583_v7 = vpop.permute.xlu2 %236  ;;  %v2585_v8 = vpop.permute.xlu1 %104 }
  0x80   :  { %v2587_v9 = vpop.permute.xlu0 %77 }
  0x85   :  { %284 = vrot.lane.b32.xlu2 %v2539_v3, %s2384_s22  ;;  %258 = vrot.lane.b32.xlu1 %v2539_v3, %s2383_s21 }
  0x86   :  { %154 = vrot.lane.b32.xlu0 %v2539_v3, %s2382_s20 }
  0x87   :  { %v2595_v10 = vpop.permute.xlu2 %134  ;;  %v2597_v11 = vpop.permute.xlu1 %106 }
  0x88   :  { %5063 = vst [vmem:[#allocation15_spill] sm:$0xff] %v2595_v10  ;;  %v2599_v12 = vpop.permute.xlu0 %79  ;;  %v137_v58 = vsel %vm136_vm0, %v2567_v5, %v2595_v10  ;;  %v112_v62 = vsel %vm110_vm2, %v2585_v8, %v2597_v11 }
  0x89   :  { %v87_v45 = vsel %vm85_vm3, %v2587_v9, %v2599_v12 }
  0x8d   :  { %368 = vrot.lane.b32.xlu2 %v2504_v2, %s2388_s1  ;;  %336 = vrot.lane.b32.xlu1 %v2539_v3, %s2385_s23 }
  0x8e   :  { %310 = vrot.lane.b32.xlu0 %v2539_v3, %s2386_s24 }
  0x8f   :  { %v2607_v13 = vpop.permute.xlu2 %186  ;;  %v2609_v14 = vpop.permute.xlu1 %184 }
  0x90   :  { %v2611_v15 = vpop.permute.xlu0 %182 }
  0x91   :  { %v190_v55 = vsel %vm188_vm1, %v2611_v15, %v2609_v14 }
  0x95   :  { %457 = vrot.lane.b32.xlu2 %v2481_v1, %s2390_s13  ;;  %427 = vrot.lane.b32.xlu1 %v2539_v3, %s2389_s6 }
  0x96   :  { %394 = vrot.lane.b32.xlu0 %v2504_v2, %s2387_s0 }
  0x97   :  { %v2619_v16 = vpop.permute.xlu2 %260  ;;  %v2621_v17 = vpop.permute.xlu1 %234 }
  0x98   :  { %5064 = vst [vmem:[#allocation16_spill] sm:$0xff] %v2621_v17  ;;  %v2623_v18 = vpop.permute.xlu0 %210  ;;  %v242_v5 = vsel %vm240_vm4, %v2621_v17, %v2583_v7  ;;  %v585_v17 = vld [vmem:[#allocation2 + $0x2c8] sm:$0xff] }
  0x99   :  { %v2776_v10 = vmul.f32 %v585_v17, %v190_v55 }
  0x9b   :  { %5083 = vst [vmem:[#allocation35_spill] sm:$0xff] %v2776_v10 }
  0x9d   :  { %485 = vrot.lane.b32.xlu2 %v2504_v2, %s2391_s14  ;;  %483 = vrot.lane.b32.xlu1 %v2481_v1, %s2391_s14 }
  0x9e   :  { %459 = vrot.lane.b32.xlu0 %v2504_v2, %s2390_s13 }
  0x9f   :  { %v2631_v19 = vpop.permute.xlu2 %288  ;;  %v2633_v20 = vpop.permute.xlu1 %108 }
  0xa0   :  { %v2635_v21 = vpop.permute.xlu0 %81 }
  0xa5   :  { %362 = vrot.lane.b32.xlu2 %v2539_v3, %s2388_s1  ;;  %511 = vrot.lane.b32.xlu1 %v2504_v2, %s2392_s18 }
  0xa6   :  { %509 = vrot.lane.b32.xlu0 %v2481_v1, %s2392_s18 }
  0xa7   :  { %v2643_v22 = vpop.permute.xlu2 %338  ;;  %v2645_v23 = vpop.permute.xlu1 %158 }
  0xa8   :  { %5065 = vst [vmem:[#allocation17_spill] sm:$0xff] %v2643_v22  ;;  %v2647_v24 = vpop.permute.xlu0 %156 }
  0xad   :  { %453 = vrot.lane.b32.xlu2 %v2539_v3, %s2390_s13  ;;  %429 = vrot.lane.b32.xlu1 %v2470_v0, %s2389_s6 }
  0xae   :  { %388 = vrot.lane.b32.xlu0 %v2539_v3, %s2387_s0 }
  0xaf   :  { %v2655_v25 = vpop.permute.xlu1 %238  ;;  %v2657_v26 = vpop.permute.xlu2 %102 }
  0xb0   :  { %v2659_v27 = vpop.permute.xlu0 %212 }
  0xb5   :  { %455 = vrot.lane.b32.xlu2 %v2470_v0, %s2390_s13  ;;  %505 = vrot.lane.b32.xlu1 %v2539_v3, %s2392_s18 }
  0xb6   :  { %479 = vrot.lane.b32.xlu0 %v2539_v3, %s2391_s14  ;;  %v248_v3 = vld [vmem:[#allocation2 + $0xd0] sm:$0xff] }
  0xb7   :  { %v2667_v28 = vpop.permute.xlu1 %286  ;;  %v2669_v29 = vpop.permute.xlu2 %180 }
  0xb8   :  { %v2671_v30 = vpop.permute.xlu0 %262 }
  0xbd   :  { %507 = vrot.lane.b32.xlu1 %v2470_v0, %s2392_s18 }
  0xbe   :  { %481 = vrot.lane.b32.xlu0 %v2470_v0, %s2391_s14  ;;  %v222_v0 = vld [vmem:[#allocation2 + $0xb0] sm:$0xff] }
  0xbf   :  { %v2677_v31 = vpop.permute.xlu1 %314  ;;  %v2679_v32 = vpop.permute.xlu2 %264 }
  0xc0   :  { %v2681_v33 = vpop.permute.xlu0 %312 }
  0xc7   :  { %v2683_v34 = vpop.permute.xlu1 %75  ;;  %v2687_v36 = vpop.permute.xlu2 %342 }
  0xc8   :  { %v2685_v35 = vpop.permute.xlu0 %340 }
  0xcf   :  { %v2689_v37 = vpop.permute.xlu1 %160  ;;  %v2693_v39 = vpop.permute.xlu2 %390 }
  0xd0   :  { %v2691_v38 = vpop.permute.xlu0 %128  ;;  %5067 = vst [vmem:[#allocation19_spill] sm:$0xff] %v2693_v39 }
  0xd1   :  { %5066 = vst [vmem:[#allocation18_spill] sm:$0xff] %v2691_v38  ;;  %v547_v38 = vld [vmem:[#allocation2 + $0x270] sm:$0xff] }
  0xd7   :  { %v2695_v40 = vpop.permute.xlu1 %232  ;;  %v2699_v42 = vpop.permute.xlu2 %433 }
  0xd8   :  { %5068 = vst [vmem:[#allocation20_spill] sm:$0xff] %v2695_v40  ;;  %v2697_v41 = vpop.permute.xlu0 %206  ;;  %v2761_v40 = vmul.f32 %v560_v57, %v137_v58 }
  0xd9   :  { %5069 = vst [vmem:[#allocation21_spill] sm:$0xff] %v2697_v41  ;;  %v2759_v41 = vmul.f32 %v145_v53, %v137_v58 }
  0xda   :  { %5070 = vst [vmem:[#allocation22_spill] sm:$0xff] %v2699_v42  ;;  %v200_v42 = vmul.f32 %v196_v54, %v190_v55  ;;  %v2768_v54 = vmul.f32 %v546_v60, %v112_v62  ;;  %v170_v55 = vld [vmem:[#allocation2 + $0x70] sm:$0xff] }
  0xdb   :  { %5080 = vst [vmem:[#allocation32_spill] sm:$0xff] %v2761_v40 }
  0xdc   :  { %5081 = vst [vmem:[#allocation33_spill] sm:$0xff] %v2768_v54 }
  0xdf   :  { %v2701_v43 = vpop.permute.xlu1 %316  ;;  %v2705_v46 = vpop.permute.xlu2 %284 }
  0xe0   :  { %5071 = vst [vmem:[#allocation23_spill] sm:$0xff] %v2701_v43  ;;  %v2703_v44 = vpop.permute.xlu0 %290  ;;  %v197_v43 = vld [vmem:[#allocation2 + $0x98] sm:$0xff] }
  0xe1   :  { %5072 = vst [vmem:[#allocation24_spill] sm:$0xff] %v2703_v44  ;;  %v216_v44 = vsel %vm214_vm5, %v2575_v6, %v2623_v18  ;;  %v93_v6 = vld [vmem:[#allocation2 + $0x18] sm:$0xff] }
  0xe2   :  { %5073 = vst [vmem:[#allocation25_spill] sm:$0xff] %v2705_v46  ;;  %v586_v46 = vld [vmem:[#allocation2 + $0x2d0] sm:$0xff]  ;;  %v2784_v60 = vmul.f32 %v598_v4, %v216_v44 }
  0xe4   :  { %5085 = vst [vmem:[#allocation37_spill] sm:$0xff] %v2784_v60  ;;  %v300_v60 = vld [vmem:[#allocation2 + $0x110] sm:$0xff] }
  0xe7   :  { %v2707_v47 = vpop.permute.xlu1 %366  ;;  %v2751_v39 = vpop.permute.xlu2 %368 }
  0xe8   :  { %5074 = vst [vmem:[#allocation26_spill] sm:$0xff] %v2707_v47  ;;  %v2711_v49 = vpop.permute.xlu0 %364  ;;  %v533_v47 = vld [vmem:[#allocation2 + $0x248] sm:$0xff] }
  0xe9   :  { %5075 = vst [vmem:[#allocation27_spill] sm:$0xff] %v2711_v49  ;;  %v2753_v49 = vmul.f32 %v559_v51, %v138_v52  ;;  %v122_v51 = vmul.f32 %v118_v59, %v112_v62  ;;  %v2770_v53 = vmul.f32 %v533_v47, %v87_v45  ;;  %v534_v47 = vld [vmem:[#allocation2 + $0x250] sm:$0xff] }
  0xea   :  { %5078 = vst [vmem:[#allocation30_spill] sm:$0xff] %v2751_v39  ;;  %v252_v39 = vmul.f32 %v248_v3, %v242_v5  ;;  %v111_v3 = vsel %vm110_vm2, %v2597_v11, %v2633_v20  ;;  %v417_v11 = vld [vmem:[#allocation2 + $0x1b0] sm:$0xff] }
  0xeb   :  { %5079 = vst [vmem:[#allocation31_spill] sm:$0xff] %v2753_v49  ;;  %v611_v49 = vld [vmem:[#allocation2 + $0x308] sm:$0xff] }
  0xec   :  { %5082 = vst [vmem:[#allocation34_spill] sm:$0xff] %v2770_v53  ;;  %v274_v53 = vld [vmem:[#allocation2 + $0xf0] sm:$0xff] }
  0xef   :  { %v2727_v56 = vpop.permute.xlu1 %431 }
  0xf0   :  { %5076 = vst [vmem:[#allocation28_spill] sm:$0xff] %v2727_v56  ;;  %v2733_v61 = vpop.permute.xlu0 %392  ;;  %v189_v56 = vsel %vm188_vm1, %v2609_v14, %v2607_v13  ;;  %v226_v14 = vmul.f32 %v222_v0, %v216_v44  ;;  %v2782_v0 = vmul.f32 %v611_v49, %v242_v5  ;;  %v2801_v49 = vmul.f32 %v547_v38, %v111_v3  ;;  %v599_v38 = vld [vmem:[#allocation2 + $0x2f0] sm:$0xff]  ;;  %v116_v5 = vld [vmem:[#allocation2 + $0x20] sm:$0xff] }
  0xf1   :  { %5077 = vst [vmem:[#allocation29_spill] sm:$0xff] %v2733_v61  ;;  %v148_v61 = vmul.f32 %v144_v50, %v138_v52  ;;  %v86_v50 = vsel %vm85_vm3, %v2599_v12, %v2635_v21  ;;  %v96_v52 = vmul.f32 %v92_v63, %v87_v45  ;;  %v201_v57 = vmul.f32 %v197_v43, %v189_v56  ;;  %v119_v12 = vld [vmem:[#allocation2 + $0x38] sm:$0xff]  ;;  %v612_v45 = vld [vmem:[#allocation2 + $0x310] sm:$0xff] }
  0xf2   :  { %v2772_v58 = vmul.f32 %v586_v46, %v189_v56  ;;  %v97_v59 = vmul.f32 %v93_v6, %v86_v50  ;;  %5084 = vst [vmem:[#allocation36_spill] sm:$0xff] %v2782_v0  ;;  %v2792_v43 = vadd.f32 %v226_v14, %v122_v51  ;;  %v249_v46 = vld [vmem:[#allocation2 + $0xd8] sm:$0xff]  ;;  %v241_v6 = vsel %vm240_vm4, %v2583_v7, %v2655_v25  ;;  %v572_v56 = vld [vmem:[#allocation2 + $0x2a8] sm:$0xff] }
  0xf3   :  { %v2774_v40 = vadd.f32 %v200_v42, %v96_v52  ;;  %v2790_v17 = vadd.f32 %v252_v39, %v148_v61  ;;  %v123_v44 = vmul.f32 %v119_v12, %v111_v3  ;;  %v164_v39 = vsel %vm162_vm6, %v2647_v24, %v2645_v23  ;;  %v223_v61 = vld [vmem:[#allocation2 + $0xb8] sm:$0xff]  ;;  %v117_v14 = vld [vmem:[#allocation2 + $0x28] sm:$0xff]  ;;  %v545_v12 = vld [vmem:[#allocation2 + $0x260] sm:$0xff]  ;;  %v2828_v3 = vpop.permute.xlu2 %457 }
  0xf4   :  { %v215_v7 = vsel %vm214_vm5, %v2623_v18, %v2659_v27  ;;  %v2811_v62 = vadd.f32 %v201_v57, %v97_v59  ;;  %v2813_v63 = vmul.f32 %v534_v47, %v86_v50  ;;  %v114_v51 = vsel %vm110_vm2, %v2633_v20, %v2657_v26  ;;  %v326_v50 = vld [vmem:[#allocation2 + $0x130] sm:$0xff]  ;;  %v548_v0 = vld [vmem:[#allocation2 + $0x278] sm:$0xff] }
  0xf5   :  { %v253_v52 = vmul.f32 %v249_v46, %v241_v6  ;;  %v113_v18 = vsel %vm110_vm2, %v2657_v26, %v2585_v8  ;;  %v320_v57 = vsel %vm318_vm9, %v2681_v33, %v2677_v31  ;;  %v2831_v20 = vmul.f32 %v417_v11, %v2481_v1 }
  0xf6   :  { %v174_v59 = vmul.f32 %v170_v55, %v164_v39  ;;  %v2833_v47 = vmul.f32 %v572_v56, %v164_v39  ;;  %v227_v46 = vmul.f32 %v223_v61, %v215_v7  ;;  %v294_v8 = vsel %vm4952_vm7, %v2667_v28, %v2631_v19  ;;  %v637_v56 = vld [vmem:[#allocation2 + $0x348] sm:$0xff]  ;;  %v194_v61 = vld [vmem:[#allocation2 + $0x80] sm:$0xff] }
  0xf7   :  { %v2788_v42 = vpop.permute.xlu1 %258  ;;  %v2839_v26 = vmul.f32 %v612_v45, %v241_v6  ;;  %v2841_v54 = vmul.f32 %v599_v38, %v215_v7  ;;  %v2843_v10 = vmul.f32 %v116_v5, %v114_v51  ;;  %v268_v1 = vsel %vm266_vm8, %v2619_v16, %v2671_v30  ;;  %v624_v39 = vld [vmem:[#allocation2 + $0x328] sm:$0xff] }
  0xf8   :  { %v2799_v4 = vpop.permute.xlu0 %154  ;;  %5086 = vst [vmem:[#allocation38_spill] sm:$0xff] %v2833_v47  ;;  %v2849_v11 = vmul.f32 %v117_v14, %v113_v18  ;;  %v2851_v55 = vmul.f32 %v545_v12, %v113_v18  ;;  %v192_v6 = vsel %vm188_vm1, %v2607_v13, %v2669_v29  ;;  %v330_v7 = vmul.f32 %v326_v50, %v320_v57  ;;  %v195_v47 = vld [vmem:[#allocation2 + $0x88] sm:$0xff]  ;;  %v90_v13 = vld [vmem:[#allocation2] sm:$0xff] }
  0xf9   :  { %5087 = vst [vmem:[#allocation39_spill] sm:$0xff] %v2839_v26  ;;  %v2858_v45 = vadd.f32 %v253_v52, %v2759_v41  ;;  %v2860_v38 = vmul.f32 %v548_v0, %v114_v51  ;;  %v304_v5 = vmul.f32 %v300_v60, %v294_v8  ;;  %v191_v14 = vsel %vm188_vm1, %v2669_v29, %v2611_v15  ;;  %v584_v26 = vld [vmem:[#allocation2 + $0x2c0] sm:$0xff]  ;;  %v91_v50 = vld [vmem:[#allocation2 + $0x8] sm:$0xff]  ;;  %v275_v51 = vld [vmem:[#allocation2 + $0xf8] sm:$0xff] }
  0xfa   :  { %5088 = vst [vmem:[#allocation40_spill] sm:$0xff] %v2841_v54  ;;  %v2868_v18 = vadd.f32 %v227_v46, %v123_v44  ;;  %v88_v41 = vsel %vm85_vm3, %v2683_v34, %v2587_v9  ;;  %v89_v0 = vsel %vm85_vm3, %v2635_v21, %v2683_v34  ;;  %v2880_v15 = vmul.f32 %v637_v56, %v294_v8  ;;  %v625_v52 = vld [vmem:[#allocation2 + $0x330] sm:$0xff]  ;;  %v353_v34 = vld [vmem:[#allocation2 + $0x158] sm:$0xff] }
  0xfb   :  { %5089 = vst [vmem:[#allocation41_spill] sm:$0xff] %v2851_v55  ;;  %v278_v55 = vmul.f32 %v274_v53, %v268_v1  ;;  %v2882_v29 = vmul.f32 %v624_v39, %v268_v1  ;;  %v587_v53 = vld [vmem:[#allocation2 + $0x2d8] sm:$0xff]  ;;  %v198_v44 = vmul.f32 %v194_v61, %v192_v6  ;;  %v267_v9 = vsel %vm266_vm8, %v2671_v30, %v2679_v32 }
  0xfc   :  { %5090 = vst [vmem:[#allocation42_spill] sm:$0xff] %v2860_v38  ;;  %v199_v57 = vmul.f32 %v195_v47, %v191_v14  ;;  %v334_v46 = vadd.f32 %v330_v7, %v2792_v43  ;;  %v352_v38 = vld [vmem:[#allocation2 + $0x150] sm:$0xff]  ;;  %v346_v21 = vsel %vm344_vm10, %v2643_v22, %v2685_v35  ;;  %v345_v8 = vsel %vm344_vm10, %v2685_v35, %v2687_v36  ;;  %v418_v1 = vld [vmem:[#allocation2 + $0x1b8] sm:$0xff]  ;;  %v532_v47 = vld [vmem:[#allocation2 + $0x240] sm:$0xff] }
  0xfd   :  { %5092 = vst [vmem:[#allocation44_spill] sm:$0xff] %v2880_v15  ;;  %v2898_v56 = vadd.f32 %v304_v5, %v2774_v40  ;;  %v2900_v30 = vmul.f32 %v584_v26, %v191_v14  ;;  %v535_v43 = vld [vmem:[#allocation2 + $0x258] sm:$0xff]  ;;  %v94_v39 = vmul.f32 %v90_v13, %v89_v0  ;;  %v95_v61 = vmul.f32 %v91_v50, %v88_v41  ;;  %v2912_v26 = vpop.permute.xlu2 %485  ;;  %v142_v13 = vld [vmem:[#allocation2 + $0x40] sm:$0xff] }
  0xfe   :  { %5093 = vst [vmem:[#allocation45_spill] sm:$0xff] %v2882_v29  ;;  %v2902_v7 = vadd.f32 %v278_v55, %v174_v59  ;;  %v2904_v29 = vmul.f32 %v587_v53, %v192_v6  ;;  %v279_v15 = vmul.f32 %v275_v51, %v267_v9  ;;  %v2906_v22 = vmul.f32 %v625_v52, %v267_v9  ;;  %v171_v35 = vld [vmem:[#allocation2 + $0x78] sm:$0xff]  ;;  %v5100_v53 = vld [vmem:[#allocation15_spill] sm:$0xff]  ;;  %v5101_v52 = vld [vmem:[#allocation13_spill] sm:$0xff] }
  0xff   :  { %v2866_v12 = vpop.permute.xlu1 %336  ;;  %5094 = vst [vmem:[#allocation46_spill] sm:$0xff] %v2900_v30  ;;  %v356_v54 = vmul.f32 %v352_v38, %v346_v21  ;;  %v163_v40 = vsel %vm162_vm6, %v2645_v23, %v2689_v37  ;;  %v2915_v5 = vmul.f32 %v418_v1, %v2504_v2  ;;  %v2917_v59 = vmul.f32 %v532_v47, %v88_v41  ;;  %v143_v23 = vld [vmem:[#allocation2 + $0x48] sm:$0xff]  ;;  %v5099_v50 = vld [vmem:[#allocation18_spill] sm:$0xff]  ;;  %v573_v41 = vld [vmem:[#allocation2 + $0x2b0] sm:$0xff] }
 0x100   :  { %5091 = vst [vmem:[#allocation43_spill] sm:$0xff] %v2866_v12  ;;  %v2878_v60 = vpop.permute.xlu0 %310  ;;  %v357_v12 = vmul.f32 %v353_v34, %v345_v8  ;;  %v2919_v55 = vmul.f32 %v535_v43, %v89_v0  ;;  %v2923_v6 = vadd.f32 %v2831_v20, %v334_v46  ;;  %v2925_v38 = vadd.f32 %v198_v44, %v94_v39  ;;  %v558_v51 = vld [vmem:[#allocation2 + $0x280] sm:$0xff]  ;;  %v5102_v46 = vld [vmem:[#allocation16_spill] sm:$0xff]  ;;  %v561_v39 = vld [vmem:[#allocation2 + $0x298] sm:$0xff] }
 0x101   :  { %5095 = vst [vmem:[#allocation47_spill] sm:$0xff] %v2904_v29  ;;  %v2927_v14 = vadd.f32 %v199_v57, %v95_v61  ;;  %v140_v2 = vsel %vm136_vm0, %v5100_v53, %v5099_v50  ;;  %v139_v20 = vsel %vm136_vm0, %v5099_v50, %v5101_v52  ;;  %v175_v44 = vmul.f32 %v171_v35, %v163_v40  ;;  %v246_v9 = vld [vmem:[#allocation2 + $0xc0] sm:$0xff]  ;;  %v247_v57 = vld [vmem:[#allocation2 + $0xc8] sm:$0xff]  ;;  %v5107_v50 = vld [vmem:[#allocation14_spill] sm:$0xff] }
 0x102   :  { %5096 = vst [vmem:[#allocation48_spill] sm:$0xff] %v2906_v22  ;;  %v5103_v21 = vld [vmem:[#allocation20_spill] sm:$0xff]  ;;  %v360_v47 = vadd.f32 %v356_v54, %v2790_v17  ;;  %v2954_v43 = vadd.f32 %v357_v12, %v2858_v45  ;;  %v220_v61 = vld [vmem:[#allocation2 + $0xa0] sm:$0xff]  ;;  %v5108_v53 = vld [vmem:[#allocation21_spill] sm:$0xff]  ;;  %v147_v30 = vmul.f32 %v143_v23, %v139_v20 }
 0x103   :  { %5097 = vst [vmem:[#allocation49_spill] sm:$0xff] %v2917_v59  ;;  %v2944_v34 = vsel %vm240_vm4, %v5103_v21, %v5102_v46  ;;  %v244_v8 = vsel %vm240_vm4, %v2655_v25, %v5103_v21  ;;  %v221_v35 = vld [vmem:[#allocation2 + $0xa8] sm:$0xff]  ;;  %v217_v52 = vsel %vm214_vm5, %v5108_v53, %v5107_v50  ;;  %v218_v25 = vsel %vm214_vm5, %v2659_v27, %v5108_v53  ;;  %v443_v54 = vld [vmem:[#allocation2 + $0x1d0] sm:$0xff]  ;;  %v5110_v17 = vld [vmem:[#allocation22_spill] sm:$0xff] }
 0x104   :  { %5098 = vst [vmem:[#allocation50_spill] sm:$0xff] %v2919_v55  ;;  %v146_v46 = vmul.f32 %v142_v13, %v140_v2  ;;  %v2964_v21 = vmul.f32 %v573_v41, %v163_v40  ;;  %v5111_v45 = vld [vmem:[#allocation28_spill] sm:$0xff]  ;;  %v2971_v59 = vmul.f32 %v558_v51, %v139_v20  ;;  %v597_v50 = vld [vmem:[#allocation2 + $0x2e0] sm:$0xff]  ;;  %v250_v29 = vmul.f32 %v246_v9, %v244_v8  ;;  %v600_v40 = vld [vmem:[#allocation2 + $0x2f8] sm:$0xff] }
 0x105   :  { %5104 = vst [vmem:[#allocation18_spill] sm:$0xff] %v2944_v34  ;;  %v436_v12 = vsel %vm435_vm12, %v5111_v45, %v5110_v17  ;;  %v251_v55 = vmul.f32 %v247_v57, %v2944_v34  ;;  %v2976_v27 = vadd.f32 %v279_v15, %v175_v44  ;;  %v224_v13 = vmul.f32 %v220_v61, %v218_v25  ;;  %v299_v53 = vld [vmem:[#allocation2 + $0x108] sm:$0xff]  ;;  %v5114_v22 = vld [vmem:[#allocation25_spill] sm:$0xff]  ;;  %v327_v23 = vld [vmem:[#allocation2 + $0x138] sm:$0xff] }
 0x106   :  { %5106 = vst [vmem:[#allocation13_spill] sm:$0xff] %v2954_v43  ;;  %v2974_v43 = vmul.f32 %v561_v39, %v140_v2  ;;  %v225_v41 = vmul.f32 %v221_v35, %v217_v52  ;;  %v295_v45 = vsel %vm4952_vm7, %v5114_v22, %v2667_v28  ;;  %v5115_v51 = vld [vmem:[#allocation23_spill] sm:$0xff]  ;;  %v378_v9 = vld [vmem:[#allocation2 + $0x170] sm:$0xff]  ;;  %v5116_v2 = vld [vmem:[#allocation26_spill] sm:$0xff]  ;;  %v447_v44 = vmul.f32 %v443_v54, %v436_v12 }
 0x107   :  { %v2934_v0 = vpop.permute.xlu1 %427  ;;  %5109 = vst [vmem:[#allocation16_spill] sm:$0xff] %v2964_v21  ;;  %v319_v20 = vsel %vm318_vm9, %v2677_v31, %v5115_v51  ;;  %v5117_v57 = vld [vmem:[#allocation27_spill] sm:$0xff]  ;;  %v2990_v39 = vmul.f32 %v597_v50, %v217_v52  ;;  %v404_v61 = vld [vmem:[#allocation2 + $0x190] sm:$0xff]  ;;  %v2998_v31 = vmul.f32 %v600_v40, %v218_v25  ;;  %v613_v34 = vld [vmem:[#allocation2 + $0x318] sm:$0xff]  ;;  %v3008_v50 = vpop.permute.xlu2 %362 }
 0x108   :  { %v2950_v1 = vpop.permute.xlu0 %394  ;;  %5112 = vst [vmem:[#allocation20_spill] sm:$0xff] %v2971_v59  ;;  %v372_v15 = vsel %vm4954_vm11, %v5117_v57, %v5116_v2  ;;  %v5119_v35 = vld [vmem:[#allocation29_spill] sm:$0xff]  ;;  %v5120_v59 = vld [vmem:[#allocation19_spill] sm:$0xff]  ;;  %v301_v54 = vld [vmem:[#allocation2 + $0x118] sm:$0xff] }
 0x109   :  { %5105 = vst [vmem:[#allocation15_spill] sm:$0xff] %v2950_v1  ;;  %v398_v28 = vsel %vm396_vm13, %v5120_v59, %v5119_v35  ;;  %v3002_v1 = vadd.f32 %v251_v55, %v147_v30  ;;  %v5124_v52 = vld [vmem:[#allocation24_spill] sm:$0xff]  ;;  %v638_v35 = vld [vmem:[#allocation2 + $0x350] sm:$0xff]  ;;  %v298_v57 = vld [vmem:[#allocation2 + $0x100] sm:$0xff]  ;;  %v303_v30 = vmul.f32 %v299_v53, %v295_v45  ;;  %v331_v55 = vmul.f32 %v327_v23, %v319_v20 }
 0x10a   :  { %5113 = vst [vmem:[#allocation14_spill] sm:$0xff] %v2974_v43  ;;  %v3000_v43 = vadd.f32 %v250_v29, %v146_v46  ;;  %v293_v12 = vsel %vm4952_vm7, %v2631_v19, %v5124_v52  ;;  %v636_v25 = vld [vmem:[#allocation2 + $0x340] sm:$0xff]  ;;  %v296_v29 = vsel %vm4952_vm7, %v5124_v52, %v5114_v22  ;;  %v382_v46 = vmul.f32 %v378_v9, %v372_v15  ;;  %v5127_v52 = vld [vmem:[#allocation30_spill] sm:$0xff] }
 0x10b   :  { %5118 = vst [vmem:[#allocation21_spill] sm:$0xff] %v2990_v39  ;;  %v469_v39 = vld [vmem:[#allocation2 + $0x1f0] sm:$0xff]  ;;  %v408_v19 = vmul.f32 %v404_v61, %v398_v28  ;;  %v3027_v22 = vadd.f32 %v224_v13, %v2843_v10  ;;  %v3030_v53 = vadd.f32 %v225_v41, %v2849_v11  ;;  %v3032_v23 = vmul.f32 %v613_v34, %v244_v8  ;;  %v379_v28 = vld [vmem:[#allocation2 + $0x178] sm:$0xff]  ;;  %v416_v41 = vld [vmem:[#allocation2 + $0x1a8] sm:$0xff] }
 0x10c   :  { %5121 = vst [vmem:[#allocation22_spill] sm:$0xff] %v2998_v31  ;;  %v639_v31 = vld [vmem:[#allocation2 + $0x358] sm:$0xff]  ;;  %v305_v20 = vmul.f32 %v301_v54, %v293_v12  ;;  %v642_v9 = vmul.f32 %v638_v35, %v293_v12  ;;  %v302_v15 = vmul.f32 %v298_v57, %v296_v29  ;;  %v371_v10 = vsel %vm4954_vm11, %v5116_v2, %v5127_v52  ;;  %v415_v57 = vld [vmem:[#allocation2 + $0x1a0] sm:$0xff]  ;;  %v169_v54 = vld [vmem:[#allocation2 + $0x68] sm:$0xff] }
 0x10d   :  { %5122 = vst [vmem:[#allocation25_spill] sm:$0xff] %v3000_v43  ;;  %v3036_v61 = vmul.f32 %v639_v31, %v296_v29  ;;  %v386_v13 = vadd.f32 %v382_v46, %v2902_v7  ;;  %v3044_v34 = vadd.f32 %v303_v30, %v2927_v14  ;;  %v335_v8 = vadd.f32 %v331_v55, %v2868_v18  ;;  %v272_v35 = vld [vmem:[#allocation2 + $0xe0] sm:$0xff]  ;;  %v574_v12 = vld [vmem:[#allocation2 + $0x2b8] sm:$0xff]  ;;  %v5130_v29 = vld [vmem:[#allocation12_spill] sm:$0xff] }
 0x10e   :  { %5123 = vst [vmem:[#allocation23_spill] sm:$0xff] %v3002_v1  ;;  %v451_v1 = vadd.f32 %v447_v44, %v360_v47  ;;  %v3034_v44 = vmul.f32 %v636_v25, %v295_v45  ;;  %v166_v2 = vsel %vm162_vm6, %v2689_v37, %v2799_v4  ;;  %v270_v7 = vsel %vm266_vm8, %v2679_v32, %v2788_v42  ;;  %v5128_v37 = vld [vmem:[#allocation11_spill] sm:$0xff]  ;;  %v626_v46 = vld [vmem:[#allocation2 + $0x338] sm:$0xff] }
 0x10f   :  { %5125 = vst [vmem:[#allocation26_spill] sm:$0xff] %v3008_v50  ;;  %v3010_v59 = vpop.permute.xlu1 %483  ;;  %v495_v50 = vld [vmem:[#allocation2 + $0x210] sm:$0xff]  ;;  %vm4956_vm7 = vcmp.lt.s32.totalorder %v2709_v48, 119  ;;  %v3059_v18 = vadd.f32 %v305_v20, %v2811_v62  ;;  %v3067_v31 = vmul.f32 %v416_v41, %v5128_v37  ;;  %v3073_v32 = vsel %vm162_vm6, %v2799_v4, %v2647_v24  ;;  %v273_v62 = vld [vmem:[#allocation2 + $0xe8] sm:$0xff] }
 0x110   :  { %v3016_v40 = vpop.permute.xlu0 %459  ;;  %v488_v21 = vsel %vm4957_vm15, %v3010_v59, %v2912_v26  ;;  %5126 = vst [vmem:[#allocation24_spill] sm:$0xff] %v3034_v44  ;;  %v542_v45 = vadd.f32 %v2813_v63, %v451_v1  ;;  %v3062_v63 = vadd.f32 %v302_v15, %v2925_v38  ;;  %v521_v1 = vld [vmem:[#allocation2 + $0x230] sm:$0xff]  ;;  %v3079_v38 = vsel %vm266_vm8, %v2788_v42, %v2619_v16  ;;  %v444_v16 = vld [vmem:[#allocation2 + $0x1d8] sm:$0xff]  ;;  %v5134_v37 = vld [vmem:[#allocation40_spill] sm:$0xff] }
 0x111   :  { %v462_v43 = vsel %vm461_vm14, %v2828_v3, %v3016_v40  ;;  %v499_v11 = vmul.f32 %v495_v50, %v488_v21  ;;  %5129 = vst [vmem:[#allocation30_spill] sm:$0xff] %v3079_v38  ;;  %v3084_v30 = vmul.f32 %v415_v57, %v5130_v29  ;;  %v439_v42 = vsel %vm435_vm12, %v5110_v17, %v2934_v0  ;;  %v5138_v29 = vld [vmem:[#allocation15_spill] sm:$0xff] }
 0x112   :  { %v473_v47 = vmul.f32 %v469_v39, %v462_v43  ;;  %v412_v43 = vadd.f32 %v408_v19, %v2898_v56  ;;  %v168_v39 = vld [vmem:[#allocation2 + $0x60] sm:$0xff]  ;;  %v383_v56 = vmul.f32 %v379_v28, %v371_v10  ;;  %v276_v19 = vmul.f32 %v272_v35, %v270_v7  ;;  %v325_v35 = vld [vmem:[#allocation2 + $0x128] sm:$0xff] }
 0x113   :  { %v172_v55 = vmul.f32 %v168_v39, %v166_v2  ;;  %v594_v4 = vadd.f32 %v2772_v58, %v542_v45  ;;  %v3099_v28 = vadd.f32 %v2915_v5, %v335_v8  ;;  %v277_v58 = vmul.f32 %v273_v62, %v3079_v38  ;;  %v5131_v5 = vld [vmem:[#allocation32_spill] sm:$0xff] }
 0x114   :  { %v477_v14 = vadd.f32 %v473_v47, %v386_v13  ;;  %v503_v50 = vadd.f32 %v499_v11, %v412_v43  ;;  %v3086_v47 = vpop.permute.xlu2 %453  ;;  %v387_v10 = vadd.f32 %v383_v56, %v2976_v27  ;;  %v173_v13 = vmul.f32 %v169_v54, %v3073_v32  ;;  %v470_v43 = vld [vmem:[#allocation2 + $0x1f8] sm:$0xff]  ;;  %v324_v27 = vld [vmem:[#allocation2 + $0x120] sm:$0xff]  ;;  %v5133_v56 = vld [vmem:[#allocation16_spill] sm:$0xff] }
 0x115   :  { %v3103_v11 = vmul.f32 %v574_v12, %v166_v2  ;;  %v3106_v41 = vmul.f32 %v626_v46, %v270_v7  ;;  %v465_v17 = vsel %vm461_vm14, %v3016_v40, %v3086_v47  ;;  %v3114_v45 = vadd.f32 %v276_v19, %v172_v55  ;;  %v350_v7 = vld [vmem:[#allocation2 + $0x140] sm:$0xff]  ;;  %v351_v62 = vld [vmem:[#allocation2 + $0x148] sm:$0xff]  ;;  %v5139_v55 = vld [vmem:[#allocation29_spill] sm:$0xff] }
 0x116   :  { %v555_v15 = vadd.f32 %v2801_v49, %v477_v14  ;;  %v568_v8 = vadd.f32 %v5131_v5, %v503_v50  ;;  %v322_v57 = vsel %vm318_vm9, %v5115_v51, %v2878_v60  ;;  %v448_v39 = vmul.f32 %v444_v16, %v439_v42  ;;  %v5135_v12 = vld [vmem:[#allocation27_spill] sm:$0xff]  ;;  %v5136_v51 = vld [vmem:[#allocation26_spill] sm:$0xff]  ;;  %v5137_v50 = vld [vmem:[#allocation17_spill] sm:$0xff] }
 0x117   :  { %v3064_v21 = vpop.permute.xlu1 %511  ;;  %v646_v2 = vadd.f32 %v642_v9, %v594_v4  ;;  %v321_v40 = vsel %vm318_vm9, %v2878_v60, %v2681_v33  ;;  %v373_v9 = vsel %vm4954_vm11, %v5136_v51, %v5135_v12  ;;  %v405_v60 = vld [vmem:[#allocation2 + $0x198] sm:$0xff]  ;;  %v474_v46 = vmul.f32 %v470_v43, %v465_v17  ;;  %v376_v4 = vld [vmem:[#allocation2 + $0x160] sm:$0xff]  ;;  %v5142_v12 = vld [vmem:[#allocation13_spill] sm:$0xff] }
 0x118   :  { %v3081_v25 = vpop.permute.xlu0 %509  ;;  %v607_v54 = vadd.f32 %v5134_v37, %v555_v15  ;;  %v374_v16 = vsel %vm4954_vm11, %v5127_v52, %v5136_v51  ;;  %v281_v52 = vadd.f32 %v277_v58, %v173_v13  ;;  %vm674_vm11 = vcmask 64512  }
 0x119   :  { %v514_v24 = vsel %vm4956_vm7, %v3081_v25, %v3064_v21  ;;  %v380_v51 = vmul.f32 %v376_v4, %v374_v16  ;;  %v478_v38 = vadd.f32 %v474_v46, %v387_v10  ;;  %v5144_v10 = vld [vmem:[#allocation25_spill] sm:$0xff]  ;;  %v496_v4 = vld [vmem:[#allocation2 + $0x218] sm:$0xff] }
 0x11a   :  { %v525_v20 = vmul.f32 %v521_v1, %v514_v24  ;;  %v328_v24 = vmul.f32 %v324_v27, %v322_v57  ;;  %v654_v44 = vadd.f32 %v646_v2, %v607_v54 }
 0x11c   :  { %v529_v49 = vadd.f32 %v525_v20, %v2923_v6  ;;  %v5132_v6 = vld [vmem:[#allocation43_spill] sm:$0xff]  ;;  %v332_v2 = vadd.f32 %v328_v24, %v3027_v22 }
 0x11d   :  { %v348_v14 = vsel %vm344_vm10, %v2687_v36, %v5132_v6  ;;  %v347_v33 = vsel %vm344_vm10, %v5132_v6, %v5137_v50  ;;  %v397_v36 = vsel %vm396_vm13, %v5139_v55, %v5138_v29  ;;  %v5140_v20 = vld [vmem:[#allocation39_spill] sm:$0xff]  ;;  %v329_v6 = vmul.f32 %v325_v35, %v321_v40 }
 0x11e   :  { %v581_v1 = vadd.f32 %v5133_v56, %v529_v49  ;;  %v620_v15 = vadd.f32 %v5140_v20, %v568_v8  ;;  %v5141_v49 = vld [vmem:[#allocation48_spill] sm:$0xff]  ;;  %v354_v37 = vmul.f32 %v350_v7, %v348_v14  ;;  %v452_v50 = vadd.f32 %v448_v39, %v5142_v12  ;;  %v441_v55 = vld [vmem:[#allocation2 + $0x1c0] sm:$0xff]  ;;  %v456_v8 = vpop.permute.xlu2 %455  ;;  %v5145_v14 = vld [vmem:[#allocation50_spill] sm:$0xff] }
 0x11f   :  { %v430_v19 = vpop.permute.xlu1 %429  ;;  %v377_v56 = vld [vmem:[#allocation2 + $0x168] sm:$0xff]  ;;  %v355_v17 = vmul.f32 %v351_v62, %v347_v33  ;;  %v409_v27 = vmul.f32 %v405_v60, %v397_v36  ;;  %v333_v13 = vadd.f32 %v329_v6, %v3030_v53  ;;  %v5146_v62 = vld [vmem:[#allocation23_spill] sm:$0xff]  ;;  %v464_v36 = vsel %vm461_vm14, %v3086_v47, %v456_v8 }
 0x120   :  { %v389_v42 = vpop.permute.xlu0 %388  ;;  %v633_v5 = vadd.f32 %v5141_v49, %v581_v1  ;;  %v438_v43 = vsel %vm435_vm12, %v2934_v0, %v430_v19  ;;  %v442_v20 = vld [vmem:[#allocation2 + $0x1c8] sm:$0xff]  ;;  %v381_v40 = vmul.f32 %v377_v56, %v373_v9  ;;  %v3158_v0 = vld [vmem:[%s4918_s2] sm:$0xff]  ;;  %v358_v58 = vadd.f32 %v354_v37, %v5144_v10 }
 0x121   :  { %v5143_v1 = vld [vmem:[#allocation28_spill] sm:$0xff]  ;;  %v445_v39 = vmul.f32 %v441_v55, %v438_v43  ;;  %v543_v54 = vadd.f32 %v5145_v14, %v452_v50  ;;  %v359_v33 = vadd.f32 %v355_v17, %v5146_v62  ;;  %v413_v9 = vadd.f32 %v409_v27, %v3059_v18  ;;  %v467_v60 = vld [vmem:[#allocation2 + $0x1e0] sm:$0xff]  ;;  %v5148_v18 = vld [vmem:[#allocation42_spill] sm:$0xff] }
 0x122   :  { %v650_v57 = vadd.f32 %v633_v5, %v620_v15  ;;  %v437_v35 = vsel %vm435_vm12, %v430_v19, %v5143_v1  ;;  %v522_v19 = vld [vmem:[#allocation2 + $0x238] sm:$0xff]  ;;  %v463_v22 = vsel %vm461_vm14, %v456_v8, %v2828_v3  ;;  %v5147_v53 = vld [vmem:[#allocation19_spill] sm:$0xff]  ;;  %v556_v15 = vadd.f32 %v5148_v18, %v478_v38  ;;  %v663_v47 = vld [vmem:[%s4919_s3 + $0x8] sm:$0xff] }
 0x123   :  { %v446_v46 = vmul.f32 %v442_v20, %v437_v35  ;;  %v399_v24 = vsel %vm396_vm13, %v389_v42, %v5147_v53  ;;  %v662_v49 = vld [vmem:[%s4919_s3] sm:$0xff]  ;;  %v403_v5 = vld [vmem:[#allocation2 + $0x188] sm:$0xff]  ;;  %v400_v6 = vsel %vm396_vm13, %v5138_v29, %v389_v42  ;;  %v449_v56 = vadd.f32 %v445_v39, %v358_v58  ;;  %v5150_v35 = vld [vmem:[#allocation22_spill] sm:$0xff] }
 0x124   :  { %v658_v7 = vadd.f32 %v654_v44, %v650_v57  ;;  %v468_v44 = vld [vmem:[#allocation2 + $0x1e8] sm:$0xff]  ;;  %v402_v3 = vld [vmem:[#allocation2 + $0x180] sm:$0xff]  ;;  %v2393_v12 = vmov 0   ;;  %v471_v55 = vmul.f32 %v467_v60, %v464_v36  ;;  %v407_v20 = vmul.f32 %v403_v5, %v399_v24  ;;  %v5151_v58 = vld [vmem:[#allocation49_spill] sm:$0xff] }
 0x125   :  { %2288 = vset.pattern.permute.xlu0 %v2393_v12  ;;  %2287 = vset.pattern.permute.xlu2 %v2393_v12  ;;  %v860_v50 = vld [vmem:[%s4921_s5 + $0x8] sm:$0xff]  ;;  %v5149_v29 = vld [vmem:[#allocation47_spill] sm:$0xff]  ;;  %v472_v27 = vmul.f32 %v468_v44, %v463_v22  ;;  %v450_v57 = vadd.f32 %v446_v46, %v359_v33  ;;  %v608_v39 = vadd.f32 %v5150_v35, %v556_v15  ;;  %v5154_v18 = vld [vmem:[#allocation46_spill] sm:$0xff] }
 0x126   :  { %742 = vmatpush.msra.mxu2 %v658_v7  ;;  %v595_v42 = vadd.f32 %v5149_v29, %v543_v54  ;;  %671 = vperm.xlu0 %2288, %v663_v47   ;;  %v384_v7 = vadd.f32 %v380_v51, %v3114_v45  ;;  %v385_v10 = vadd.f32 %v381_v40, %v281_v52  ;;  %v3204_v54 = vld [vmem:[%s4918_s2 + $0x8] sm:$0xff]  ;;  %v519_v45 = vld [vmem:[#allocation2 + $0x220] sm:$0xff]  ;;  %v5152_v51 = vld [vmem:[#allocation14_spill] sm:$0xff] }
 0x127   :  { %v506_v16 = vpop.permute.xlu1 %505  ;;  %2252 = vmatmul.msk.f32.vlgmr.msra.gmra.mxu2 %vm674_vm11, %v3158_v0  ;;  %666 = vperm.xlu2 %2287, %v662_v49   ;;  %v540_v14 = vadd.f32 %v5151_v58, %v449_v56  ;;  %v424_v62 = vadd.f32 %v3067_v31, %v333_v13  ;;  %v423_v33 = vadd.f32 %v3084_v30, %v332_v2  ;;  %v520_v52 = vld [vmem:[#allocation2 + $0x228] sm:$0xff]  ;;  %v493_v2 = vld [vmem:[#allocation2 + $0x200] sm:$0xff]  ;;  %v5160_v35 = vld [vmem:[#allocation38_spill] sm:$0xff] }
 0x128   :  { %v480_v37 = vpop.permute.xlu0 %479  ;;  %v517_v38 = vsel %vm4956_vm7, %v3064_v21, %v506_v16  ;;  %2289 = vset.pattern.permute.xlu1 %v2393_v12  ;;  %v406_v21 = vmul.f32 %v402_v3, %v400_v6  ;;  %v647_v60 = vadd.f32 %v3036_v61, %v595_v42  ;;  %v475_v44 = vadd.f32 %v471_v55, %v384_v7  ;;  %v571_v53 = vld [vmem:[#allocation2 + $0x2a0] sm:$0xff]  ;;  %v5161_v7 = vld [vmem:[#allocation20_spill] sm:$0xff] }
 0x129   :  { %v491_v43 = vsel %vm4957_vm15, %v2912_v26, %v480_v37  ;;  %v526_v17 = vmul.f32 %v522_v19, %v517_v38  ;;  %868 = vperm.xlu1 %2289, %v860_v50   ;;  %v476_v36 = vadd.f32 %v472_v27, %v385_v10  ;;  %v859_v19 = vld [vmem:[%s4921_s5] sm:$0xff]  ;;  %v411_v30 = vadd.f32 %v407_v20, %v3044_v34 }
 0x12a   :  { %v500_v8 = vmul.f32 %v496_v4, %v491_v43  ;;  %v410_v31 = vadd.f32 %v406_v21, %v3062_v63  ;;  %v655_v22 = vadd.f32 %v647_v60, %v608_v39  ;;  %v592_v15 = vadd.f32 %v5154_v18, %v540_v14  ;;  %v610_v5 = vld [vmem:[#allocation2 + $0x300] sm:$0xff]  ;;  %v5156_v43 = vld [vmem:[#allocation41_spill] sm:$0xff]  ;;  %v5159_v21 = vld [vmem:[#allocation30_spill] sm:$0xff] }
 0x12b   :  { %v530_v1 = vadd.f32 %v526_v17, %v3099_v28  ;;  %v623_v6 = vld [vmem:[#allocation2 + $0x320] sm:$0xff]  ;;  %v553_v17 = vadd.f32 %v5156_v43, %v475_v44  ;;  %v5165_v60 = vld [vmem:[#allocation45_spill] sm:$0xff] }
 0x12c   :  { %v504_v26 = vadd.f32 %v500_v8, %v413_v9  ;;  %v5153_v9 = vld [vmem:[#allocation34_spill] sm:$0xff]  ;;  %v627_v20 = vmul.f32 %v623_v6, %v5159_v21  ;;  %v5163_v58 = vld [vmem:[#allocation31_spill] sm:$0xff] }
 0x12d   :  { %v582_v28 = vadd.f32 %v3103_v11, %v530_v1  ;;  %v541_v46 = vadd.f32 %v5153_v9, %v450_v57  ;;  %v494_v11 = vld [vmem:[#allocation2 + $0x208] sm:$0xff]  ;;  %v5158_v57 = vld [vmem:[#allocation18_spill] sm:$0xff] }
 0x12e   :  { %v569_v40 = vadd.f32 %v5152_v51, %v504_v26  ;;  %863 = vperm.xlu0 %2288, %v859_v19   ;;  %v614_v8 = vmul.f32 %v610_v5, %v5158_v57  ;;  %v5167_v51 = vld [vmem:[#allocation37_spill] sm:$0xff]  ;;  %v5168_v9 = vld [vmem:[#allocation36_spill] sm:$0xff] }
 0x12f   :  { %v508_v13 = vpop.permute.xlu1 %507  ;;  %v634_v61 = vadd.f32 %v3106_v41, %v582_v28  ;;  %2253 = vmatmul.msk.f32.gmra.mxu2 %vm674_vm11, %v3204_v54 }
 0x130   :  { %v482_v24 = vpop.permute.xlu0 %481  ;;  %v515_v4 = vsel %vm4956_vm7, %v508_v13, %v3081_v25  ;;  %v516_v63 = vsel %vm4956_vm7, %v506_v16, %v508_v13  ;;  %v621_v34 = vadd.f32 %v3032_v23, %v569_v40  ;;  %v5155_v16 = vld [vmem:[#allocation35_spill] sm:$0xff]  ;;  %v575_v23 = vmul.f32 %v571_v53, %v3073_v32  ;;  %v5162_v32 = vld [vmem:[#allocation24_spill] sm:$0xff] }
 0x131   :  { %v489_v41 = vsel %vm4957_vm15, %v482_v24, %v3010_v59  ;;  %v490_v47 = vsel %vm4957_vm15, %v480_v37, %v482_v24  ;;  %v523_v49 = vmul.f32 %v519_v45, %v516_v63  ;;  %v524_v3 = vmul.f32 %v520_v52, %v515_v4  ;;  %v5157_v37 = vld [vmem:[#allocation33_spill] sm:$0xff] }
 0x132   :  { %v497_v25 = vmul.f32 %v493_v2, %v490_v47  ;;  %v498_v56 = vmul.f32 %v494_v11, %v489_v41  ;;  %v651_v38 = vadd.f32 %v634_v61, %v621_v34  ;;  %v593_v12 = vadd.f32 %v5155_v16, %v541_v46 }
 0x133   :  { %v527_v50 = vadd.f32 %v523_v49, %v423_v33  ;;  %v528_v55 = vadd.f32 %v524_v3, %v424_v62  ;;  %v554_v27 = vadd.f32 %v5157_v37, %v476_v36  ;;  %v644_v26 = vadd.f32 %v5162_v32, %v592_v15  ;;  %v5164_v62 = vld [vmem:[#allocation44_spill] sm:$0xff]  ;;  %v5166_v36 = vld [vmem:[#allocation21_spill] sm:$0xff] }
 0x134   :  { %v501_v59 = vadd.f32 %v497_v25, %v410_v31  ;;  %v502_v29 = vadd.f32 %v498_v56, %v411_v30  ;;  %v659_v42 = vadd.f32 %v655_v22, %v651_v38  ;;  %v645_v33 = vadd.f32 %v5164_v62, %v593_v12 }
 0x135   :  { %v579_v1 = vadd.f32 %v575_v23, %v527_v50  ;;  %v580_v39 = vadd.f32 %v5160_v35, %v528_v55  ;;  %v605_v45 = vadd.f32 %v5166_v36, %v553_v17  ;;  %v606_v40 = vadd.f32 %v5167_v51, %v554_v27 }
 0x136   :  { %765 = vmatpush.msra.mxu3 %v659_v42  ;;  %v566_v10 = vadd.f32 %v5161_v7, %v501_v59  ;;  %v567_v14 = vadd.f32 %v5163_v58, %v502_v29 }
 0x137   :  { %2254 = vmatmul.msk.f32.vlgmr.msra.gmra.mxu3 %vm674_vm11, %v3158_v0  ;;  %v631_v28 = vadd.f32 %v627_v20, %v579_v1  ;;  %v632_v44 = vadd.f32 %v5165_v60, %v580_v39  ;;  %v652_v31 = vadd.f32 %v644_v26, %v605_v45  ;;  %v653_v2 = vadd.f32 %v645_v33, %v606_v40 }
 0x138   :  { %v618_v52 = vadd.f32 %v614_v8, %v566_v10  ;;  %v619_v46 = vadd.f32 %v5168_v9, %v567_v14 }
 0x13a   :  { %v648_v19 = vadd.f32 %v631_v28, %v618_v52  ;;  %v649_v30 = vadd.f32 %v632_v44, %v619_v46 }
 0x13c   :  { %v656_v11 = vadd.f32 %v652_v31, %v648_v19  ;;  %v657_v13 = vadd.f32 %v653_v2, %v649_v30 }
 0x13e   :  { %696 = vmatpush.msra.mxu0 %v656_v11  ;;  %719 = vmatpush.msra.mxu1 %v657_v13 }
 0x13f   :  { %2248 = vmatmul.msk.f32.vlgmr.msra.gmra.mxu0 %vm674_vm11, %v3158_v0  ;;  %2250 = vmatmul.msk.f32.vlgmr.msra.gmra.mxu1 %vm674_vm11, %v3158_v0 }
 0x140   :  { %2255 = vmatmul.msk.f32.gmra.mxu3 %vm674_vm11, %v3204_v54 }
 0x147   :  { %2249 = vmatmul.msk.f32.gmra.mxu0 %vm674_vm11, %v3204_v54  ;;  %2251 = vmatmul.msk.f32.gmra.mxu1 %vm674_vm11, %v3204_v54 }
 0x181   :  { %v667_v22 = vpop.permute.xlu2 %666 }
 0x198   :  { %v672_v6 = vpop.permute.xlu0 %671 }
 0x19b   :  { %v3259_v57 = vpop.permute.xlu1 %868 }
 0x1a0   :  { %v3261_v35 = vpop.permute.xlu0 %863 }
 0x1aa   :  { %v744_v61 = vpop.f32.mrf.mxu2 }
 0x1ab   :  { %v745_v24 = vadd.f32 %v744_v61, %v667_v22 }
 0x1ad   :  { %v775_v47 = vmax.f32 %v745_v24, 0.0 }
 0x1b2   :  { %v747_v5 = vpop.f32.mrf.mxu2 }
 0x1b3   :  { %v748_v23 = vadd.f32 %v747_v5, %v672_v6 }
 0x1b5   :  { %v779_v29 = vmax.f32 %v748_v23, 0.0 }
 0x1ba   :  { %v767_v53 = vpop.f32.mrf.mxu3 }
 0x1bb   :  { %v768_v15 = vadd.f32 %v767_v53, %v667_v22 }
 0x1bc   :  { %v698_v4 = vpop.f32.mrf.mxu0  ;;  %v721_v63 = vpop.f32.mrf.mxu1 }
 0x1bd   :  { %v699_v34 = vadd.f32 %v698_v4, %v667_v22  ;;  %v722_v18 = vadd.f32 %v721_v63, %v667_v22  ;;  %v776_v3 = vmax.f32 %v768_v15, 0.0  ;;  %v827_v15 = vld [vmem:[%s4920_s4 + $0x8] sm:$0xff] }
 0x1bf   :  { %v773_v41 = vmax.f32 %v699_v34, 0.0  ;;  %v774_v0 = vmax.f32 %v722_v18, 0.0 }
 0x1c1   :  { %v781_v49 = vadd.f32 %v774_v0, %v773_v41 }
 0x1c3   :  { %v782_v25 = vadd.f32 %v781_v49, %v775_v47  ;;  %v770_v56 = vpop.f32.mrf.mxu3 }
 0x1c4   :  { %v701_v38 = vpop.f32.mrf.mxu0  ;;  %v724_v54 = vpop.f32.mrf.mxu1  ;;  %v771_v17 = vadd.f32 %v770_v56, %v672_v6 }
 0x1c5   :  { %v702_v16 = vadd.f32 %v701_v38, %v672_v6  ;;  %v725_v12 = vadd.f32 %v724_v54, %v672_v6  ;;  %v783_v50 = vadd.f32 %v782_v25, %v776_v3 }
 0x1c6   :  { %v780_v37 = vmax.f32 %v771_v17, 0.0 }
 0x1c7   :  { %v777_v55 = vmax.f32 %v702_v16, 0.0  ;;  %v778_v43 = vmax.f32 %v725_v12, 0.0  ;;  %784 = vadd.xlane.f32.xlu1 %v783_v50 }
 0x1c9   :  { %v786_v59 = vadd.f32 %v778_v43, %v777_v55 }
 0x1cb   :  { %v787_v42 = vadd.f32 %v786_v59, %v779_v29 }
 0x1cd   :  { %v788_v27 = vadd.f32 %v787_v42, %v780_v37 }
 0x1cf   :  { %789 = vadd.xlane.f32.xlu2 %v788_v27 }
 0x23a   :  { %v785_v8 = vpop.xlane.xlu1 %784 }
 0x242   :  { %v790_v21 = vpop.xlane.xlu2 %789 }
 0x243   :  { %v791_v20 = vadd.f32 %v790_v21, %v785_v8 }
 0x245   :  { %v792_v1 = vmul.f32 0.0009765625, %v791_v20 }
 0x247   :  { %795 = vperm.xlu0 %2288, %v792_v1  }
 0x2b9   :  { %v796_v39 = vpop.permute.xlu0 %795 }
 0x2ba   :  { %v802_v7 = vsub.f32 %v777_v55, %v796_v39  ;;  %v803_v10 = vsub.f32 %v778_v43, %v796_v39  ;;  %v3263_v32 = vsub.f32 %v779_v29, %v796_v39  ;;  %v798_v26 = vsub.f32 %v773_v41, %v796_v39 }
 0x2bb   :  { %v799_v58 = vsub.f32 %v774_v0, %v796_v39  ;;  %v800_v14 = vsub.f32 %v775_v47, %v796_v39  ;;  %v805_v62 = vsub.f32 %v780_v37, %v796_v39  ;;  %v801_v60 = vsub.f32 %v776_v3, %v796_v39  ;;  %v826_v0 = vld [vmem:[%s4920_s4] sm:$0xff] }
 0x2bc   :  { %v810_v33 = vmul.f32 %v802_v7, %v802_v7  ;;  %v811_v28 = vmul.f32 %v803_v10, %v803_v10  ;;  %v806_v44 = vmul.f32 %v798_v26, %v798_v26  ;;  %v812_v45 = vmul.f32 %v3263_v32, %v3263_v32 }
 0x2bd   :  { %v807_v36 = vmul.f32 %v799_v58, %v799_v58  ;;  %v808_v51 = vmul.f32 %v800_v14, %v800_v14  ;;  %v813_v9 = vmul.f32 %v805_v62, %v805_v62  ;;  %v809_v19 = vmul.f32 %v801_v60, %v801_v60 }
 0x2be   :  { %v819_v52 = vadd.f32 %v811_v28, %v810_v33 }
 0x2bf   :  { %v814_v40 = vadd.f32 %v807_v36, %v806_v44 }
 0x2c0   :  { %v820_v46 = vadd.f32 %v819_v52, %v812_v45 }
 0x2c1   :  { %v815_v31 = vadd.f32 %v814_v40, %v808_v51 }
 0x2c2   :  { %v821_v30 = vadd.f32 %v820_v46, %v813_v9 }
 0x2c3   :  { %v816_v2 = vadd.f32 %v815_v31, %v809_v19 }
 0x2c4   :  { %822 = vadd.xlane.f32.xlu2 %v821_v30 }
 0x2c5   :  { %817 = vadd.xlane.f32.xlu0 %v816_v2 }
 0x337   :  { %v823_v11 = vpop.xlane.xlu2 %822 }
 0x338   :  { %v818_v13 = vpop.xlane.xlu0 %817 }
 0x339   :  { %v824_v61 = vadd.f32 %v823_v11, %v818_v13 }
 0x33b   :  { %v825_v22 = vmul.f32 0.0009765625, %v824_v61 }
 0x33d   :  { %v828_v53 = vadd.f32 1e-05, %v825_v22 }
 0x33f   :  { %2290 = vrsqrt.f32 %v828_v53  ;;  %vm835_vm7 = vweird.f32 %v828_v53 }
 0x345   :  { %v2291_v24 = vpop.eup %2290 }
 0x346   :  { %v830_v4 = vmul.f32 %v2291_v24, %v828_v53  ;;  %vm836_vm11 = vweird.f32 %v2291_v24 }
 0x347   :  { %vm837_vm15 = vmor %vm835_vm7, %vm836_vm11 }
 0x348   :  { %v831_v63 = vmul.f32 %v2291_v24, %v830_v4 }
 0x34a   :  { %v832_v34 = vmul.f32 0.5, %v831_v63 }
 0x34c   :  { %v833_v18 = vsub.f32 1.5, %v832_v34 }
 0x34e   :  { %v834_v41 = vmul.f32 %v2291_v24, %v833_v18 }
 0x350   :  { %v838_v47 = vsel %vm837_vm15, %v2291_v24, %v834_v41  ;;  %vm5245_vm15 = vcmp.lt.s32.totalorder %v2709_v48, 7 }
 0x351   :  { %v840_v49 = vmul.f32 %v838_v47, %v827_v15  ;;  %v839_v3 = vmul.f32 %v838_v47, %v826_v0 }
 0x353   :  { %848 = vperm.xlu2 %2287, %v840_v49   ;;  %843 = vperm.xlu1 %2289, %v839_v3  }
 0x3ad   :  { %v849_v5 = vpop.permute.xlu2 %848 }
 0x3ae   :  { %v855_v6 = vmul.f32 %v849_v5, %v802_v7  ;;  %v856_v56 = vmul.f32 %v849_v5, %v803_v10  ;;  %v858_v29 = vmul.f32 %v849_v5, %v805_v62  ;;  %v857_v39 = vmul.f32 %v849_v5, %v3263_v32 }
 0x3b0   :  { %v875_v25 = vadd.f32 %v3259_v57, %v855_v6  ;;  %v876_v54 = vadd.f32 %v3259_v57, %v856_v56  ;;  %v878_v21 = vadd.f32 %v3259_v57, %v858_v29  ;;  %v877_v10 = vadd.f32 %v3259_v57, %v857_v39 }
 0x3b2   :  { %v3274_v38 = vmax.f32 %v875_v25, 0.0  ;;  %v3279_v16 = vmax.f32 %v876_v54, 0.0  ;;  %v3300_v1 = vmax.f32 %v878_v21, 0.0  ;;  %v917_v21 = vld [vmem:[#allocation5 + $0x30] sm:$0xff] }
 0x3b4   :  { %5169 = vst [vmem:[#allocation11_spill] sm:$0xff] %v3274_v38  ;;  %889 = vrot.lane.b32.xlu1 %v3274_v38, %s2378_s12 }
 0x3b5   :  { %5171 = vst [vmem:[#allocation32_spill] sm:$0xff] %v3300_v1 }
 0x3bc   :  { %893 = vrot.lane.b32.xlu1 %v3279_v16, %s2378_s12 }
 0x3c5   :  { %v844_v12 = vpop.permute.xlu1 %843 }
 0x3c6   :  { %v851_v23 = vmul.f32 %v844_v12, %v798_v26  ;;  %v853_v50 = vmul.f32 %v844_v12, %v800_v14  ;;  %v854_v55 = vmul.f32 %v844_v12, %v801_v60  ;;  %v852_v8 = vmul.f32 %v844_v12, %v799_v58 }
 0x3c7   :  { %v3312_v26 = vmax.f32 %v877_v10, 0.0 }
 0x3c8   :  { %v871_v43 = vadd.f32 %v3261_v35, %v851_v23  ;;  %v873_v17 = vadd.f32 %v3261_v35, %v853_v50  ;;  %v874_v59 = vadd.f32 %v3261_v35, %v854_v55  ;;  %v872_v20 = vadd.f32 %v3261_v35, %v852_v8 }
 0x3c9   :  { %5173 = vst [vmem:[#allocation16_spill] sm:$0xff] %v3312_v26 }
 0x3ca   :  { %v3286_v42 = vmax.f32 %v871_v43, 0.0  ;;  %v3288_v37 = vmax.f32 %v873_v17, 0.0  ;;  %v3290_v27 = vmax.f32 %v874_v59, 0.0  ;;  %v3303_v7 = vmax.f32 %v872_v20, 0.0  ;;  %v1113_v20 = vld [vmem:[#allocation5 + $0x130] sm:$0xff] }
 0x3cc   :  { %5170 = vst [vmem:[#allocation12_spill] sm:$0xff] %v3290_v27  ;;  %899 = vrot.lane.b32.xlu1 %v3290_v27, %s2378_s12  ;;  %895 = vrot.lane.b32.xlu0 %v3288_v37, %s2378_s12 }
 0x3cd   :  { %887 = vrot.lane.b32.xlu2 %v3286_v42, %s2378_s12  ;;  %5172 = vst [vmem:[#allocation43_spill] sm:$0xff] %v3303_v7 }
 0x3d4   :  { %937 = vrot.lane.b32.xlu1 %v3274_v38, %s2377_s30  ;;  %901 = vrot.lane.b32.xlu0 %v3300_v1, %s2378_s12 }
 0x3d5   :  { %891 = vrot.lane.b32.xlu2 %v3303_v7, %s2378_s12 }
 0x3dc   :  { %943 = vrot.lane.b32.xlu1 %v3288_v37, %s2377_s30  ;;  %939 = vrot.lane.b32.xlu0 %v3303_v7, %s2377_s30 }
 0x3dd   :  { %897 = vrot.lane.b32.xlu2 %v3312_v26, %s2378_s12 }
 0x3e4   :  { %949 = vrot.lane.b32.xlu1 %v3300_v1, %s2377_s30  ;;  %945 = vrot.lane.b32.xlu0 %v3312_v26, %s2377_s30 }
 0x3e5   :  { %935 = vrot.lane.b32.xlu2 %v3286_v42, %s2377_s30 }
 0x3ec   :  { %988 = vrot.lane.b32.xlu1 %v3303_v7, %s2376_s29  ;;  %984 = vrot.lane.b32.xlu0 %v3286_v42, %s2376_s29 }
 0x3ed   :  { %941 = vrot.lane.b32.xlu2 %v3279_v16, %s2377_s30 }
 0x3f4   :  { %994 = vrot.lane.b32.xlu1 %v3312_v26, %s2376_s29  ;;  %990 = vrot.lane.b32.xlu0 %v3279_v16, %s2376_s29 }
 0x3f5   :  { %947 = vrot.lane.b32.xlu2 %v3290_v27, %s2377_s30 }
 0x3fc   :  { %1033 = vrot.lane.b32.xlu1 %v3286_v42, %s2382_s20  ;;  %996 = vrot.lane.b32.xlu0 %v3290_v27, %s2376_s29 }
 0x3fd   :  { %986 = vrot.lane.b32.xlu2 %v3274_v38, %s2376_s29 }
 0x404   :  { %1039 = vrot.lane.b32.xlu1 %v3279_v16, %s2382_s20  ;;  %1035 = vrot.lane.b32.xlu0 %v3274_v38, %s2382_s20 }
 0x405   :  { %992 = vrot.lane.b32.xlu2 %v3288_v37, %s2376_s29 }
 0x40c   :  { %1092 = vrot.lane.b32.xlu1 %v3312_v26, %s2380_s16  ;;  %1041 = vrot.lane.b32.xlu0 %v3288_v37, %s2382_s20 }
 0x40d   :  { %998 = vrot.lane.b32.xlu2 %v3300_v1, %s2376_s29 }
 0x414   :  { %1186 = vrot.lane.b32.xlu1 %v3279_v16, %s2381_s17  ;;  %1137 = vrot.lane.b32.xlu0 %v3279_v16, %s2379_s15 }
 0x415   :  { %1037 = vrot.lane.b32.xlu2 %v3303_v7, %s2382_s20 }
 0x41c   :  { %1086 = vrot.lane.b32.xlu1 %v3303_v7, %s2380_s16  ;;  %1190 = vrot.lane.b32.xlu0 %v3312_v26, %s2381_s17 }
 0x41d   :  { %1088 = vrot.lane.b32.xlu2 %v3279_v16, %s2380_s16 }
 0x424   :  { %1135 = vrot.lane.b32.xlu1 %v3303_v7, %s2379_s15  ;;  %1090 = vrot.lane.b32.xlu0 %v3288_v37, %s2380_s16 }
 0x425   :  { %1141 = vrot.lane.b32.xlu2 %v3312_v26, %s2379_s15 }
 0x426   :  { %v890_v57 = vpop.permute.xlu1 %889 }
 0x427   :  { %v3374_v35 = vpop.permute.xlu2 %887 }
 0x428   :  { %5174 = vst [vmem:[#allocation40_spill] sm:$0xff] %v3374_v35 }
 0x42c   :  { %1184 = vrot.lane.b32.xlu1 %v3303_v7, %s2381_s17  ;;  %1139 = vrot.lane.b32.xlu0 %v3288_v37, %s2379_s15 }
 0x42d   :  { %1043 = vrot.lane.b32.xlu2 %v3312_v26, %s2382_s20 }
 0x42e   :  { %v894_v32 = vpop.permute.xlu1 %893 }
 0x42f   :  { %v3382_v58 = vpop.permute.xlu2 %891  ;;  %v3386_v14 = vsel %vm85_vm3, %v890_v57, %v894_v32 }
 0x430   :  { %5175 = vst [vmem:[#allocation27_spill] sm:$0xff] %v3382_v58 }
 0x431   :  { %5176 = vst [vmem:[#allocation26_spill] sm:$0xff] %v3386_v14 }
 0x434   :  { %1235 = vrot.lane.b32.xlu1 %v3279_v16, %s2383_s21  ;;  %1188 = vrot.lane.b32.xlu0 %v3288_v37, %s2381_s17 }
 0x435   :  { %1096 = vrot.lane.b32.xlu2 %v3300_v1, %s2380_s16 }
 0x437   :  { %v898_v62 = vpop.permute.xlu2 %897 }
 0x438   :  { %v3396_v33 = vsel %vm85_vm3, %v894_v32, %v898_v62 }
 0x439   :  { %5177 = vst [vmem:[#allocation17_spill] sm:$0xff] %v3396_v33 }
 0x43c   :  { %1288 = vrot.lane.b32.xlu1 %v3312_v26, %s2384_s22  ;;  %1239 = vrot.lane.b32.xlu0 %v3312_v26, %s2383_s21 }
 0x43d   :  { %1145 = vrot.lane.b32.xlu2 %v3300_v1, %s2379_s15 }
 0x43e   :  { %v896_v28 = vpop.permute.xlu0 %895  ;;  %v3404_v60 = vpop.permute.xlu1 %899 }
 0x43f   :  { %5178 = vst [vmem:[#allocation15_spill] sm:$0xff] %v3404_v60  ;;  %v3409_v44 = vsel %vm85_vm3, %v3382_v58, %v896_v28  ;;  %v936_v36 = vpop.permute.xlu2 %935  ;;  %v3414_v45 = vsel %vm85_vm3, %v896_v28, %v3404_v60 }
 0x440   :  { %5179 = vst [vmem:[#allocation29_spill] sm:$0xff] %v3409_v44 }
 0x444   :  { %1382 = vrot.lane.b32.xlu1 %v3279_v16, %s2385_s23  ;;  %1333 = vrot.lane.b32.xlu0 %v3279_v16, %s2386_s24 }
 0x445   :  { %1194 = vrot.lane.b32.xlu2 %v3300_v1, %s2381_s17 }
 0x446   :  { %v902_v52 = vpop.permute.xlu0 %901  ;;  %v938_v51 = vpop.permute.xlu1 %937 }
 0x447   :  { %v3424_v40 = vsel %vm85_vm3, %v898_v62, %v902_v52  ;;  %v3428_v9 = vsel %vm85_vm3, %v902_v52, %v890_v57  ;;  %v942_v46 = vpop.permute.xlu2 %941  ;;  %v925_v62 = vmul.f32 %v917_v21, %v3396_v33  ;;  %v966_v52 = vld [vmem:[#allocation5 + $0x70] sm:$0xff] }
 0x448   :  { %5180 = vst [vmem:[#allocation39_spill] sm:$0xff] %v3424_v40  ;;  %v3432_v19 = vsel %vm110_vm2, %v938_v51, %v942_v46 }
 0x449   :  { %5181 = vst [vmem:[#allocation48_spill] sm:$0xff] %v3428_v9 }
 0x44a   :  { %5182 = vst [vmem:[#allocation13_spill] sm:$0xff] %v3432_v19 }
 0x44c   :  { %1084 = vrot.lane.b32.xlu1 %v3274_v38, %s2380_s16  ;;  %1386 = vrot.lane.b32.xlu0 %v3312_v26, %s2385_s23 }
 0x44d   :  { %1284 = vrot.lane.b32.xlu2 %v3279_v16, %s2384_s22 }
 0x44e   :  { %v940_v31 = vpop.permute.xlu0 %939  ;;  %v944_v30 = vpop.permute.xlu1 %943 }
 0x44f   :  { %v3442_v2 = vsel %vm110_vm2, %v936_v36, %v940_v31  ;;  %v948_v11 = vpop.permute.xlu2 %947  ;;  %v3446_v13 = vsel %vm110_vm2, %v940_v31, %v944_v30 }
 0x450   :  { %5183 = vst [vmem:[#allocation28_spill] sm:$0xff] %v3442_v2  ;;  %v3450_v61 = vsel %vm110_vm2, %v948_v11, %v936_v36  ;;  %v3454_v22 = vsel %vm110_vm2, %v944_v30, %v948_v11 }
 0x451   :  { %5184 = vst [vmem:[#allocation25_spill] sm:$0xff] %v3446_v13 }
 0x452   :  { %5185 = vst [vmem:[#allocation50_spill] sm:$0xff] %v3450_v61 }
 0x453   :  { %5186 = vst [vmem:[#allocation23_spill] sm:$0xff] %v3454_v22 }
 0x454   :  { %1143 = vrot.lane.b32.xlu1 %v3290_v27, %s2379_s15  ;;  %1094 = vrot.lane.b32.xlu0 %v3290_v27, %s2380_s16 }
 0x455   :  { %1337 = vrot.lane.b32.xlu2 %v3312_v26, %s2386_s24 }
 0x456   :  { %v946_v53 = vpop.permute.xlu0 %945  ;;  %v950_v24 = vpop.permute.xlu1 %949 }
 0x457   :  { %v3464_v4 = vsel %vm110_vm2, %v942_v46, %v946_v53  ;;  %v987_v63 = vpop.permute.xlu2 %986  ;;  %v3468_v34 = vsel %vm110_vm2, %v946_v53, %v950_v24  ;;  %v3472_v18 = vsel %vm110_vm2, %v950_v24, %v938_v51  ;;  %v1162_v51 = vld [vmem:[#allocation5 + $0x170] sm:$0xff] }
 0x458   :  { %5187 = vst [vmem:[#allocation19_spill] sm:$0xff] %v3464_v4  ;;  %v974_v53 = vmul.f32 %v966_v52, %v3464_v4 }
 0x459   :  { %5188 = vst [vmem:[#allocation42_spill] sm:$0xff] %v3468_v34 }
 0x45a   :  { %5189 = vst [vmem:[#allocation47_spill] sm:$0xff] %v3472_v18 }
 0x45c   :  { %1233 = vrot.lane.b32.xlu1 %v3303_v7, %s2383_s21  ;;  %1182 = vrot.lane.b32.xlu0 %v3274_v38, %s2381_s17 }
 0x45d   :  { %1047 = vrot.lane.b32.xlu2 %v3300_v1, %s2382_s20 }
 0x45e   :  { %v985_v15 = vpop.permute.xlu0 %984  ;;  %v989_v41 = vpop.permute.xlu1 %988 }
 0x45f   :  { %v993_v0 = vpop.permute.xlu2 %992  ;;  %v3482_v47 = vsel %vm136_vm0, %v985_v15, %v989_v41 }
 0x460   :  { %5190 = vst [vmem:[#allocation22_spill] sm:$0xff] %v3482_v47  ;;  %v3486_v49 = vsel %vm136_vm0, %v989_v41, %v993_v0  ;;  %v1015_v41 = vld [vmem:[#allocation5 + $0xb0] sm:$0xff] }
 0x461   :  { %5191 = vst [vmem:[#allocation49_spill] sm:$0xff] %v3486_v49 }
 0x464   :  { %1282 = vrot.lane.b32.xlu1 %v3303_v7, %s2384_s22  ;;  %1237 = vrot.lane.b32.xlu0 %v3288_v37, %s2383_s21 }
 0x465   :  { %1133 = vrot.lane.b32.xlu2 %v3274_v38, %s2379_s15 }
 0x466   :  { %v991_v3 = vpop.permute.xlu0 %990  ;;  %v995_v5 = vpop.permute.xlu1 %994 }
 0x467   :  { %v3496_v6 = vsel %vm136_vm0, %v987_v63, %v991_v3  ;;  %v999_v25 = vpop.permute.xlu2 %998  ;;  %v3500_v56 = vsel %vm136_vm0, %v991_v3, %v995_v5  ;;  %v918_v3 = vld [vmem:[#allocation5 + $0x38] sm:$0xff] }
 0x468   :  { %5192 = vst [vmem:[#allocation14_spill] sm:$0xff] %v3496_v6  ;;  %v3504_v54 = vsel %vm136_vm0, %v999_v25, %v987_v63  ;;  %v3508_v12 = vsel %vm136_vm0, %v995_v5, %v999_v25  ;;  %v1114_v25 = vld [vmem:[#allocation5 + $0x138] sm:$0xff] }
 0x469   :  { %5193 = vst [vmem:[#allocation34_spill] sm:$0xff] %v3500_v56 }
 0x46a   :  { %5194 = vst [vmem:[#allocation46_spill] sm:$0xff] %v3504_v54 }
 0x46b   :  { %5195 = vst [vmem:[#allocation35_spill] sm:$0xff] %v3508_v12 }
 0x46c   :  { %1331 = vrot.lane.b32.xlu1 %v3303_v7, %s2386_s24  ;;  %1286 = vrot.lane.b32.xlu0 %v3288_v37, %s2384_s22 }
 0x46d   :  { %1192 = vrot.lane.b32.xlu2 %v3290_v27, %s2381_s17 }
 0x46e   :  { %v997_v23 = vpop.permute.xlu0 %996  ;;  %v3516_v50 = vpop.permute.xlu1 %1033 }
 0x46f   :  { %5196 = vst [vmem:[#allocation41_spill] sm:$0xff] %v3516_v50  ;;  %v3520_v55 = vsel %vm136_vm0, %v993_v0, %v997_v23  ;;  %v3524_v43 = vsel %vm136_vm0, %v997_v23, %v985_v15  ;;  %v3526_v17 = vpop.permute.xlu2 %1037  ;;  %v1211_v0 = vld [vmem:[#allocation5 + $0x1b0] sm:$0xff]  ;;  %vm5217_vm0 = vcmp.lt.s32.totalorder %v2709_v48, 55 }
 0x470   :  { %5197 = vst [vmem:[#allocation33_spill] sm:$0xff] %v3520_v55  ;;  %vm5236_vm2 = vmmov %vm5217_vm0 }
 0x471   :  { %5198 = vst [vmem:[#allocation18_spill] sm:$0xff] %v3524_v43  ;;  %vm5238_vm7 = vmmov %vm5217_vm0 }
 0x472   :  { %5199 = vst [vmem:[#allocation30_spill] sm:$0xff] %v3526_v17 }
 0x474   :  { %1380 = vrot.lane.b32.xlu1 %v3303_v7, %s2385_s23  ;;  %1335 = vrot.lane.b32.xlu0 %v3288_v37, %s2386_s24 }
 0x475   :  { %1243 = vrot.lane.b32.xlu2 %v3300_v1, %s2383_s21 }
 0x476   :  { %v3534_v59 = vpop.permute.xlu0 %1035  ;;  %v3536_v29 = vpop.permute.xlu1 %1039 }
 0x477   :  { %5200 = vst [vmem:[#allocation38_spill] sm:$0xff] %v3534_v59  ;;  %v3538_v8 = vpop.permute.xlu2 %1088 }
 0x478   :  { %5201 = vst [vmem:[#allocation20_spill] sm:$0xff] %v3536_v29 }
 0x47c   :  { %1431 = vrot.lane.b32.xlu1 %v3279_v16, %s2388_s1  ;;  %1384 = vrot.lane.b32.xlu0 %v3288_v37, %s2385_s23 }
 0x47d   :  { %1292 = vrot.lane.b32.xlu2 %v3300_v1, %s2384_s22 }
 0x47e   :  { %v3546_v39 = vpop.permute.xlu0 %1041  ;;  %v1093_v10 = vpop.permute.xlu1 %1092 }
 0x47f   :  { %v1142_v57 = vpop.permute.xlu2 %1141  ;;  %v3551_v32 = vsel %vm188_vm1, %v3538_v8, %v1093_v10 }
 0x480   :  { %5202 = vst [vmem:[#allocation24_spill] sm:$0xff] %v3551_v32  ;;  %v1121_v28 = vmul.f32 %v1113_v20, %v3551_v32 }
 0x482   :  { %v3555_v36 = vadd.f32 %v1121_v28, %v925_v62  ;;  %v1023_v62 = vmul.f32 %v1015_v41, %v3500_v56  ;;  %v913_v41 = vld [vmem:[#allocation5 + $0x10] sm:$0xff] }
 0x484   :  { %1484 = vrot.lane.b32.xlu1 %v3312_v26, %s2387_s0  ;;  %1435 = vrot.lane.b32.xlu0 %v3312_v26, %s2388_s1 }
 0x485   :  { %1341 = vrot.lane.b32.xlu2 %v3300_v1, %s2386_s24 }
 0x486   :  { %v3563_v46 = vpop.permute.xlu0 %1137  ;;  %v3565_v31 = vpop.permute.xlu1 %1186 }
 0x487   :  { %v3570_v30 = vsel %vm214_vm5, %v3563_v46, %v1142_v57  ;;  %v3572_v11 = vpop.permute.xlu2 %1043 }
 0x488   :  { %5203 = vst [vmem:[#allocation31_spill] sm:$0xff] %v3570_v30  ;;  %v1170_v24 = vmul.f32 %v1162_v51, %v3570_v30  ;;  %v3580_v63 = vsel %vm162_vm6, %v3536_v29, %v3572_v11  ;;  %v926_v51 = vmul.f32 %v918_v3, %v3424_v40  ;;  %v1163_v3 = vld [vmem:[#allocation5 + $0x178] sm:$0xff] }
 0x489   :  { %5204 = vst [vmem:[#allocation44_spill] sm:$0xff] %v3580_v63 }
 0x48a   :  { %v3582_v15 = vadd.f32 %v1170_v24, %v974_v53 }
 0x48c   :  { %1045 = vrot.lane.b32.xlu1 %v3290_v27, %s2382_s20  ;;  %1558 = vrot.lane.b32.xlu0 %v3312_v26, %s2389_s6 }
 0x48d   :  { %1390 = vrot.lane.b32.xlu2 %v3300_v1, %s2385_s23 }
 0x48e   :  { %v1191_v5 = vpop.permute.xlu0 %1190  ;;  %v3590_v23 = vpop.permute.xlu1 %1086 }
 0x48f   :  { %5205 = vst [vmem:[#allocation45_spill] sm:$0xff] %v3590_v23  ;;  %v3595_v21 = vsel %vm240_vm4, %v3565_v31, %v1191_v5  ;;  %v3597_v20 = vpop.permute.xlu2 %1096 }
 0x490   :  { %5206 = vst [vmem:[#allocation21_spill] sm:$0xff] %v3595_v21  ;;  %v1219_v28 = vmul.f32 %v1211_v0, %v3595_v21  ;;  %v3604_v52 = vsel %vm188_vm1, %v1093_v10, %v3597_v20  ;;  %v1109_v10 = vld [vmem:[#allocation5 + $0x110] sm:$0xff]  ;;  %v967_v0 = vld [vmem:[#allocation5 + $0x78] sm:$0xff] }
 0x491   :  { %5207 = vst [vmem:[#allocation37_spill] sm:$0xff] %v3604_v52  ;;  %v1122_v53 = vmul.f32 %v1114_v25, %v3604_v52  ;;  %v975_v4 = vmul.f32 %v967_v0, %v3468_v34  ;;  %v1212_v0 = vld [vmem:[#allocation5 + $0x1b8] sm:$0xff] }
 0x492   :  { %v3608_v24 = vadd.f32 %v1219_v28, %v1023_v62 }
 0x493   :  { %v3610_v30 = vadd.f32 %v1122_v53, %v926_v51  ;;  %v921_v51 = vmul.f32 %v913_v41, %v3409_v44  ;;  %v962_v41 = vld [vmem:[#allocation5 + $0x50] sm:$0xff] }
 0x494   :  { %1180 = vrot.lane.b32.xlu1 %v3286_v42, %s2381_s17  ;;  %1082 = vrot.lane.b32.xlu0 %v3286_v42, %s2380_s16 }
 0x495   :  { %1480 = vrot.lane.b32.xlu2 %v3279_v16, %s2387_s0 }
 0x496   :  { %v3618_v21 = vpop.permute.xlu0 %1090  ;;  %v3620_v25 = vpop.permute.xlu1 %1135 }
 0x497   :  { %v3626_v62 = vsel %vm188_vm1, %v3590_v23, %v3618_v21  ;;  %v3628_v28 = vpop.permute.xlu2 %1145  ;;  %v1112_v23 = vld [vmem:[#allocation5 + $0x128] sm:$0xff] }
 0x498   :  { %5208 = vst [vmem:[#allocation36_spill] sm:$0xff] %v3626_v62  ;;  %v1117_v53 = vmul.f32 %v1109_v10, %v3626_v62  ;;  %v3635_v56 = vsel %vm214_vm5, %v1142_v57, %v3628_v28  ;;  %v1158_v57 = vld [vmem:[#allocation5 + $0x150] sm:$0xff]  ;;  %v1016_v10 = vld [vmem:[#allocation5 + $0xb8] sm:$0xff] }
 0x499   :  { %5209 = vst [vmem:[#allocation51_spill] sm:$0xff] %v3635_v56  ;;  %v1171_v32 = vmul.f32 %v1163_v3, %v3635_v56  ;;  %v1024_v56 = vmul.f32 %v1016_v10, %v3508_v12 }
 0x49a   :  { %v3639_v33 = vadd.f32 %v1117_v53, %v921_v51  ;;  %v970_v51 = vmul.f32 %v962_v41, %v3446_v13  ;;  %v1011_v41 = vld [vmem:[#allocation5 + $0x90] sm:$0xff] }
 0x49b   :  { %v3641_v50 = vadd.f32 %v1171_v32, %v975_v4  ;;  %v1260_v13 = vld [vmem:[#allocation5 + $0x1f0] sm:$0xff] }
 0x49c   :  { %1280 = vrot.lane.b32.xlu1 %v3274_v38, %s2384_s22  ;;  %1231 = vrot.lane.b32.xlu0 %v3274_v38, %s2383_s21 }
 0x49d   :  { %1562 = vrot.lane.b32.xlu2 %v3300_v1, %s2389_s6 }
 0x49e   :  { %v3649_v62 = vpop.permute.xlu0 %1139  ;;  %v3651_v3 = vpop.permute.xlu1 %1184 }
 0x49f   :  { %5210 = vst [vmem:[#allocation52_spill] sm:$0xff] %v3651_v3  ;;  %v3657_v4 = vsel %vm214_vm5, %v3620_v25, %v3649_v62  ;;  %v3659_v32 = vpop.permute.xlu2 %1194 }
 0x4a0   :  { %5211 = vst [vmem:[#allocation53_spill] sm:$0xff] %v3657_v4  ;;  %v1166_v53 = vmul.f32 %v1158_v57, %v3657_v4  ;;  %v3666_v44 = vsel %vm240_vm4, %v1191_v5, %v3659_v32  ;;  %v1207_v5 = vld [vmem:[#allocation5 + $0x190] sm:$0xff] }
 0x4a1   :  { %5212 = vst [vmem:[#allocation54_spill] sm:$0xff] %v3666_v44  ;;  %v1220_v34 = vmul.f32 %v1212_v0, %v3666_v44  ;;  %v1019_v0 = vmul.f32 %v1011_v41, %v3486_v49  ;;  %v1064_v4 = vld [vmem:[#allocation5 + $0xf0] sm:$0xff] }
 0x4a2   :  { %v3670_v59 = vadd.f32 %v1166_v53, %v970_v51  ;;  %v1309_v44 = vld [vmem:[#allocation5 + $0x230] sm:$0xff] }
 0x4a3   :  { %v3672_v29 = vadd.f32 %v1220_v34, %v1024_v56 }
 0x4a4   :  { %1339 = vrot.lane.b32.xlu1 %v3290_v27, %s2386_s24  ;;  %1290 = vrot.lane.b32.xlu0 %v3290_v27, %s2384_s22 }
 0x4a5   :  { %1131 = vrot.lane.b32.xlu2 %v3286_v42, %s2379_s15 }
 0x4a6   :  { %v3680_v57 = vpop.permute.xlu0 %1188  ;;  %v3682_v10 = vpop.permute.xlu1 %1235 }
 0x4a7   :  { %5213 = vst [vmem:[#allocation55_spill] sm:$0xff] %v3682_v10  ;;  %v3688_v34 = vsel %vm240_vm4, %v3651_v3, %v3680_v57  ;;  %v3690_v56 = vpop.permute.xlu2 %1284 }
 0x4a8   :  { %5214 = vst [vmem:[#allocation56_spill] sm:$0xff] %v3688_v34  ;;  %v1215_v51 = vmul.f32 %v1207_v5, %v3688_v34 }
 0x4a9   :  { %5215 = vst [vmem:[#allocation57_spill] sm:$0xff] %v3690_v56 }
 0x4aa   :  { %v3694_v53 = vadd.f32 %v1215_v51, %v1019_v0  ;;  %v1072_v51 = vmul.f32 %v1064_v4, %v3580_v63  ;;  %v965_v63 = vld [vmem:[#allocation5 + $0x68] sm:$0xff] }
 0x4ac   :  { %1429 = vrot.lane.b32.xlu1 %v3303_v7, %s2388_s1  ;;  %1378 = vrot.lane.b32.xlu0 %v3274_v38, %s2385_s23 }
 0x4ad   :  { %1241 = vrot.lane.b32.xlu2 %v3290_v27, %s2383_s21 }
 0x4ae   :  { %v3702_v12 = vpop.permute.xlu0 %1239  ;;  %v3704_v43 = vpop.permute.xlu1 %1288 }
 0x4af   :  { %v3710_v41 = vsel %vm266_vm8, %v3682_v10, %v3702_v12  ;;  %v3712_v5 = vpop.permute.xlu2 %1337  ;;  %v3718_v0 = vsel %vm5217_vm0, %v3690_v56, %v3704_v43  ;;  %v1358_v56 = vld [vmem:[#allocation5 + $0x270] sm:$0xff]  ;;  %v1161_v10 = vld [vmem:[#allocation5 + $0x168] sm:$0xff] }
 0x4b0   :  { %5216 = vst [vmem:[#allocation58_spill] sm:$0xff] %v3710_v41  ;;  %v1268_v34 = vmul.f32 %v1260_v13, %v3710_v41  ;;  %v1317_v49 = vmul.f32 %v1309_v44, %v3718_v0  ;;  %v915_v41 = vld [vmem:[#allocation5 + $0x20] sm:$0xff] }
 0x4b1   :  { %5218 = vst [vmem:[#allocation59_spill] sm:$0xff] %v3718_v0  ;;  %v964_v0 = vld [vmem:[#allocation5 + $0x60] sm:$0xff] }
 0x4b2   :  { %v3723_v47 = vadd.f32 %v1268_v34, %v1072_v51  ;;  %v3726_v3 = vadd.f32 %v1317_v49, %v3555_v36  ;;  %v972_v58 = vmul.f32 %v964_v0, %v3472_v18  ;;  %v1208_v0 = vld [vmem:[#allocation5 + $0x198] sm:$0xff] }
 0x4b4   :  { %1478 = vrot.lane.b32.xlu1 %v3303_v7, %s2387_s0  ;;  %1433 = vrot.lane.b32.xlu0 %v3288_v37, %s2388_s1 }
 0x4b5   :  { %1329 = vrot.lane.b32.xlu2 %v3274_v38, %s2386_s24 }
 0x4b6   :  { %v3734_v4 = vpop.permute.xlu0 %1333  ;;  %v3736_v13 = vpop.permute.xlu1 %1382 }
 0x4b7   :  { %5219 = vst [vmem:[#allocation60_spill] sm:$0xff] %v3734_v4  ;;  %v1346_v44 = vsel %vm318_vm9, %v3734_v4, %v3712_v5  ;;  %v3742_v49 = vpop.permute.xlu2 %1047 }
 0x4b8   :  { %5220 = vst [vmem:[#allocation61_spill] sm:$0xff] %v3736_v13  ;;  %v1366_v36 = vmul.f32 %v1358_v56, %v1346_v44  ;;  %v3748_v34 = vsel %vm162_vm6, %v3572_v11, %v3742_v49  ;;  %v1407_v56 = vld [vmem:[#allocation5 + $0x2b0] sm:$0xff]  ;;  %v1111_v44 = vld [vmem:[#allocation5 + $0x120] sm:$0xff] }
 0x4b9   :  { %5221 = vst [vmem:[#allocation62_spill] sm:$0xff] %v3742_v49  ;;  %v1160_v11 = vld [vmem:[#allocation5 + $0x160] sm:$0xff] }
 0x4ba   :  { %5222 = vst [vmem:[#allocation63_spill] sm:$0xff] %v3748_v34  ;;  %v3751_v51 = vadd.f32 %v1366_v36, %v3582_v15  ;;  %v916_v36 = vld [vmem:[#allocation5 + $0x28] sm:$0xff] }
 0x4bc   :  { %5223 = vst [vmem:[#allocation64_spill] sm:$0xff] %v3751_v51  ;;  %1550 = vrot.lane.b32.xlu1 %v3274_v38, %s2389_s6  ;;  %1482 = vrot.lane.b32.xlu0 %v3288_v37, %s2387_s0  ;;  %v923_v51 = vmul.f32 %v915_v41, %v3428_v9 }
 0x4bd   :  { %1388 = vrot.lane.b32.xlu2 %v3290_v27, %s2385_s23 }
 0x4be   :  { %v3759_v4 = vpop.permute.xlu0 %1386  ;;  %v1085_v15 = vpop.permute.xlu1 %1084 }
 0x4bf   :  { %v1395_v49 = vsel %vm344_vm10, %v3736_v13, %v3759_v4  ;;  %v1134_v7 = vpop.permute.xlu2 %1133  ;;  %v3769_v52 = vsel %vm188_vm1, %v1085_v15, %v3538_v8  ;;  %v3774_v60 = vsel %vm188_vm1, %v3597_v20, %v1085_v15  ;;  %v973_v8 = vmul.f32 %v965_v63, %v3432_v19  ;;  %v914_v63 = vld [vmem:[#allocation5 + $0x18] sm:$0xff] }
 0x4c0   :  { %5224 = vst [vmem:[#allocation65_spill] sm:$0xff] %v3769_v52  ;;  %v1415_v35 = vmul.f32 %v1407_v56, %v1395_v49  ;;  %v3779_v41 = vsel %vm214_vm5, %v1134_v7, %v3563_v46  ;;  %v3784_v9 = vsel %vm214_vm5, %v3628_v28, %v1134_v7  ;;  %v1119_v13 = vmul.f32 %v1111_v44, %v3774_v60 }
 0x4c1   :  { %5225 = vst [vmem:[#allocation66_spill] sm:$0xff] %v3779_v41  ;;  %v1168_v20 = vmul.f32 %v1160_v11, %v3784_v9  ;;  %v1169_v49 = vmul.f32 %v1161_v10, %v3779_v41  ;;  %v924_v56 = vmul.f32 %v916_v36, %v3386_v14  ;;  %v1120_v15 = vmul.f32 %v1112_v23, %v3769_v52  ;;  %v963_v10 = vld [vmem:[#allocation5 + $0x58] sm:$0xff] }
 0x4c2   :  { %5226 = vst [vmem:[#allocation67_spill] sm:$0xff] %v3784_v9  ;;  %v3793_v46 = vadd.f32 %v1415_v35, %v3608_v24  ;;  %v3796_v40 = vadd.f32 %v1119_v13, %v923_v51  ;;  %v1110_v35 = vld [vmem:[#allocation5 + $0x118] sm:$0xff]  ;;  %v922_v51 = vmul.f32 %v914_v63, %v3414_v45 }
 0x4c3   :  { %v3798_v7 = vadd.f32 %v1168_v20, %v972_v58  ;;  %v3800_v28 = vadd.f32 %v1169_v49, %v973_v8  ;;  %v3802_v44 = vadd.f32 %v1120_v15, %v924_v56  ;;  %v1159_v23 = vld [vmem:[#allocation5 + $0x158] sm:$0xff]  ;;  %v971_v20 = vmul.f32 %v963_v10, %v3454_v22  ;;  %v1014_v10 = vld [vmem:[#allocation5 + $0xa8] sm:$0xff] }
 0x4c4   :  { %1607 = vrot.lane.b32.xlu1 %v3312_v26, %s2390_s13  ;;  %1556 = vrot.lane.b32.xlu0 %v3288_v37, %s2389_s6  ;;  %v1012_v24 = vld [vmem:[#allocation5 + $0x98] sm:$0xff] }
 0x4c5   :  { %1439 = vrot.lane.b32.xlu2 %v3300_v1, %s2388_s1  ;;  %v1020_v15 = vmul.f32 %v1012_v24, %v3520_v55 }
 0x4c6   :  { %v3810_v58 = vpop.permute.xlu0 %1094  ;;  %v3812_v13 = vpop.permute.xlu1 %1143 }
 0x4c7   :  { %v3819_v11 = vsel %vm188_vm1, %v3618_v21, %v3810_v58  ;;  %v3821_v36 = vpop.permute.xlu2 %1192  ;;  %v3827_v8 = vsel %vm214_vm5, %v3649_v62, %v3812_v13 }
 0x4c8   :  { %5227 = vst [vmem:[#allocation68_spill] sm:$0xff] %v3827_v8  ;;  %v1118_v49 = vmul.f32 %v1110_v35, %v3819_v11  ;;  %v3835_v56 = vsel %vm240_vm4, %v3680_v57, %v3821_v36  ;;  %v1167_v21 = vmul.f32 %v1159_v23, %v3827_v8  ;;  %v1013_v57 = vld [vmem:[#allocation5 + $0xa0] sm:$0xff]  ;;  %v1210_v23 = vld [vmem:[#allocation5 + $0x1a8] sm:$0xff] }
 0x4c9   :  { %5228 = vst [vmem:[#allocation69_spill] sm:$0xff] %v3835_v56  ;;  %v1216_v63 = vmul.f32 %v1208_v0, %v3835_v56  ;;  %v1209_v35 = vld [vmem:[#allocation5 + $0x1a0] sm:$0xff]  ;;  %v1021_v56 = vmul.f32 %v1013_v57, %v3504_v54  ;;  %v1060_v57 = vld [vmem:[#allocation5 + $0xd0] sm:$0xff] }
 0x4ca   :  { %v3840_v41 = vadd.f32 %v1118_v49, %v922_v51  ;;  %v3842_v62 = vadd.f32 %v1167_v21, %v971_v20  ;;  %v1065_v51 = vld [vmem:[#allocation5 + $0xf8] sm:$0xff] }
 0x4cb   :  { %v3844_v19 = vadd.f32 %v1216_v63, %v1020_v15  ;;  %v1261_v21 = vld [vmem:[#allocation5 + $0x1f8] sm:$0xff]  ;;  %v1022_v63 = vmul.f32 %v1014_v10, %v3496_v6 }
 0x4cc   :  { %1660 = vrot.lane.b32.xlu1 %v3300_v1, %s2391_s14  ;;  %1611 = vrot.lane.b32.xlu0 %v3300_v1, %s2390_s13 }
 0x4cd   :  { %1488 = vrot.lane.b32.xlu2 %v3300_v1, %s2387_s0 }
 0x4ce   :  { %v1183_v24 = vpop.permute.xlu0 %1182  ;;  %v3852_v0 = vpop.permute.xlu1 %1233 }
 0x4cf   :  { %5229 = vst [vmem:[#allocation70_spill] sm:$0xff] %v3852_v0  ;;  %v3857_v20 = vsel %vm240_vm4, %v1183_v24, %v3565_v31  ;;  %v3862_v49 = vsel %vm240_vm4, %v3659_v32, %v1183_v24  ;;  %v3864_v15 = vpop.permute.xlu2 %1243  ;;  %v1073_v32 = vmul.f32 %v1065_v51, %v3748_v34 }
 0x4d0   :  { %5230 = vst [vmem:[#allocation71_spill] sm:$0xff] %v3857_v20  ;;  %v1217_v55 = vmul.f32 %v1209_v35, %v3862_v49  ;;  %v1218_v8 = vmul.f32 %v1210_v23, %v3857_v20  ;;  %v3874_v31 = vsel %vm266_vm8, %v3702_v12, %v3864_v15  ;;  %v3892_v12 = vsel %vm162_vm6, %v3526_v17, %v3546_v39 }
 0x4d1   :  { %5231 = vst [vmem:[#allocation72_spill] sm:$0xff] %v3862_v49  ;;  %v1269_v10 = vmul.f32 %v1261_v21, %v3874_v31  ;;  %v1068_v21 = vmul.f32 %v1060_v57, %v3892_v12  ;;  %v1305_v57 = vld [vmem:[#allocation5 + $0x210] sm:$0xff] }
 0x4d2   :  { %5232 = vst [vmem:[#allocation73_spill] sm:$0xff] %v3874_v31  ;;  %v3877_v24 = vadd.f32 %v1217_v55, %v1021_v56  ;;  %v3879_v9 = vadd.f32 %v1218_v8, %v1022_v63  ;;  %v1256_v55 = vld [vmem:[#allocation5 + $0x1d0] sm:$0xff]  ;;  %v1310_v56 = vld [vmem:[#allocation5 + $0x238] sm:$0xff] }
 0x4d3   :  { %v3882_v6 = vadd.f32 %v1269_v10, %v1073_v32  ;;  %5233 = vst [vmem:[#allocation74_spill] sm:$0xff] %v3892_v12 }
 0x4d4   :  { %1229 = vrot.lane.b32.xlu1 %v3286_v42, %s2383_s21  ;;  %1705 = vrot.lane.b32.xlu0 %v3312_v26, %s2392_s18 }
 0x4d5   :  { %1560 = vrot.lane.b32.xlu2 %v3290_v27, %s2389_s6 }
 0x4d6   :  { %v3896_v8 = vpop.permute.xlu0 %1237  ;;  %v3898_v35 = vpop.permute.xlu1 %1282 }
 0x4d7   :  { %5234 = vst [vmem:[#allocation75_spill] sm:$0xff] %v3898_v35  ;;  %v3904_v23 = vsel %vm266_vm8, %v3852_v0, %v3896_v8  ;;  %v3906_v51 = vpop.permute.xlu2 %1292  ;;  %v1851_v0 = vld [vmem:[#allocation5 + $0x5b0] sm:$0xff] }
 0x4d8   :  { %5235 = vst [vmem:[#allocation76_spill] sm:$0xff] %v3904_v23  ;;  %v1264_v63 = vmul.f32 %v1256_v55, %v3904_v23  ;;  %v3914_v32 = vsel %vm5236_vm2, %v3704_v43, %v3906_v51  ;;  %v1359_v43 = vld [vmem:[#allocation5 + $0x278] sm:$0xff]  ;;  %vm5313_vm2 = vcmp.lt.s32.totalorder %v2709_v48, 119 }
 0x4d9   :  { %v1318_v10 = vmul.f32 %v1310_v56, %v3914_v32 }
 0x4da   :  { %v3917_v20 = vadd.f32 %v1264_v63, %v1068_v21 }
 0x4db   :  { %v3920_v49 = vadd.f32 %v1318_v10, %v3610_v30 }
 0x4dc   :  { %1376 = vrot.lane.b32.xlu1 %v3286_v42, %s2385_s23  ;;  %1278 = vrot.lane.b32.xlu0 %v3286_v42, %s2384_s22 }
 0x4dd   :  { %1656 = vrot.lane.b32.xlu2 %v3312_v26, %s2391_s14 }
 0x4de   :  { %v3928_v55 = vpop.permute.xlu0 %1286  ;;  %v3930_v23 = vpop.permute.xlu1 %1331 }
 0x4df   :  { %5237 = vst [vmem:[#allocation77_spill] sm:$0xff] %v3930_v23  ;;  %v3936_v30 = vsel %vm5238_vm7, %v3898_v35, %v3928_v55  ;;  %v3938_v56 = vpop.permute.xlu2 %1341 }
 0x4e0   :  { %5239 = vst [vmem:[#allocation78_spill] sm:$0xff] %v3936_v30  ;;  %v1313_v21 = vmul.f32 %v1305_v57, %v3936_v30  ;;  %v1344_v63 = vsel %vm318_vm9, %v3712_v5, %v3938_v56  ;;  %v1354_v57 = vld [vmem:[#allocation5 + $0x250] sm:$0xff]  ;;  %v1408_v5 = vld [vmem:[#allocation5 + $0x2b8] sm:$0xff] }
 0x4e1   :  { %v1367_v10 = vmul.f32 %v1359_v43, %v1344_v63 }
 0x4e2   :  { %v3946_v12 = vadd.f32 %v1313_v21, %v3639_v33 }
 0x4e3   :  { %v3949_v54 = vadd.f32 %v1367_v10, %v3641_v50 }
 0x4e4   :  { %1476 = vrot.lane.b32.xlu1 %v3274_v38, %s2387_s0  ;;  %1427 = vrot.lane.b32.xlu0 %v3274_v38, %s2388_s1 }
 0x4e5   :  { %5240 = vst [vmem:[#allocation79_spill] sm:$0xff] %v3949_v54  ;;  %1709 = vrot.lane.b32.xlu2 %v3300_v1, %s2392_s18 }
 0x4e6   :  { %v3957_v30 = vpop.permute.xlu0 %1335  ;;  %v3959_v43 = vpop.permute.xlu1 %1380 }
 0x4e7   :  { %5241 = vst [vmem:[#allocation80_spill] sm:$0xff] %v3959_v43  ;;  %v1345_v33 = vsel %vm318_vm9, %v3930_v23, %v3957_v30  ;;  %v3965_v50 = vpop.permute.xlu2 %1390 }
 0x4e8   :  { %v1362_v21 = vmul.f32 %v1354_v57, %v1345_v33  ;;  %v1393_v63 = vsel %vm344_vm10, %v3759_v4, %v3965_v50  ;;  %v1403_v57 = vld [vmem:[#allocation5 + $0x290] sm:$0xff] }
 0x4e9   :  { %v1416_v10 = vmul.f32 %v1408_v5, %v1393_v63  ;;  %v1456_v63 = vld [vmem:[#allocation5 + $0x2f0] sm:$0xff] }
 0x4ea   :  { %v3972_v54 = vadd.f32 %v1362_v21, %v3670_v59 }
 0x4eb   :  { %v3975_v1 = vadd.f32 %v1416_v10, %v3672_v29  ;;  %v1505_v10 = vld [vmem:[#allocation5 + $0x330] sm:$0xff] }
 0x4ec   :  { %5242 = vst [vmem:[#allocation81_spill] sm:$0xff] %v3972_v54  ;;  %1554 = vrot.lane.b32.xlu1 %v3279_v16, %s2389_s6  ;;  %1486 = vrot.lane.b32.xlu0 %v3290_v27, %s2387_s0 }
 0x4ed   :  { %1327 = vrot.lane.b32.xlu2 %v3286_v42, %s2386_s24 }
 0x4ee   :  { %v3983_v33 = vpop.permute.xlu0 %1384  ;;  %v3985_v4 = vpop.permute.xlu1 %1431 }
 0x4ef   :  { %5243 = vst [vmem:[#allocation82_spill] sm:$0xff] %v3985_v4  ;;  %v1394_v59 = vsel %vm344_vm10, %v3959_v43, %v3983_v33  ;;  %v3991_v29 = vpop.permute.xlu2 %1480  ;;  %v1579_v43 = vld [vmem:[#allocation5 + $0x3b0] sm:$0xff] }
 0x4f0   :  { %5244 = vst [vmem:[#allocation83_spill] sm:$0xff] %v3991_v29  ;;  %v1411_v5 = vmul.f32 %v1403_v57, %v1394_v59 }
 0x4f2   :  { %v3994_v21 = vadd.f32 %v1411_v5, %v3694_v53 }
 0x4f4   :  { %1609 = vrot.lane.b32.xlu1 %v3290_v27, %s2390_s13  ;;  %1599 = vrot.lane.b32.xlu0 %v3274_v38, %s2390_s13 }
 0x4f5   :  { %1437 = vrot.lane.b32.xlu2 %v3290_v27, %s2388_s1 }
 0x4f6   :  { %v4002_v54 = vpop.permute.xlu0 %1435  ;;  %v4004_v18 = vpop.permute.xlu1 %1484 }
 0x4f7   :  { %v1444_v53 = vsel %vm5245_vm15, %v3985_v4, %v4002_v54  ;;  %v4010_v57 = vpop.permute.xlu2 %1562  ;;  %v1493_v59 = vsel %vm396_vm13, %v3991_v29, %v4004_v18  ;;  %v961_v4 = vld [vmem:[#allocation5 + $0x48] sm:$0xff]  ;;  %v960_v29 = vld [vmem:[#allocation5 + $0x40] sm:$0xff] }
 0x4f8   :  { %v1464_v5 = vmul.f32 %v1456_v63, %v1444_v53  ;;  %v1513_v22 = vmul.f32 %v1505_v10, %v1493_v59  ;;  %v1156_v10 = vld [vmem:[#allocation5 + $0x140] sm:$0xff]  ;;  %v969_v34 = vmul.f32 %v961_v4, %v3442_v2  ;;  %v968_v23 = vmul.f32 %v960_v29, %v3450_v61  ;;  %v5261_v61 = vld [vmem:[#allocation45_spill] sm:$0xff] }
 0x4f9   :  { %v5255_v4 = vld [vmem:[#allocation15_spill] sm:$0xff] }
 0x4fa   :  { %v4017_v52 = vadd.f32 %v1464_v5, %v3723_v47  ;;  %v4020_v14 = vadd.f32 %v1513_v22, %v3726_v3  ;;  %v1157_v47 = vld [vmem:[#allocation5 + $0x148] sm:$0xff]  ;;  %v1751_v22 = vld [vmem:[#allocation5 + $0x4b0] sm:$0xff] }
 0x4fc   :  { %5246 = vst [vmem:[#allocation84_spill] sm:$0xff] %v4017_v52  ;;  %1658 = vrot.lane.b32.xlu1 %v3290_v27, %s2391_s14  ;;  %1648 = vrot.lane.b32.xlu0 %v3274_v38, %s2391_s14  ;;  %v5253_v52 = vld [vmem:[#allocation40_spill] sm:$0xff] }
 0x4fd   :  { %5247 = vst [vmem:[#allocation85_spill] sm:$0xff] %v4020_v14  ;;  %1548 = vrot.lane.b32.xlu2 %v3286_v42, %s2389_s6  ;;  %v5252_v14 = vld [vmem:[#allocation27_spill] sm:$0xff]  ;;  %v4062_v29 = vsel %vm85_vm3, %v5255_v4, %v5253_v52  ;;  %v1108_v4 = vld [vmem:[#allocation5 + $0x108] sm:$0xff] }
 0x4fe   :  { %v4028_v63 = vpop.permute.xlu0 %1558  ;;  %v4030_v53 = vpop.permute.xlu1 %1045  ;;  %5256 = vst [vmem:[#allocation27_spill] sm:$0xff] %v4062_v29 }
 0x4ff   :  { %5248 = vst [vmem:[#allocation86_spill] sm:$0xff] %v4028_v63  ;;  %v1565_v3 = vsel %vm435_vm12, %v4028_v63, %v4010_v57  ;;  %v1132_v59 = vpop.permute.xlu2 %1131 }
 0x500   :  { %v1587_v5 = vmul.f32 %v1579_v43, %v1565_v3  ;;  %v4039_v35 = vsel %vm214_vm5, %v1132_v59, %v3620_v25  ;;  %v4044_v31 = vsel %vm214_vm5, %v3812_v13, %v1132_v59  ;;  %v5251_v43 = vld [vmem:[#allocation39_spill] sm:$0xff]  ;;  %v912_v25 = vld [vmem:[#allocation5 + $0x8] sm:$0xff]  ;;  %v4056_v13 = vsel %vm85_vm3, %v5253_v52, %v5252_v14  ;;  %vm5281_vm3 = vmmov %vm5217_vm0 }
 0x501   :  { %5249 = vst [vmem:[#allocation87_spill] sm:$0xff] %v4039_v35  ;;  %v1164_v17 = vmul.f32 %v1156_v10, %v4044_v31  ;;  %v1165_v63 = vmul.f32 %v1157_v47, %v4039_v35  ;;  %v1759_v3 = vmul.f32 %v1751_v22, %v5251_v43  ;;  %v911_v59 = vld [vmem:[#allocation5] sm:$0xff]  ;;  %v1010_v22 = vld [vmem:[#allocation5 + $0x88] sm:$0xff]  ;;  %vm5291_vm5 = vmmov %vm5245_vm15 }
 0x502   :  { %5250 = vst [vmem:[#allocation88_spill] sm:$0xff] %v4044_v31  ;;  %v1595_v26 = vadd.f32 %v1587_v5, %v3793_v46  ;;  %v5259_v46 = vld [vmem:[#allocation37_spill] sm:$0xff]  ;;  %v1009_v14 = vld [vmem:[#allocation5 + $0x80] sm:$0xff]  ;;  %v1061_v31 = vld [vmem:[#allocation5 + $0xd8] sm:$0xff] }
 0x503   :  { %5254 = vst [vmem:[#allocation39_spill] sm:$0xff] %v4056_v13  ;;  %v4064_v10 = vadd.f32 %v1164_v17, %v968_v23  ;;  %v4066_v47 = vadd.f32 %v1165_v63, %v969_v34  ;;  %v1859_v5 = vmul.f32 %v1851_v0, %v5259_v46  ;;  %v1107_v52 = vld [vmem:[#allocation5 + $0x100] sm:$0xff]  ;;  %v920_v17 = vmul.f32 %v912_v25, %v4056_v13  ;;  %v1951_v23 = vld [vmem:[#allocation5 + $0x6b0] sm:$0xff]  ;;  %vm5293_vm11 = vmmov %vm5291_vm5 }
 0x504   :  { %v1767_v43 = vadd.f32 %v1759_v3, %v1595_v26  ;;  %1707 = vrot.lane.b32.xlu1 %v3290_v27, %s2392_s18  ;;  %1697 = vrot.lane.b32.xlu0 %v3274_v38, %s2392_s18  ;;  %v919_v34 = vmul.f32 %v911_v59, %v4062_v29  ;;  %v4081_v26 = vsel %vm162_vm6, %v3546_v39, %v4030_v53  ;;  %v1205_v63 = vld [vmem:[#allocation5 + $0x180] sm:$0xff]  ;;  %v1206_v3 = vld [vmem:[#allocation5 + $0x188] sm:$0xff]  ;;  %v1257_v59 = vld [vmem:[#allocation5 + $0x1d8] sm:$0xff] }
 0x505   :  { %5257 = vst [vmem:[#allocation40_spill] sm:$0xff] %v4064_v10  ;;  %1605 = vrot.lane.b32.xlu2 %v3288_v37, %s2390_s13  ;;  %v5264_v39 = vld [vmem:[#allocation52_spill] sm:$0xff]  ;;  %v5268_v38 = vld [vmem:[#allocation18_spill] sm:$0xff] }
 0x506   :  { %5258 = vst [vmem:[#allocation15_spill] sm:$0xff] %v4066_v47  ;;  %v1083_v0 = vpop.permute.xlu0 %1082  ;;  %v1181_v46 = vpop.permute.xlu1 %1180  ;;  %v1867_v35 = vadd.f32 %v1859_v5, %v1767_v43  ;;  %v1017_v29 = vmul.f32 %v1009_v14, %v5268_v38  ;;  %v1959_v47 = vmul.f32 %v1951_v23, %v3914_v32  ;;  %v5282_v38 = vld [vmem:[#allocation60_spill] sm:$0xff] }
 0x507   :  { %5260 = vst [vmem:[#allocation37_spill] sm:$0xff] %v4081_v26  ;;  %v4086_v2 = vsel %vm188_vm1, %v1083_v0, %v5261_v61  ;;  %v4091_v25 = vsel %vm188_vm1, %v3810_v58, %v1083_v0  ;;  %v4093_v27 = vpop.permute.xlu2 %1241  ;;  %v4098_v13 = vsel %vm240_vm4, %v1181_v46, %v5264_v39  ;;  %v4103_v5 = vsel %vm240_vm4, %v3821_v36, %v1181_v46  ;;  %v5267_v61 = vld [vmem:[#allocation22_spill] sm:$0xff]  ;;  %vm5280_vm1 = vmmov %vm5217_vm0 }
 0x508   :  { %5262 = vst [vmem:[#allocation45_spill] sm:$0xff] %v4086_v2  ;;  %v1018_v43 = vmul.f32 %v1010_v22, %v5267_v61  ;;  %v1115_v58 = vmul.f32 %v1107_v52, %v4091_v25  ;;  %v1116_v0 = vmul.f32 %v1108_v4, %v4086_v2  ;;  %v4114_v39 = vsel %vm266_vm8, %v3896_v8, %v4093_v27  ;;  %v1063_v8 = vld [vmem:[#allocation5 + $0xe8] sm:$0xff]  ;;  %vm5287_vm4 = vmmov %vm5217_vm0 }
 0x509   :  { %5263 = vst [vmem:[#allocation89_spill] sm:$0xff] %v4091_v25  ;;  %v1213_v10 = vmul.f32 %v1205_v63, %v4103_v5  ;;  %v1214_v36 = vmul.f32 %v1206_v3, %v4098_v13  ;;  %v1069_v22 = vmul.f32 %v1061_v31, %v4081_v26  ;;  %v1265_v52 = vmul.f32 %v1257_v59, %v4114_v39  ;;  %v5270_v63 = vld [vmem:[#allocation43_spill] sm:$0xff]  ;;  %v5271_v31 = vld [vmem:[#allocation20_spill] sm:$0xff] }
 0x50a   :  { %5265 = vst [vmem:[#allocation52_spill] sm:$0xff] %v4098_v13  ;;  %v4119_v46 = vadd.f32 %v1115_v58, %v919_v34  ;;  %v4121_v14 = vadd.f32 %v1116_v0, %v920_v17  ;;  %v4128_v23 = vadd.f32 %v1959_v47, %v1867_v35  ;;  %v5272_v17 = vld [vmem:[#allocation38_spill] sm:$0xff]  ;;  %v1258_v47 = vld [vmem:[#allocation5 + $0x1e0] sm:$0xff]  ;;  %v1259_v3 = vld [vmem:[#allocation5 + $0x1e8] sm:$0xff]  ;;  %vm5300_vm0 = vcmp.lt.s32.totalorder %v2709_v48, 120 }
 0x50b   :  { %5266 = vst [vmem:[#allocation90_spill] sm:$0xff] %v4103_v5  ;;  %v4124_v4 = vadd.f32 %v1213_v10, %v1017_v29  ;;  %v4126_v32 = vadd.f32 %v1214_v36, %v1018_v43  ;;  %v4130_v2 = vadd.f32 %v1265_v52, %v1069_v22  ;;  %v4140_v34 = vsel %vm162_vm6, %v5272_v17, %v5271_v31  ;;  %v1062_v29 = vld [vmem:[#allocation5 + $0xe0] sm:$0xff]  ;;  %v5274_v10 = vld [vmem:[#allocation62_spill] sm:$0xff]  ;;  %v1308_v58 = vld [vmem:[#allocation5 + $0x228] sm:$0xff] }
 0x50c   :  { %5269 = vst [vmem:[#allocation91_spill] sm:$0xff] %v4114_v39  ;;  %1552 = vrot.lane.b32.xlu1 %v5270_v63, %s2389_s6  ;;  %1425 = vrot.lane.b32.xlu0 %v3286_v42, %s2388_s1  ;;  %v4146_v35 = vsel %vm162_vm6, %v5274_v10, %v5272_v17  ;;  %v1307_v43 = vld [vmem:[#allocation5 + $0x220] sm:$0xff]  ;;  %v1357_v17 = vld [vmem:[#allocation5 + $0x268] sm:$0xff]  ;;  %v5279_v5 = vld [vmem:[#allocation57_spill] sm:$0xff] }
 0x50d   :  { %5273 = vst [vmem:[#allocation43_spill] sm:$0xff] %v4140_v34  ;;  %1654 = vrot.lane.b32.xlu2 %v3288_v37, %s2391_s14  ;;  %v5276_v36 = vld [vmem:[#allocation55_spill] sm:$0xff]  ;;  %v1070_v26 = vmul.f32 %v1062_v29, %v4146_v35  ;;  %vm5365_vm7 = vmmov %vm5300_vm0 }
 0x50e   :  { %5275 = vst [vmem:[#allocation20_spill] sm:$0xff] %v4146_v35  ;;  %v1232_v59 = vpop.permute.xlu0 %1231  ;;  %v1281_v0 = vpop.permute.xlu1 %1280  ;;  %v1356_v31 = vld [vmem:[#allocation5 + $0x260] sm:$0xff]  ;;  %v5306_v35 = vld [vmem:[#allocation16_spill] sm:$0xff]  ;;  %vm5367_vm15 = vmmov %vm5300_vm0 }
 0x50f   :  { %v4153_v22 = vsel %vm266_vm8, %v1232_v59, %v5276_v36  ;;  %v4158_v52 = vsel %vm266_vm8, %v3864_v15, %v1232_v59  ;;  %v1330_v10 = vpop.permute.xlu2 %1329  ;;  %v4163_v13 = vsel %vm5280_vm1, %v1281_v0, %v5279_v5  ;;  %v4168_v39 = vsel %vm5281_vm3, %v3906_v51, %v1281_v0 }
 0x510   :  { %5277 = vst [vmem:[#allocation38_spill] sm:$0xff] %v4153_v22  ;;  %v1071_v36 = vmul.f32 %v1063_v8, %v4140_v34  ;;  %v1266_v15 = vmul.f32 %v1258_v47, %v4158_v52  ;;  %v1267_v59 = vmul.f32 %v1259_v3, %v4153_v22  ;;  %v1348_v61 = vsel %vm318_vm9, %v1330_v10, %v5282_v38 }
 0x511   :  { %5278 = vst [vmem:[#allocation62_spill] sm:$0xff] %v4158_v52  ;;  %v1350_v5 = vsel %vm318_vm9, %v3938_v56, %v1330_v10  ;;  %v1315_v25 = vmul.f32 %v1307_v43, %v4168_v39  ;;  %v1316_v51 = vmul.f32 %v1308_v58, %v4163_v13  ;;  %v1365_v47 = vmul.f32 %v1357_v17, %v1348_v61 }
 0x512   :  { %v4182_v0 = vadd.f32 %v1266_v15, %v1070_v26  ;;  %v4184_v8 = vadd.f32 %v1267_v59, %v1071_v36  ;;  %v1364_v29 = vmul.f32 %v1356_v31, %v1350_v5  ;;  %v1355_v26 = vld [vmem:[#allocation5 + $0x258] sm:$0xff] }
 0x513   :  { %v4187_v3 = vadd.f32 %v1315_v25, %v3796_v40  ;;  %v4190_v22 = vadd.f32 %v1316_v51, %v3802_v44  ;;  %v4196_v56 = vadd.f32 %v1365_v47, %v3800_v28  ;;  %v1306_v40 = vld [vmem:[#allocation5 + $0x218] sm:$0xff] }
 0x514   :  { %5283 = vst [vmem:[#allocation55_spill] sm:$0xff] %v4184_v8  ;;  %v4193_v38 = vadd.f32 %v1364_v29, %v3798_v7  ;;  %1646 = vrot.lane.b32.xlu1 %v3286_v42, %s2391_s14  ;;  %1597 = vrot.lane.b32.xlu0 %v3286_v42, %s2390_s13  ;;  %v1404_v44 = vld [vmem:[#allocation5 + $0x298] sm:$0xff]  ;;  %v5304_v8 = vld [vmem:[#allocation85_spill] sm:$0xff] }
 0x515   :  { %5284 = vst [vmem:[#allocation57_spill] sm:$0xff] %v4190_v22  ;;  %1703 = vrot.lane.b32.xlu2 %v3288_v37, %s2392_s18 }
 0x516   :  { %5285 = vst [vmem:[#allocation60_spill] sm:$0xff] %v4193_v38  ;;  %v4204_v25 = vpop.permute.xlu0 %1290  ;;  %v4206_v61 = vpop.permute.xlu1 %1339  ;;  %v1575_v38 = vld [vmem:[#allocation5 + $0x390] sm:$0xff] }
 0x517   :  { %5286 = vst [vmem:[#allocation92_spill] sm:$0xff] %v4196_v56  ;;  %v4212_v7 = vsel %vm5287_vm4, %v3928_v55, %v4204_v25  ;;  %v4214_v28 = vpop.permute.xlu2 %1388  ;;  %v1343_v43 = vsel %vm318_vm9, %v3957_v30, %v4206_v61  ;;  %v1405_v30 = vld [vmem:[#allocation5 + $0x2a0] sm:$0xff]  ;;  %vm5412_vm4 = vmmov %vm5291_vm5 }
 0x518   :  { %v1314_v58 = vmul.f32 %v1306_v40, %v4212_v7  ;;  %v1392_v31 = vsel %vm344_vm10, %v3983_v33, %v4214_v28  ;;  %v1363_v17 = vmul.f32 %v1355_v26, %v1343_v43  ;;  %v1406_v33 = vld [vmem:[#allocation5 + $0x2a8] sm:$0xff] }
 0x519   :  { %v1412_v10 = vmul.f32 %v1404_v44, %v1392_v31 }
 0x51a   :  { %v4226_v36 = vadd.f32 %v1314_v58, %v3840_v41  ;;  %v4229_v55 = vadd.f32 %v1363_v17, %v3842_v62  ;;  %v1457_v41 = vld [vmem:[#allocation5 + $0x2f8] sm:$0xff]  ;;  %v5290_v62 = vld [vmem:[#allocation61_spill] sm:$0xff] }
 0x51b   :  { %v4232_v15 = vadd.f32 %v1412_v10, %v3844_v19 }
 0x51c   :  { %5288 = vst [vmem:[#allocation93_spill] sm:$0xff] %v4229_v55  ;;  %1701 = vrot.lane.b32.xlu1 %v3279_v16, %s2392_s18  ;;  %1652 = vrot.lane.b32.xlu0 %v3279_v16, %s2391_s14  ;;  %v5305_v55 = vld [vmem:[#allocation51_spill] sm:$0xff] }
 0x51d   :  { %1474 = vrot.lane.b32.xlu2 %v3286_v42, %s2387_s0 }
 0x51e   :  { %v1379_v59 = vpop.permute.xlu0 %1378  ;;  %v4240_v5 = vpop.permute.xlu1 %1429 }
 0x51f   :  { %5289 = vst [vmem:[#allocation94_spill] sm:$0xff] %v4240_v5  ;;  %v1397_v19 = vsel %vm344_vm10, %v1379_v59, %v5290_v62  ;;  %v1399_v51 = vsel %vm344_vm10, %v3965_v50, %v1379_v59  ;;  %v4248_v29 = vpop.permute.xlu2 %1439  ;;  %v1995_v59 = vld [vmem:[%s4924_s8] sm:$0xff] }
 0x520   :  { %v1413_v47 = vmul.f32 %v1405_v30, %v1399_v51  ;;  %v1414_v40 = vmul.f32 %v1406_v33, %v1397_v19  ;;  %v1442_v26 = vsel %vm5291_vm5, %v4002_v54, %v4248_v29  ;;  %v1452_v54 = vld [vmem:[#allocation5 + $0x2d0] sm:$0xff]  ;;  %v1580_v51 = vld [vmem:[#allocation5 + $0x3b8] sm:$0xff] }
 0x521   :  { %v1465_v44 = vmul.f32 %v1457_v41, %v1442_v26  ;;  %v1501_v19 = vld [vmem:[#allocation5 + $0x310] sm:$0xff] }
 0x522   :  { %v4255_v43 = vadd.f32 %v1413_v47, %v3877_v24  ;;  %v4258_v58 = vadd.f32 %v1414_v40, %v3879_v9  ;;  %v1506_v24 = vld [vmem:[#allocation5 + $0x338] sm:$0xff] }
 0x523   :  { %v4261_v31 = vadd.f32 %v1465_v44, %v3882_v6  ;;  %v1752_v40 = vld [vmem:[#allocation5 + $0x4b8] sm:$0xff] }
 0x524   :  { %1699 = vrot.lane.b32.xlu1 %v5270_v63, %s2392_s18  ;;  %1601 = vrot.lane.b32.xlu0 %v5270_v63, %s2390_s13 }
 0x525   :  { %1603 = vrot.lane.b32.xlu2 %v3279_v16, %s2390_s13 }
 0x526   :  { %v4269_v50 = vpop.permute.xlu0 %1433  ;;  %v4271_v17 = vpop.permute.xlu1 %1478 }
 0x527   :  { %5292 = vst [vmem:[#allocation61_spill] sm:$0xff] %v4271_v17  ;;  %v1443_v9 = vsel %vm5293_vm11, %v4240_v5, %v4269_v50  ;;  %v4277_v6 = vpop.permute.xlu2 %1488 }
 0x528   :  { %v1460_v10 = vmul.f32 %v1452_v54, %v1443_v9  ;;  %v1491_v30 = vsel %vm396_vm13, %v4004_v18, %v4277_v6  ;;  %v5294_v9 = vld [vmem:[#allocation48_spill] sm:$0xff] }
 0x529   :  { %v1514_v33 = vmul.f32 %v1506_v24, %v1491_v30  ;;  %v1852_v24 = vld [vmem:[#allocation5 + $0x5b8] sm:$0xff] }
 0x52a   :  { %v4287_v41 = vadd.f32 %v1460_v10, %v3917_v20  ;;  %v1760_v10 = vmul.f32 %v1752_v40, %v5294_v9  ;;  %v1860_v22 = vmul.f32 %v1852_v24, %v3774_v60 }
 0x52b   :  { %v4290_v62 = vadd.f32 %v1514_v33, %v3920_v49 }
 0x52c   :  { %1999 = vperm.xlu0 %2288, %v1995_v59   ;;  %v1952_v59 = vld [vmem:[#allocation5 + $0x6b8] sm:$0xff] }
 0x52d   :  { %1695 = vrot.lane.b32.xlu2 %v3286_v42, %s2392_s18  ;;  %s5486_s18 = smov 512  }
 0x52e   :  { %v4294_v47 = vpop.permute.xlu0 %1482  ;;  %v4296_v18 = vpop.permute.xlu1 %1550 }
 0x52f   :  { %v1492_v20 = vsel %vm396_vm13, %v4271_v17, %v4294_v47  ;;  %v4302_v26 = vpop.permute.xlu2 %1560  ;;  %v1571_v49 = vsel %vm435_vm12, %v4010_v57, %v4296_v18  ;;  %v1960_v57 = vmul.f32 %v1952_v59, %v4168_v39  ;;  %v5303_v17 = vld [vmem:[#allocation84_spill] sm:$0xff] }
 0x530   :  { %v1509_v44 = vmul.f32 %v1501_v19, %v1492_v20  ;;  %v1588_v54 = vmul.f32 %v1580_v51, %v1571_v49  ;;  %v1747_v20 = vld [vmem:[#allocation5 + $0x490] sm:$0xff] }
 0x532   :  { %v4310_v30 = vadd.f32 %v1509_v44, %v3946_v12  ;;  %v1596_v33 = vadd.f32 %v1588_v54, %v3975_v1  ;;  %v1847_v44 = vld [vmem:[#allocation5 + $0x590] sm:$0xff]  ;;  %v1755_v54 = vmul.f32 %v1747_v20, %v3414_v45 }
 0x533   :  { %v1855_v24 = vmul.f32 %v1847_v44, %v3819_v11 }
 0x534   :  { %5295 = vst [vmem:[#allocation48_spill] sm:$0xff] %v4310_v30  ;;  %v1768_v56 = vadd.f32 %v1760_v10, %v1596_v33  ;;  %v1628_v10 = vld [vmem:[#allocation5 + $0x3f0] sm:$0xff] }
 0x535   :  { %1650 = vrot.lane.b32.xlu2 %v5270_v63, %s2391_s14  ;;  %v1677_v33 = vld [vmem:[#allocation5 + $0x430] sm:$0xff]  ;;  %s2234_s14 = sshll.u32 %s4927_s11, 4  ;;  %s2235_s14 = int_to_ptr.hbm [resolvable:$true] %s2234_s14 }
 0x536   :  { %v4317_v19 = vpop.permute.xlu0 %1556  ;;  %v4319_v51 = vpop.permute.xlu1 %1607  ;;  %v1868_v40 = vadd.f32 %v1860_v22, %v1768_v56  ;;  %v1996_v22 = vld [vmem:[%s4924_s8 + $0x8] sm:$0xff]  ;;  %v1947_v56 = vld [vmem:[#allocation5 + $0x690] sm:$0xff] }
 0x537   :  { %5296 = vst [vmem:[#allocation95_spill] sm:$0xff] %v4317_v19  ;;  %v1564_v1 = vsel %vm435_vm12, %v4317_v19, %v4302_v26  ;;  %v4325_v12 = vpop.permute.xlu2 %1656 }
 0x538   :  { %5297 = vst [vmem:[#allocation96_spill] sm:$0xff] %v4319_v51  ;;  %v1583_v60 = vmul.f32 %v1575_v38, %v1564_v1  ;;  %v4327_v49 = vadd.f32 %v1960_v57, %v1868_v40  ;;  %v1955_v38 = vmul.f32 %v1947_v56, %v4212_v7  ;;  %v1776_v40 = vld [vmem:[#allocation5 + $0x4f0] sm:$0xff]  ;;  %v5301_v56 = vld [vmem:[#allocation42_spill] sm:$0xff] }
 0x539   :  { %5298 = vst [vmem:[#allocation97_spill] sm:$0xff] %v4325_v12  ;;  %v1876_v7 = vld [vmem:[#allocation5 + $0x5f0] sm:$0xff] }
 0x53a   :  { %v1591_v39 = vadd.f32 %v1583_v60, %v3994_v21  ;;  %v1801_v21 = vld [vmem:[#allocation5 + $0x530] sm:$0xff]  ;;  %v1884_v52 = vmul.f32 %v1876_v7, %v5305_v55  ;;  %v5312_v55 = vld [vmem:[#allocation64_spill] sm:$0xff]  ;;  %v1352_v7 = vld [vmem:[#allocation5 + $0x240] sm:$0xff] }
 0x53c   :  { %v1763_v9 = vadd.f32 %v1755_v54, %v1591_v39  ;;  %v1530_v54 = vld [vmem:[#allocation5 + $0x370] sm:$0xff] }
 0x53d   :  { %2004 = vperm.xlu2 %2287, %v1996_v22   ;;  %v1901_v22 = vld [vmem:[#allocation5 + $0x630] sm:$0xff]  ;;  %v1538_v34 = vmul.f32 %v1530_v54, %v5306_v35 }
 0x53e   :  { %v4336_v59 = vpop.permute.xlu0 %1611  ;;  %v4338_v57 = vpop.permute.xlu1 %1660  ;;  %v1863_v45 = vadd.f32 %v1855_v24, %v1763_v9  ;;  %v1784_v24 = vmul.f32 %v1776_v40, %v5301_v56  ;;  %v5302_v9 = vld [vmem:[#allocation35_spill] sm:$0xff] }
 0x53f   :  { %v1614_v20 = vsel %vm461_vm14, %v4319_v51, %v4336_v59  ;;  %v4344_v1 = vpop.permute.xlu2 %1709  ;;  %v1663_v11 = vsel %vm5300_vm0, %v4325_v12, %v4338_v57  ;;  %v1809_v5 = vmul.f32 %v1801_v21, %v5302_v9  ;;  %v5307_v12 = vld [vmem:[#allocation54_spill] sm:$0xff]  ;;  %v1059_v21 = vld [vmem:[#allocation5 + $0xc8] sm:$0xff] }
 0x540   :  { %5299 = vst [vmem:[#allocation98_spill] sm:$0xff] %v4344_v1  ;;  %v1636_v60 = vmul.f32 %v1628_v10, %v1614_v20  ;;  %v1685_v44 = vmul.f32 %v1677_v33, %v1663_v11  ;;  %v4350_v39 = vadd.f32 %v1955_v38, %v1863_v45  ;;  %v1909_v30 = vmul.f32 %v1901_v22, %v5307_v12  ;;  %v1058_v10 = vld [vmem:[#allocation5 + $0xc0] sm:$0xff]  ;;  %v5308_v33 = vld [vmem:[#allocation41_spill] sm:$0xff]  ;;  %v5310_v11 = vld [vmem:[#allocation30_spill] sm:$0xff] }
 0x541   :  { %v4363_v38 = vsel %vm162_vm6, %v4030_v53, %v5308_v33  ;;  %v1726_v20 = vld [vmem:[#allocation5 + $0x470] sm:$0xff]  ;;  %v1546_v12 = vadd.f32 %v1538_v34, %v5312_v55 }
 0x542   :  { %v1644_v51 = vadd.f32 %v1636_v60, %v5303_v17  ;;  %v1693_v19 = vadd.f32 %v1685_v44, %v5304_v8  ;;  %5309 = vst [vmem:[#allocation42_spill] sm:$0xff] %v4363_v38  ;;  %v1254_v17 = vld [vmem:[#allocation5 + $0x1c0] sm:$0xff]  ;;  %v4369_v8 = vsel %vm162_vm6, %v5308_v33, %v5310_v11  ;;  %v1353_v60 = vld [vmem:[#allocation5 + $0x248] sm:$0xff]  ;;  %v1926_v11 = vld [vmem:[#allocation5 + $0x670] sm:$0xff] }
 0x543   :  { %v1255_v44 = vld [vmem:[#allocation5 + $0x1c8] sm:$0xff]  ;;  %vm5326_vm6 = vmmov %vm5280_vm1 }
 0x544   :  { %v1792_v45 = vadd.f32 %v1784_v24, %v1644_v51  ;;  %v1817_v40 = vadd.f32 %v1809_v5, %v1693_v19  ;;  %v1826_v5 = vld [vmem:[#allocation5 + $0x570] sm:$0xff]  ;;  %v1066_v19 = vmul.f32 %v1058_v10, %v4363_v38  ;;  %v5314_v24 = vld [vmem:[#allocation70_spill] sm:$0xff]  ;;  %v5319_v38 = vld [vmem:[#allocation40_spill] sm:$0xff] }
 0x546   :  { %v4371_v35 = vpop.permute.xlu0 %1705  ;;  %v1230_v53 = vpop.permute.xlu1 %1229  ;;  %v1892_v54 = vadd.f32 %v1884_v52, %v1792_v45  ;;  %v1917_v51 = vadd.f32 %v1909_v30, %v1817_v40  ;;  %v5317_v30 = vld [vmem:[#allocation77_spill] sm:$0xff]  ;;  %v1067_v40 = vmul.f32 %v1059_v21, %v4369_v8 }
 0x547   :  { %5311 = vst [vmem:[#allocation35_spill] sm:$0xff] %v4371_v35  ;;  %v1712_v22 = vsel %vm5313_vm2, %v4371_v35, %v4344_v1  ;;  %v1328_v56 = vpop.permute.xlu2 %1327  ;;  %v4382_v9 = vsel %vm266_vm8, %v1230_v53, %v5314_v24  ;;  %v4387_v34 = vsel %vm266_vm8, %v4093_v27, %v1230_v53  ;;  %v5318_v27 = vld [vmem:[#allocation63_spill] sm:$0xff]  ;;  %v5324_v21 = vld [vmem:[#allocation73_spill] sm:$0xff]  ;;  %vm5327_vm8 = vmmov %vm5280_vm1 }
 0x548   :  { %5315 = vst [vmem:[#allocation84_spill] sm:$0xff] %v4382_v9  ;;  %v1734_v52 = vmul.f32 %v1726_v20, %v1712_v22  ;;  %v1347_v10 = vsel %vm318_vm9, %v1328_v56, %v5317_v30  ;;  %v1349_v33 = vsel %vm318_vm9, %v4206_v61, %v1328_v56  ;;  %v1262_v45 = vmul.f32 %v1254_v17, %v4387_v34  ;;  %v5321_v61 = vld [vmem:[#allocation15_spill] sm:$0xff]  ;;  %vm5329_vm9 = vmmov %vm5291_vm5 }
 0x549   :  { %5316 = vst [vmem:[#allocation85_spill] sm:$0xff] %v4387_v34  ;;  %v1360_v55 = vmul.f32 %v1352_v7, %v1349_v33  ;;  %v1361_v24 = vmul.f32 %v1353_v60, %v1347_v10  ;;  %v1263_v35 = vmul.f32 %v1255_v44, %v4382_v9  ;;  %v1834_v53 = vmul.f32 %v1826_v5, %v5318_v27  ;;  %v1303_v10 = vld [vmem:[#allocation5 + $0x200] sm:$0xff]  ;;  %v1304_v44 = vld [vmem:[#allocation5 + $0x208] sm:$0xff]  ;;  %vm5403_vm1 = vmmov %vm5313_vm2 }
 0x54a   :  { %v1742_v20 = vadd.f32 %v1734_v52, %v1546_v12  ;;  %v4399_v22 = vadd.f32 %v1262_v45, %v1066_v19  ;;  %v1983_v30 = vadd.f32 %v4128_v23, %v1892_v54  ;;  %v1934_v7 = vmul.f32 %v1926_v11, %v5324_v21  ;;  %v1401_v5 = vld [vmem:[#allocation5 + $0x280] sm:$0xff]  ;;  %v1402_v12 = vld [vmem:[#allocation5 + $0x288] sm:$0xff]  ;;  %vm5404_vm3 = vmmov %vm5403_vm1 }
 0x54b   :  { %v4403_v1 = vadd.f32 %v1360_v55, %v5319_v38  ;;  %v4406_v56 = vadd.f32 %v1361_v24, %v5321_v61  ;;  %v4408_v17 = vadd.f32 %v1263_v35, %v1067_v40  ;;  %v5325_v45 = vld [vmem:[#allocation75_spill] sm:$0xff]  ;;  %v1453_v35 = vld [vmem:[#allocation5 + $0x2d8] sm:$0xff]  ;;  %v5328_v40 = vld [vmem:[#allocation80_spill] sm:$0xff] }
 0x54c   :  { %v1842_v60 = vadd.f32 %v1834_v53, %v1742_v20  ;;  %v1774_v9 = vld [vmem:[#allocation5 + $0x4e0] sm:$0xff]  ;;  %vm5434_vm11 = vmmov %vm5403_vm1 }
 0x54d   :  { %5320 = vst [vmem:[#allocation51_spill] sm:$0xff] %v4403_v1  ;;  %v5385_v1 = vld [vmem:[#allocation69_spill] sm:$0xff]  ;;  %vm5451_vm2 = vmmov %vm5365_vm7 }
 0x54e   :  { %5322 = vst [vmem:[#allocation16_spill] sm:$0xff] %v4406_v56  ;;  %v1279_v33 = vpop.permute.xlu0 %1278  ;;  %v1377_v19 = vpop.permute.xlu1 %1376  ;;  %v1942_v52 = vadd.f32 %v1934_v7, %v1842_v60  ;;  %v5354_v56 = vld [vmem:[#allocation39_spill] sm:$0xff] }
 0x54f   :  { %5323 = vst [vmem:[#allocation54_spill] sm:$0xff] %v4408_v17  ;;  %v4414_v23 = vsel %vm5326_vm6, %v1279_v33, %v5325_v45  ;;  %v1300_v38 = vsel %vm5327_vm8, %v4204_v25, %v1279_v33  ;;  %v4419_v54 = vpop.permute.xlu2 %1437  ;;  %v1396_v11 = vsel %vm344_vm10, %v1377_v19, %v5328_v40  ;;  %v1398_v55 = vsel %vm344_vm10, %v4214_v28, %v1377_v19  ;;  %vm5332_vm10 = vmmov %vm5291_vm5 }
 0x550   :  { %v1311_v24 = vmul.f32 %v1303_v10, %v1300_v38  ;;  %v1312_v27 = vmul.f32 %v1304_v44, %v4414_v23  ;;  %v1441_v53 = vsel %vm5329_vm9, %v4269_v50, %v4419_v54  ;;  %v1409_v25 = vmul.f32 %v1401_v5, %v1398_v55  ;;  %v1454_v50 = vld [vmem:[#allocation5 + $0x2e0] sm:$0xff]  ;;  %vm5428_vm5 = vmmov %vm5412_vm4 }
 0x551   :  { %v1410_v20 = vmul.f32 %v1402_v12, %v1396_v11  ;;  %v1975_v61 = vadd.f32 %v1942_v52, %v1917_v51  ;;  %v1461_v60 = vmul.f32 %v1453_v35, %v1441_v53  ;;  %v1503_v51 = vld [vmem:[#allocation5 + $0x320] sm:$0xff]  ;;  %v1848_v35 = vld [vmem:[#allocation5 + $0x598] sm:$0xff]  ;;  %vm5453_vm6 = vmmov %vm5451_vm2 }
 0x552   :  { %v4433_v21 = vadd.f32 %v1311_v24, %v4119_v46  ;;  %v4436_v7 = vadd.f32 %v1312_v27, %v4121_v14  ;;  %v4439_v28 = vadd.f32 %v1409_v25, %v4124_v4  ;;  %v1576_v46 = vld [vmem:[#allocation5 + $0x398] sm:$0xff]  ;;  %v5334_v11 = vld [vmem:[#allocation27_spill] sm:$0xff]  ;;  %v5335_v27 = vld [vmem:[#allocation89_spill] sm:$0xff] }
 0x553   :  { %v4442_v10 = vadd.f32 %v1410_v20, %v4126_v32  ;;  %v1991_v44 = vadd.f32 %v1983_v30, %v1975_v61  ;;  %v4445_v33 = vadd.f32 %v1461_v60, %v4130_v2  ;;  %v1748_v32 = vld [vmem:[#allocation5 + $0x498] sm:$0xff]  ;;  %v1856_v53 = vmul.f32 %v1848_v35, %v5335_v27  ;;  %v1577_v61 = vld [vmem:[#allocation5 + $0x3a0] sm:$0xff]  ;;  %v1850_v35 = vld [vmem:[#allocation5 + $0x5a8] sm:$0xff] }
 0x554   :  { %5330 = vst [vmem:[#allocation41_spill] sm:$0xff] %v4433_v21  ;;  %v1756_v55 = vmul.f32 %v1748_v32, %v5334_v11  ;;  %v1948_v24 = vld [vmem:[#allocation5 + $0x698] sm:$0xff]  ;;  %v1749_v60 = vld [vmem:[#allocation5 + $0x4a0] sm:$0xff]  ;;  %v5394_v21 = vld [vmem:[#allocation21_spill] sm:$0xff] }
 0x555   :  { %5331 = vst [vmem:[#allocation30_spill] sm:$0xff] %v4436_v7  ;;  %2074 = vmatpush.msrb.mxu2 %v1991_v44  ;;  %v1502_v20 = vld [vmem:[#allocation5 + $0x318] sm:$0xff]  ;;  %v1956_v44 = vmul.f32 %v1948_v24, %v1300_v38  ;;  %v1849_v11 = vld [vmem:[#allocation5 + $0x5a0] sm:$0xff]  ;;  %vm5455_vm8 = vmmov %vm5403_vm1 }
 0x556   :  { %v4447_v5 = vpop.permute.xlu0 %1427  ;;  %v4449_v12 = vpop.permute.xlu1 %1476  ;;  %vm5457_vm9 = vmmov %vm5403_vm1 }
 0x557   :  { %v1448_v14 = vsel %vm5332_vm10, %v4248_v29, %v4447_v5  ;;  %v4455_v4 = vpop.permute.xlu2 %1548  ;;  %v1497_v2 = vsel %vm396_vm13, %v4277_v6, %v4449_v12  ;;  %vm5459_vm10 = vmmov %vm5451_vm2 }
 0x558   :  { %v1462_v30 = vmul.f32 %v1454_v50, %v1448_v14  ;;  %v1570_v19 = vsel %vm435_vm12, %v4302_v26, %v4455_v4  ;;  %v1511_v52 = vmul.f32 %v1503_v51, %v1497_v2  ;;  %v1578_v26 = vld [vmem:[#allocation5 + $0x3a8] sm:$0xff] }
 0x559   :  { %v1584_v45 = vmul.f32 %v1576_v46, %v1570_v19  ;;  %v1750_v51 = vld [vmem:[#allocation5 + $0x4a8] sm:$0xff] }
 0x55a   :  { %v4466_v40 = vadd.f32 %v1462_v30, %v4182_v0  ;;  %v4469_v29 = vadd.f32 %v1511_v52, %v4187_v3  ;;  %v5338_v52 = vld [vmem:[#allocation26_spill] sm:$0xff] }
 0x55b   :  { %v1592_v6 = vadd.f32 %v1584_v45, %v4232_v15  ;;  %v5337_v15 = vld [vmem:[#allocation86_spill] sm:$0xff]  ;;  %v1757_v45 = vmul.f32 %v1749_v60, %v5338_v52 }
 0x55c   :  { %5333 = vst [vmem:[#allocation64_spill] sm:$0xff] %v4469_v29  ;;  %v5371_v29 = vld [vmem:[#allocation22_spill] sm:$0xff] }
 0x55d   :  { %v1764_v25 = vadd.f32 %v1756_v55, %v1592_v6 }
 0x55e   :  { %v4474_v50 = vpop.permute.xlu0 %1486  ;;  %v1555_v0 = vpop.permute.xlu1 %1554 }
 0x55f   :  { %v1490_v3 = vsel %vm396_vm13, %v4294_v47, %v4474_v50  ;;  %v4480_v46 = vpop.permute.xlu2 %1605  ;;  %v1567_v14 = vsel %vm435_vm12, %v1555_v0, %v5337_v15  ;;  %v1569_v2 = vsel %vm435_vm12, %v4296_v18, %v1555_v0  ;;  %v1864_v38 = vadd.f32 %v1856_v53, %v1764_v25  ;;  %v5340_v47 = vld [vmem:[#allocation17_spill] sm:$0xff]  ;;  %v1950_v18 = vld [vmem:[#allocation5 + $0x6a8] sm:$0xff]  ;;  %v1949_v53 = vld [vmem:[#allocation5 + $0x6a0] sm:$0xff] }
 0x560   :  { %5336 = vst [vmem:[#allocation70_spill] sm:$0xff] %v4480_v46  ;;  %v1510_v32 = vmul.f32 %v1502_v20, %v1490_v3  ;;  %v1585_v30 = vmul.f32 %v1577_v61, %v1569_v2  ;;  %v1586_v19 = vmul.f32 %v1578_v26, %v1567_v14  ;;  %v1758_v24 = vmul.f32 %v1750_v51, %v5340_v47  ;;  %v5342_v25 = vld [vmem:[#allocation24_spill] sm:$0xff]  ;;  %v5343_v61 = vld [vmem:[#allocation65_spill] sm:$0xff]  ;;  %v1629_v3 = vld [vmem:[#allocation5 + $0x3f8] sm:$0xff] }
 0x561   :  { %v4489_v55 = vadd.f32 %v1956_v44, %v1864_v38  ;;  %v1858_v20 = vmul.f32 %v1850_v35, %v5342_v25  ;;  %v1857_v26 = vmul.f32 %v1849_v11, %v5343_v61  ;;  %v1624_v44 = vld [vmem:[#allocation5 + $0x3d0] sm:$0xff]  ;;  %v5344_v14 = vld [vmem:[#allocation59_spill] sm:$0xff]  ;;  %v1957_v51 = vmul.f32 %v1949_v53, %v4163_v13  ;;  %v1877_v53 = vld [vmem:[#allocation5 + $0x5f8] sm:$0xff] }
 0x562   :  { %v4493_v6 = vadd.f32 %v1510_v32, %v4226_v36  ;;  %v1593_v27 = vadd.f32 %v1585_v30, %v4255_v43  ;;  %v1594_v15 = vadd.f32 %v1586_v19, %v4258_v58  ;;  %v1958_v2 = vmul.f32 %v1950_v18, %v5344_v14  ;;  %v1772_v32 = vld [vmem:[#allocation5 + $0x4d0] sm:$0xff]  ;;  %v1777_v30 = vld [vmem:[#allocation5 + $0x4f8] sm:$0xff]  ;;  %v5346_v61 = vld [vmem:[#allocation23_spill] sm:$0xff] }
 0x563   :  { %5339 = vst [vmem:[#allocation77_spill] sm:$0xff] %v4489_v55  ;;  %v1526_v47 = vld [vmem:[#allocation5 + $0x350] sm:$0xff]  ;;  %v5355_v55 = vld [vmem:[#allocation12_spill] sm:$0xff] }
 0x564   :  { %5341 = vst [vmem:[#allocation63_spill] sm:$0xff] %v4493_v6  ;;  %v1765_v60 = vadd.f32 %v1757_v45, %v1593_v27  ;;  %v1766_v0 = vadd.f32 %v1758_v24, %v1594_v15  ;;  %v1531_v45 = vld [vmem:[#allocation5 + $0x378] sm:$0xff]  ;;  %v1528_v24 = vld [vmem:[#allocation5 + $0x360] sm:$0xff]  ;;  %v1529_v27 = vld [vmem:[#allocation5 + $0x368] sm:$0xff] }
 0x565   :  { %v1872_v25 = vld [vmem:[#allocation5 + $0x5d0] sm:$0xff]  ;;  %v5421_v6 = vld [vmem:[#allocation42_spill] sm:$0xff] }
 0x566   :  { %v4501_v36 = vpop.permute.xlu0 %1599  ;;  %v4503_v38 = vpop.permute.xlu1 %1609  ;;  %v1865_v43 = vadd.f32 %v1857_v26, %v1765_v60  ;;  %v1866_v58 = vadd.f32 %v1858_v20, %v1766_v0  ;;  %v1745_v20 = vld [vmem:[#allocation5 + $0x480] sm:$0xff]  ;;  %v1780_v26 = vmul.f32 %v1772_v32, %v5346_v61  ;;  %v4533_v32 = vmul.f32 %v1529_v27, %v3279_v16 }
 0x567   :  { %v1620_v19 = vsel %vm461_vm14, %v4336_v59, %v4501_v36  ;;  %v4509_v52 = vpop.permute.xlu2 %1654  ;;  %v1613_v13 = vsel %vm461_vm14, %v4480_v46, %v4503_v38  ;;  %v1527_v59 = vld [vmem:[#allocation5 + $0x358] sm:$0xff]  ;;  %v5347_v60 = vld [vmem:[#allocation47_spill] sm:$0xff] }
 0x568   :  { %5345 = vst [vmem:[#allocation40_spill] sm:$0xff] %v4509_v52  ;;  %v1637_v35 = vmul.f32 %v1629_v3, %v1620_v19  ;;  %v1632_v11 = vmul.f32 %v1624_v44, %v1613_v13  ;;  %v4515_v15 = vadd.f32 %v1957_v51, %v1865_v43  ;;  %v4517_v18 = vadd.f32 %v1958_v2, %v1866_v58  ;;  %v1524_v44 = vld [vmem:[#allocation5 + $0x340] sm:$0xff]  ;;  %v1525_v19 = vld [vmem:[#allocation5 + $0x348] sm:$0xff] }
 0x569   :  { %v1785_v0 = vmul.f32 %v1777_v30, %v5347_v60  ;;  %v1746_v13 = vld [vmem:[#allocation5 + $0x488] sm:$0xff]  ;;  %v4527_v2 = vmul.f32 %v1526_v47, %v3288_v37  ;;  %v5349_v58 = vld [vmem:[#allocation11_spill] sm:$0xff]  ;;  %5351 = vst [vmem:[#allocation73_spill] sm:$0xff] %v4533_v32  ;;  %v1678_v37 = vld [vmem:[#allocation5 + $0x438] sm:$0xff]  ;;  %v4544_v16 = vmul.f32 %v1524_v44, %v3286_v42  ;;  %v4547_v27 = vmul.f32 %v1525_v19, %v5270_v63 }
 0x56a   :  { %v1645_v14 = vadd.f32 %v1637_v35, %v4261_v31  ;;  %v1640_v3 = vadd.f32 %v1632_v11, %v4287_v41  ;;  %v5348_v51 = vld [vmem:[#allocation32_spill] sm:$0xff]  ;;  %v4530_v46 = vmul.f32 %v1528_v24, %v5349_v58  ;;  %v1770_v30 = vld [vmem:[#allocation5 + $0x4c0] sm:$0xff]  ;;  %v1773_v31 = vld [vmem:[#allocation5 + $0x4d8] sm:$0xff]  ;;  %v4541_v24 = vmul.f32 %v1527_v59, %v5355_v55 }
 0x56b   :  { %v4524_v43 = vmul.f32 %v1531_v45, %v5348_v51  ;;  %v5352_v35 = vld [vmem:[#allocation67_spill] sm:$0xff]  ;;  %v5353_v11 = vld [vmem:[#allocation68_spill] sm:$0xff]  ;;  %v4538_v45 = vmul.f32 %v1745_v20, %v5354_v56  ;;  %v1673_v47 = vld [vmem:[#allocation5 + $0x410] sm:$0xff]  ;;  %5356 = vst [vmem:[#allocation75_spill] sm:$0xff] %v4544_v16 }
 0x56c   :  { %5350 = vst [vmem:[#allocation15_spill] sm:$0xff] %v4530_v46  ;;  %v1885_v41 = vmul.f32 %v1877_v53, %v5352_v35  ;;  %v1880_v61 = vmul.f32 %v1872_v25, %v5353_v11  ;;  %v1793_v60 = vadd.f32 %v1785_v0, %v1645_v14  ;;  %v1788_v17 = vadd.f32 %v1780_v26, %v1640_v3  ;;  %v1771_v51 = vld [vmem:[#allocation5 + $0x4c8] sm:$0xff]  ;;  %v5358_v53 = vld [vmem:[#allocation29_spill] sm:$0xff]  ;;  %v1795_v20 = vld [vmem:[#allocation5 + $0x500] sm:$0xff] }
 0x56d   :  { %5357 = vst [vmem:[#allocation80_spill] sm:$0xff] %v4547_v27  ;;  %v4550_v58 = vmul.f32 %v1746_v13, %v5358_v53  ;;  %v5359_v25 = vld [vmem:[#allocation13_spill] sm:$0xff]  ;;  %v1775_v56 = vld [vmem:[#allocation5 + $0x4e8] sm:$0xff]  ;;  %v5363_v63 = vld [vmem:[#allocation50_spill] sm:$0xff] }
 0x56e   :  { %v4553_v26 = vmul.f32 %v1774_v9, %v5359_v25  ;;  %v1796_v0 = vld [vmem:[#allocation5 + $0x508] sm:$0xff]  ;;  %v4555_v14 = vpop.permute.xlu0 %1648  ;;  %v4557_v3 = vpop.permute.xlu1 %1658  ;;  %v1888_v55 = vadd.f32 %v1880_v61, %v1788_v17  ;;  %v1893_v59 = vadd.f32 %v1885_v41, %v1793_v60  ;;  %v4563_v19 = vmul.f32 %v1773_v31, %v5363_v63  ;;  %v1799_v13 = vld [vmem:[#allocation5 + $0x520] sm:$0xff]  ;;  %v1802_v35 = vld [vmem:[#allocation5 + $0x538] sm:$0xff] }
 0x56f   :  { %5360 = vst [vmem:[#allocation27_spill] sm:$0xff] %v4555_v14  ;;  %v5361_v42 = vld [vmem:[#allocation28_spill] sm:$0xff]  ;;  %v1797_v11 = vld [vmem:[#allocation5 + $0x510] sm:$0xff]  ;;  %v1669_v9 = vsel %vm5365_vm7, %v4338_v57, %v4555_v14  ;;  %v4569_v53 = vpop.permute.xlu2 %1703  ;;  %v1662_v17 = vsel %vm5367_vm15, %v4509_v52, %v4557_v3  ;;  %v1798_v41 = vld [vmem:[#allocation5 + $0x518] sm:$0xff]  ;;  %v4588_v14 = vmul.f32 %v1795_v20, %v5371_v29 }
 0x570   :  { %v4560_v44 = vmul.f32 %v1770_v30, %v5361_v42  ;;  %5364 = vst [vmem:[#allocation86_spill] sm:$0xff] %v4563_v19  ;;  %v1800_v30 = vld [vmem:[#allocation5 + $0x528] sm:$0xff]  ;;  %v1820_v61 = vld [vmem:[#allocation5 + $0x540] sm:$0xff]  ;;  %v1686_v31 = vmul.f32 %v1678_v37, %v1669_v9  ;;  %v1681_v60 = vmul.f32 %v1673_v47, %v1662_v17  ;;  %v4576_v25 = vadd.f32 %v4350_v39, %v1888_v55  ;;  %v5368_v63 = vld [vmem:[#allocation25_spill] sm:$0xff] }
 0x571   :  { %5366 = vst [vmem:[#allocation26_spill] sm:$0xff] %v4569_v53  ;;  %v4579_v42 = vadd.f32 %v4327_v49, %v1893_v59  ;;  %v4582_v57 = vmul.f32 %v1771_v51, %v5368_v63  ;;  %v5373_v52 = vld [vmem:[#allocation49_spill] sm:$0xff]  ;;  %v1824_v37 = vld [vmem:[#allocation5 + $0x560] sm:$0xff]  ;;  %v1902_v9 = vld [vmem:[#allocation5 + $0x638] sm:$0xff] }
 0x572   :  { %5362 = vst [vmem:[#allocation89_spill] sm:$0xff] %v4560_v44  ;;  %v5370_v44 = vld [vmem:[#allocation19_spill] sm:$0xff]  ;;  %v4591_v7 = vmul.f32 %v1796_v0, %v5373_v52  ;;  %v1897_v47 = vld [vmem:[#allocation5 + $0x610] sm:$0xff]  ;;  %v5375_v39 = vld [vmem:[#allocation46_spill] sm:$0xff]  ;;  %v1694_v63 = vadd.f32 %v1686_v31, %v4290_v62 }
 0x573   :  { %5369 = vst [vmem:[#allocation17_spill] sm:$0xff] %v4582_v57  ;;  %v4585_v27 = vmul.f32 %v1775_v56, %v5370_v44  ;;  %v1810_v55 = vmul.f32 %v1802_v35, %v5375_v39  ;;  %v5376_v17 = vld [vmem:[#allocation33_spill] sm:$0xff]  ;;  %v1821_v59 = vld [vmem:[#allocation5 + $0x548] sm:$0xff]  ;;  %v5378_v57 = vld [vmem:[#allocation14_spill] sm:$0xff]  ;;  %v4607_v35 = vmul.f32 %v1820_v61, %v4369_v8  ;;  %v1905_v62 = vmul.f32 %v1897_v47, %v5385_v1 }
 0x574   :  { %5372 = vst [vmem:[#allocation24_spill] sm:$0xff] %v4588_v14  ;;  %v1805_v49 = vmul.f32 %v1797_v11, %v5376_v17  ;;  %v1875_v16 = vld [vmem:[#allocation5 + $0x5e8] sm:$0xff]  ;;  %v4598_v29 = vmul.f32 %v1799_v13, %v5378_v57  ;;  %v5380_v20 = vld [vmem:[#allocation34_spill] sm:$0xff]  ;;  %v5387_v57 = vld [vmem:[#allocation43_spill] sm:$0xff] }
 0x575   :  { %5374 = vst [vmem:[#allocation65_spill] sm:$0xff] %v4591_v7  ;;  %v1825_v51 = vld [vmem:[#allocation5 + $0x568] sm:$0xff]  ;;  %v4601_v52 = vmul.f32 %v1800_v30, %v5380_v20  ;;  %v5382_v0 = vld [vmem:[#allocation18_spill] sm:$0xff]  ;;  %vm5460_vm7 = vmmov %vm5451_vm2 }
 0x576   :  { %v5377_v56 = vld [vmem:[#allocation48_spill] sm:$0xff]  ;;  %5379 = vst [vmem:[#allocation59_spill] sm:$0xff] %v4598_v29  ;;  %v4604_v7 = vmul.f32 %v1798_v41, %v5382_v0  ;;  %v4612_v29 = vmul.f32 %v1824_v37, %v5387_v57  ;;  %v5389_v30 = vld [vmem:[#allocation74_spill] sm:$0xff]  ;;  %v5391_v41 = vld [vmem:[#allocation31_spill] sm:$0xff] }
 0x577   :  { %v1689_v44 = vadd.f32 %v1681_v60, %v5377_v56  ;;  %5381 = vst [vmem:[#allocation23_spill] sm:$0xff] %v4601_v52  ;;  %v1900_v11 = vld [vmem:[#allocation5 + $0x628] sm:$0xff]  ;;  %v1818_v56 = vadd.f32 %v1810_v55, %v1694_v63  ;;  %v4615_v20 = vmul.f32 %v1821_v59, %v5389_v30  ;;  %v4618_v0 = vmul.f32 %v1875_v16, %v5391_v41  ;;  %v1722_v52 = vld [vmem:[#allocation5 + $0x450] sm:$0xff]  ;;  %v1827_v37 = vld [vmem:[#allocation5 + $0x578] sm:$0xff]  ;;  %v4629_v63 = vpop.permute.xlu0 %1697  ;;  %v4631_v59 = vpop.permute.xlu1 %1707 }
 0x578   :  { %5383 = vst [vmem:[#allocation47_spill] sm:$0xff] %v4604_v7  ;;  %v1846_v39 = vld [vmem:[#allocation5 + $0x588] sm:$0xff]  ;;  %v4624_v1 = vmul.f32 %v1900_v11, %v5394_v21  ;;  %v1899_v11 = vld [vmem:[#allocation5 + $0x620] sm:$0xff]  ;;  %v1822_v30 = vld [vmem:[#allocation5 + $0x550] sm:$0xff] }
 0x579   :  { %5384 = vst [vmem:[#allocation32_spill] sm:$0xff] %v4607_v35  ;;  %v1871_v17 = vld [vmem:[#allocation5 + $0x5c8] sm:$0xff]  ;;  %v1813_v13 = vadd.f32 %v1805_v49, %v1689_v44  ;;  %v1727_v35 = vld [vmem:[#allocation5 + $0x478] sm:$0xff]  ;;  %v1874_v49 = vld [vmem:[#allocation5 + $0x5e0] sm:$0xff] }
 0x57a   :  { %v1896_v14 = vld [vmem:[#allocation5 + $0x608] sm:$0xff]  ;;  %5388 = vst [vmem:[#allocation11_spill] sm:$0xff] %v4612_v29  ;;  %v5402_v41 = vld [vmem:[#allocation98_spill] sm:$0xff]  ;;  %vm5476_vm15 = vmmov %vm5403_vm1 }
 0x57b   :  { %v5386_v31 = vld [vmem:[#allocation72_spill] sm:$0xff]  ;;  %5390 = vst [vmem:[#allocation67_spill] sm:$0xff] %v4615_v20  ;;  %v4633_v16 = vadd.f32 %v1905_v62, %v1813_v13  ;;  %v1711_v62 = vsel %vm5404_vm3, %v4569_v53, %v4631_v59  ;;  %v5410_v29 = vld [vmem:[#allocation66_spill] sm:$0xff] }
 0x57c   :  { %v1910_v60 = vmul.f32 %v1902_v9, %v5386_v31  ;;  %v5392_v8 = vld [vmem:[#allocation44_spill] sm:$0xff]  ;;  %5395 = vst [vmem:[#allocation39_spill] sm:$0xff] %v4624_v1  ;;  %v1730_v20 = vmul.f32 %v1722_v52, %v1711_v62  ;;  %v1823_v53 = vld [vmem:[#allocation5 + $0x558] sm:$0xff] }
 0x57d   :  { %v4621_v61 = vmul.f32 %v1825_v51, %v5392_v8  ;;  %v5396_v47 = vld [vmem:[#allocation36_spill] sm:$0xff]  ;;  %5397 = vst [vmem:[#allocation12_spill] sm:$0xff] %v4629_v63  ;;  %v5398_v51 = vld [vmem:[#allocation53_spill] sm:$0xff]  ;;  %v1718_v8 = vsel %vm5403_vm1, %v5402_v41, %v4629_v63  ;;  %v4662_v63 = vmul.f32 %v1874_v49, %v5410_v29  ;;  %v1927_v32 = vld [vmem:[#allocation5 + $0x678] sm:$0xff] }
 0x57e   :  { %v4627_v9 = vmul.f32 %v1846_v39, %v5396_v47  ;;  %v1925_v55 = vld [vmem:[#allocation5 + $0x668] sm:$0xff]  ;;  %v4635_v44 = vadd.f32 %v1910_v60, %v1818_v56  ;;  %v4638_v31 = vmul.f32 %v1871_v17, %v5398_v51  ;;  %v4647_v47 = vpop.permute.xlu2 %1474  ;;  %v1873_v60 = vld [vmem:[#allocation5 + $0x5d8] sm:$0xff]  ;;  %v1922_v56 = vld [vmem:[#allocation5 + $0x650] sm:$0xff]  ;;  %v1735_v51 = vmul.f32 %v1727_v35, %v1718_v8 }
 0x57f   :  { %5393 = vst [vmem:[#allocation68_spill] sm:$0xff] %v4621_v61  ;;  %v5400_v57 = vld [vmem:[#allocation56_spill] sm:$0xff]  ;;  %v5411_v19 = vld [vmem:[#allocation82_spill] sm:$0xff]  ;;  %v5413_v35 = vld [vmem:[#allocation71_spill] sm:$0xff] }
 0x580   :  { %5399 = vst [vmem:[#allocation29_spill] sm:$0xff] %v4638_v31  ;;  %v4641_v21 = vmul.f32 %v1896_v14, %v5400_v57  ;;  %v1921_v39 = vld [vmem:[#allocation5 + $0x648] sm:$0xff]  ;;  %v5405_v14 = vld [vmem:[#allocation79_spill] sm:$0xff]  ;;  %v5406_v57 = vld [vmem:[#allocation81_spill] sm:$0xff]  ;;  %v4669_v8 = vmul.f32 %v1899_v11, %v5413_v35 }
 0x581   :  { %v1946_v17 = vld [vmem:[#allocation5 + $0x688] sm:$0xff]  ;;  %v1547_v13 = vadd.f32 %v4524_v43, %v5405_v14  ;;  %v1542_v31 = vadd.f32 %v4527_v2, %v5406_v57  ;;  %v1446_v43 = vsel %vm5412_vm4, %v4447_v5, %v5411_v19  ;;  %v5415_v2 = vld [vmem:[#allocation37_spill] sm:$0xff]  ;;  %v1898_v62 = vld [vmem:[#allocation5 + $0x618] sm:$0xff] }
 0x582   :  { %5401 = vst [vmem:[#allocation13_spill] sm:$0xff] %v4641_v21  ;;  %v5407_v21 = vld [vmem:[#allocation58_spill] sm:$0xff]  ;;  %v5409_v1 = vld [vmem:[#allocation20_spill] sm:$0xff]  ;;  %v1830_v52 = vmul.f32 %v1822_v30, %v5415_v2  ;;  %v5419_v5 = vld [vmem:[#allocation91_spill] sm:$0xff] }
 0x583   :  { %v4658_v41 = vmul.f32 %v1925_v55, %v5407_v21  ;;  %v1835_v61 = vmul.f32 %v1827_v37, %v5409_v1  ;;  %v1455_v7 = vld [vmem:[#allocation5 + $0x2e8] sm:$0xff]  ;;  %5414 = vst [vmem:[#allocation50_spill] sm:$0xff] %v4669_v8  ;;  %v1845_v55 = vld [vmem:[#allocation5 + $0x580] sm:$0xff]  ;;  %v1743_v1 = vadd.f32 %v1735_v51, %v1547_v13  ;;  %v1738_v37 = vadd.f32 %v1730_v20, %v1542_v31  ;;  %v5417_v14 = vld [vmem:[#allocation78_spill] sm:$0xff] }
 0x584   :  { %v1895_v21 = vld [vmem:[#allocation5 + $0x600] sm:$0xff]  ;;  %v5416_v29 = vld [vmem:[#allocation76_spill] sm:$0xff]  ;;  %v4676_v57 = vmul.f32 %v1946_v17, %v5417_v14  ;;  %v1930_v19 = vmul.f32 %v1922_v56, %v5419_v5  ;;  %v5420_v35 = vld [vmem:[#allocation62_spill] sm:$0xff]  ;;  %v1463_v30 = vmul.f32 %v1455_v7, %v1446_v43  ;;  %v4684_v13 = vmul.f32 %v1823_v53, %v5421_v6  ;;  %v4698_v7 = vpop.permute.xlu0 %1425  ;;  %v1553_v53 = vpop.permute.xlu1 %1552 }
 0x585   :  { %5408 = vst [vmem:[#allocation28_spill] sm:$0xff] %v4658_v41  ;;  %v4673_v49 = vmul.f32 %v1921_v39, %v5416_v29  ;;  %v5418_v41 = vld [vmem:[#allocation88_spill] sm:$0xff]  ;;  %v1924_v11 = vld [vmem:[#allocation5 + $0x660] sm:$0xff]  ;;  %v1935_v8 = vmul.f32 %v1927_v32, %v5420_v35  ;;  %v1843_v2 = vadd.f32 %v1835_v61, %v1743_v1  ;;  %v1838_v46 = vadd.f32 %v1830_v52, %v1738_v37  ;;  %v5422_v20 = vld [vmem:[#allocation45_spill] sm:$0xff] }
 0x586   :  { %v4679_v34 = vmul.f32 %v1873_v60, %v5418_v41  ;;  %v4687_v31 = vmul.f32 %v1845_v55, %v5422_v20  ;;  %v5423_v39 = vld [vmem:[#allocation52_spill] sm:$0xff]  ;;  %v5424_v51 = vld [vmem:[#allocation90_spill] sm:$0xff]  ;;  %v1450_v41 = vld [vmem:[#allocation5 + $0x2c0] sm:$0xff]  ;;  %v1447_v37 = vsel %vm5428_vm5, %v4419_v54, %v4698_v7  ;;  %v1604_v5 = vpop.permute.xlu2 %1603 }
 0x587   :  { %v4690_v17 = vmul.f32 %v1895_v21, %v5423_v39  ;;  %v4693_v60 = vmul.f32 %v1898_v62, %v5424_v51  ;;  %v1626_v56 = vld [vmem:[#allocation5 + $0x3e0] sm:$0xff]  ;;  %v5425_v29 = vld [vmem:[#allocation38_spill] sm:$0xff]  ;;  %v1627_v32 = vld [vmem:[#allocation5 + $0x3e8] sm:$0xff]  ;;  %v1938_v43 = vadd.f32 %v1930_v19, %v1838_v46  ;;  %v1943_v52 = vadd.f32 %v1935_v8, %v1843_v2 }
 0x588   :  { %v4696_v14 = vmul.f32 %v1924_v11, %v5425_v29  ;;  %v1573_v61 = vld [vmem:[#allocation5 + $0x380] sm:$0xff]  ;;  %v1574_v6 = vld [vmem:[#allocation5 + $0x388] sm:$0xff]  ;;  %v5426_v55 = vld [vmem:[#allocation93_spill] sm:$0xff]  ;;  %v1458_v35 = vmul.f32 %v1450_v41, %v1447_v37  ;;  %v1618_v54 = vsel %vm461_vm14, %v4501_v36, %v1604_v5 }
 0x589   :  { %v4702_v21 = vadd.f32 %v4541_v24, %v5426_v55  ;;  %v5427_v1 = vld [vmem:[#allocation83_spill] sm:$0xff]  ;;  %v1568_v24 = vsel %vm435_vm12, %v4455_v4, %v1553_v53  ;;  %v5431_v2 = vld [vmem:[#allocation96_spill] sm:$0xff]  ;;  %v1634_v39 = vmul.f32 %v1626_v56, %v1618_v54  ;;  %v1496_v4 = vsel %vm396_vm13, %v4474_v50, %v4647_v47 }
 0x58a   :  { %v1495_v62 = vsel %vm396_vm13, %v4449_v12, %v5427_v1  ;;  %v5429_v11 = vld [vmem:[#allocation95_spill] sm:$0xff]  ;;  %v1616_v12 = vsel %vm461_vm14, %v1604_v5, %v5431_v2  ;;  %v1581_v29 = vmul.f32 %v1573_v61, %v1568_v24  ;;  %v1971_v41 = vadd.f32 %v1938_v43, %v4633_v16  ;;  %v1504_v1 = vld [vmem:[#allocation5 + $0x328] sm:$0xff]  ;;  %v1625_v43 = vld [vmem:[#allocation5 + $0x3d8] sm:$0xff] }
 0x58b   :  { %v1566_v46 = vsel %vm435_vm12, %v1553_v53, %v5429_v11  ;;  %v5430_v8 = vld [vmem:[#allocation55_spill] sm:$0xff]  ;;  %v1635_v51 = vmul.f32 %v1627_v32, %v1616_v12  ;;  %v1976_v53 = vadd.f32 %v1943_v52, %v4635_v44  ;;  %v1642_v36 = vadd.f32 %v1634_v39, %v4466_v40 }
 0x58c   :  { %v1471_v19 = vadd.f32 %v1463_v30, %v5430_v8  ;;  %v1945_v20 = vld [vmem:[#allocation5 + $0x680] sm:$0xff]  ;;  %v1582_v55 = vmul.f32 %v1574_v6, %v1566_v46  ;;  %v4730_v30 = vadd.f32 %v1458_v35, %v4399_v22  ;;  %v1589_v32 = vadd.f32 %v1581_v29, %v4439_v28  ;;  %v4753_v11 = vpop.permute.xlu0 %1597  ;;  %v1647_v46 = vpop.permute.xlu1 %1646 }
 0x58d   :  { %v1499_v37 = vld [vmem:[#allocation5 + $0x300] sm:$0xff]  ;;  %v1953_v6 = vmul.f32 %v1945_v20, %v4414_v23  ;;  %v1987_v50 = vadd.f32 %v4576_v25, %v1971_v41  ;;  %v1992_v22 = vadd.f32 %v4579_v42, %v1976_v53  ;;  %vm2007_vm12 = vcmask 130048   ;;  %v1674_v23 = vld [vmem:[#allocation5 + $0x418] sm:$0xff]  ;;  %v5432_v25 = vld [vmem:[#allocation61_spill] sm:$0xff] }
 0x58e   :  { %v1643_v56 = vadd.f32 %v1635_v51, %v1471_v19  ;;  %v1590_v61 = vadd.f32 %v1582_v55, %v4442_v10  ;;  %v4743_v16 = vld [vmem:[%s4923_s7] sm:$0xff]  ;;  %v1790_v44 = vadd.f32 %v4553_v26, %v1642_v36  ;;  %v1761_v28 = vadd.f32 %v4538_v45, %v1589_v32  ;;  %v1723_v26 = vld [vmem:[#allocation5 + $0x458] sm:$0xff]  ;;  %v5440_v53 = vld [vmem:[#allocation85_spill] sm:$0xff] }
 0x58f   :  { %v1512_v52 = vmul.f32 %v1504_v1, %v1495_v62  ;;  %v1494_v42 = vsel %vm396_vm13, %v4647_v47, %v5432_v25  ;;  %v1507_v5 = vmul.f32 %v1499_v37, %v1496_v4  ;;  %2075 = vmatpush.msrb.mxu2 %v1987_v50  ;;  %2097 = vmatpush.msrb.mxu3 %v1992_v22  ;;  %vm5433_vm13 = vmmov %vm5300_vm0  ;;  %v5435_v39 = vld [vmem:[#allocation63_spill] sm:$0xff]  ;;  %v5436_v55 = vld [vmem:[#allocation94_spill] sm:$0xff] }
 0x590   :  { %v1791_v40 = vadd.f32 %v4585_v27, %v1643_v56  ;;  %v1762_v10 = vadd.f32 %v4550_v58, %v1590_v61  ;;  %v1500_v27 = vld [vmem:[#allocation5 + $0x308] sm:$0xff]  ;;  %2260 = vmatmul.msk.f32.vlgmr.msrb.gmra.mxu2 %vm2007_vm12, %v4743_v16  ;;  %v1619_v45 = vsel %vm461_vm14, %v4503_v38, %v4753_v11  ;;  %v4761_v58 = vpop.permute.xlu2 %1695  ;;  %v1668_v47 = vsel %vm5433_vm13, %v4557_v3, %v1647_v46  ;;  %v1923_v38 = vld [vmem:[#allocation5 + $0x658] sm:$0xff]  ;;  %vm5437_vm0 = vmmov %vm5412_vm4 }
 0x591   :  { %v1890_v62 = vadd.f32 %v4662_v63, %v1790_v44  ;;  %v1633_v8 = vmul.f32 %v1625_v43, %v1619_v45  ;;  %v1717_v19 = vsel %vm5434_vm11, %v4631_v59, %v4761_v58  ;;  %v1682_v35 = vmul.f32 %v1674_v23, %v1668_v47  ;;  %v1451_v59 = vld [vmem:[#allocation5 + $0x2c8] sm:$0xff]  ;;  %v5441_v1 = vld [vmem:[#allocation86_spill] sm:$0xff]  ;;  %v5442_v36 = vld [vmem:[#allocation47_spill] sm:$0xff] }
 0x592   :  { %v1891_v24 = vadd.f32 %v4618_v0, %v1791_v40  ;;  %v1861_v2 = vadd.f32 %v4687_v31, %v1761_v28  ;;  %v1731_v12 = vmul.f32 %v1723_v26, %v1717_v19  ;;  %v1862_v63 = vadd.f32 %v4627_v9, %v1762_v10  ;;  %v5438_v4 = vld [vmem:[#allocation60_spill] sm:$0xff]  ;;  %v5444_v61 = vld [vmem:[#allocation73_spill] sm:$0xff]  ;;  %v1675_v40 = vld [vmem:[#allocation5 + $0x420] sm:$0xff] }
 0x593   :  { %v4774_v54 = vadd.f32 %v4515_v15, %v1890_v62  ;;  %v1508_v0 = vmul.f32 %v1500_v27, %v1494_v42  ;;  %v1641_v20 = vadd.f32 %v1633_v8, %v4445_v33  ;;  %v1690_v51 = vadd.f32 %v1682_v35, %v5435_v39  ;;  %v4800_v32 = vld [vmem:[%s4923_s7 + $0x8] sm:$0xff]  ;;  %v5446_v22 = vld [vmem:[#allocation41_spill] sm:$0xff]  ;;  %v1671_v10 = vld [vmem:[#allocation5 + $0x400] sm:$0xff] }
 0x594   :  { %v4777_v3 = vadd.f32 %v4517_v18, %v1891_v24  ;;  %v4782_v29 = vadd.f32 %v1953_v6, %v1861_v2  ;;  %v1445_v31 = vsel %vm5437_vm0, %v4698_v7, %v5436_v55  ;;  %v1739_v15 = vadd.f32 %v1731_v12, %v4702_v21  ;;  %v5439_v18 = vld [vmem:[#allocation15_spill] sm:$0xff]  ;;  %v5443_v7 = vld [vmem:[#allocation92_spill] sm:$0xff]  ;;  %v5445_v6 = vld [vmem:[#allocation57_spill] sm:$0xff]  ;;  %v1653_v45 = vpop.permute.xlu0 %1652  ;;  %v1702_v8 = vpop.permute.xlu1 %1701 }
 0x595   :  { %v1544_v41 = vadd.f32 %v5439_v18, %v5438_v4  ;;  %v4792_v9 = vadd.f32 %v4676_v57, %v1862_v63  ;;  %v1931_v33 = vmul.f32 %v1923_v38, %v5440_v53  ;;  %v1789_v37 = vadd.f32 %v5441_v1, %v1641_v20  ;;  %v1676_v28 = vld [vmem:[#allocation5 + $0x428] sm:$0xff]  ;;  %v5447_v43 = vld [vmem:[#allocation51_spill] sm:$0xff]  ;;  %v5449_v42 = vld [vmem:[#allocation30_spill] sm:$0xff] }
 0x596   :  { %v1814_v56 = vadd.f32 %v5442_v36, %v1690_v51  ;;  %v1545_v21 = vadd.f32 %v5444_v61, %v5443_v7  ;;  %v1520_v50 = vadd.f32 %v1512_v52, %v5445_v6  ;;  %v1515_v44 = vadd.f32 %v1507_v5, %v5446_v22  ;;  %v5448_v23 = vld [vmem:[#allocation75_spill] sm:$0xff]  ;;  %v1672_v47 = vld [vmem:[#allocation5 + $0x408] sm:$0xff]  ;;  %v5462_v36 = vld [vmem:[#allocation77_spill] sm:$0xff] }
 0x597   :  { %v1839_v57 = vadd.f32 %v4684_v13, %v1739_v15  ;;  %v4809_v25 = vadd.f32 %v5448_v23, %v5447_v43  ;;  %v1516_v26 = vadd.f32 %v1508_v0, %v5449_v42  ;;  %v1459_v27 = vmul.f32 %v1451_v59, %v1445_v31  ;;  %v1724_v62 = vld [vmem:[#allocation5 + $0x460] sm:$0xff]  ;;  %v1725_v24 = vld [vmem:[#allocation5 + $0x468] sm:$0xff]  ;;  %v5450_v13 = vld [vmem:[#allocation97_spill] sm:$0xff] }
 0x598   :  { %v1889_v52 = vadd.f32 %v4679_v34, %v1789_v37  ;;  %v1914_v5 = vadd.f32 %v4693_v60, %v1814_v56  ;;  %2261 = vmatmul.msk.f32.gmra.mxu2 %vm2007_vm12, %v4800_v32  ;;  %v1665_v19 = vsel %vm5451_vm2, %v1653_v45, %v5450_v13  ;;  %v5452_v35 = vld [vmem:[#allocation27_spill] sm:$0xff]  ;;  %v1651_v38 = vpop.permute.xlu2 %1650  ;;  %v5456_v0 = vld [vmem:[#allocation12_spill] sm:$0xff]  ;;  %v5471_v13 = vld [vmem:[#allocation54_spill] sm:$0xff] }
 0x599   :  { %v1667_v2 = vsel %vm5453_vm6, %v5452_v35, %v1653_v45  ;;  %v5454_v12 = vld [vmem:[#allocation35_spill] sm:$0xff]  ;;  %v1716_v34 = vsel %vm5457_vm9, %v5456_v0, %v1702_v8  ;;  %v1684_v20 = vmul.f32 %v1676_v28, %v1665_v19  ;;  %v5458_v39 = vld [vmem:[#allocation40_spill] sm:$0xff]  ;;  %v1666_v59 = vsel %vm5460_vm7, %v1647_v46, %v1651_v38 }
 0x59a   :  { %v1714_v63 = vsel %vm5455_vm8, %v1702_v8, %v5454_v12  ;;  %v1683_v60 = vmul.f32 %v1675_v40, %v1667_v2  ;;  %v1664_v51 = vsel %vm5459_vm10, %v1651_v38, %v5458_v39  ;;  %v1679_v55 = vmul.f32 %v1671_v10, %v1666_v59  ;;  %v5461_v18 = vld [vmem:[#allocation64_spill] sm:$0xff]  ;;  %v5463_v40 = vld [vmem:[#allocation59_spill] sm:$0xff]  ;;  %v5468_v8 = vld [vmem:[#allocation65_spill] sm:$0xff] }
 0x59b   :  { %v1680_v31 = vmul.f32 %v1672_v47, %v1664_v51  ;;  %v1732_v15 = vmul.f32 %v1724_v62, %v1716_v34  ;;  %v1733_v4 = vmul.f32 %v1725_v24, %v1714_v63  ;;  %v1692_v1 = vadd.f32 %v1684_v20, %v1520_v50  ;;  %v5464_v43 = vld [vmem:[#allocation23_spill] sm:$0xff]  ;;  %v5465_v10 = vld [vmem:[#allocation16_spill] sm:$0xff]  ;;  %v5472_v38 = vld [vmem:[#allocation50_spill] sm:$0xff] }
 0x59c   :  { %v1691_v53 = vadd.f32 %v1683_v60, %v5461_v18  ;;  %v1939_v37 = vadd.f32 %v1931_v33, %v1839_v57  ;;  %v1980_v56 = vadd.f32 %v5462_v36, %v1889_v52  ;;  %v1687_v7 = vadd.f32 %v1679_v55, %v1515_v44  ;;  %v1622_v46 = vld [vmem:[#allocation5 + $0x3c0] sm:$0xff]  ;;  %v5466_v45 = vld [vmem:[#allocation80_spill] sm:$0xff]  ;;  %v1602_v2 = vpop.permute.xlu0 %1601  ;;  %v5474_v34 = vld [vmem:[#allocation70_spill] sm:$0xff] }
 0x59d   :  { %v1688_v61 = vadd.f32 %v1680_v31, %v1516_v26  ;;  %v1740_v6 = vadd.f32 %v1732_v15, %v1544_v41  ;;  %v1741_v22 = vadd.f32 %v1733_v4, %v1545_v21  ;;  %v1816_v23 = vadd.f32 %v5464_v43, %v1692_v1  ;;  %v5467_v62 = vld [vmem:[#allocation24_spill] sm:$0xff]  ;;  %v5469_v33 = vld [vmem:[#allocation11_spill] sm:$0xff]  ;;  %v5475_v39 = vld [vmem:[#allocation26_spill] sm:$0xff] }
 0x59e   :  { %v1815_v28 = vadd.f32 %v5463_v40, %v1691_v53  ;;  %v1972_v42 = vadd.f32 %v1939_v37, %v1914_v5  ;;  %v1541_v47 = vadd.f32 %v5466_v45, %v5465_v10  ;;  %v1811_v24 = vadd.f32 %v5467_v62, %v1687_v7  ;;  %v5470_v52 = vld [vmem:[#allocation68_spill] sm:$0xff]  ;;  %v1720_v41 = vld [vmem:[#allocation5 + $0x440] sm:$0xff]  ;;  %v1700_v5 = vpop.permute.xlu1 %1699  ;;  %v5478_v36 = vld [vmem:[#allocation13_spill] sm:$0xff] }
 0x59f   :  { %v1812_v50 = vadd.f32 %v5468_v8, %v1688_v61  ;;  %v1840_v57 = vadd.f32 %v5469_v33, %v1740_v6  ;;  %v1841_v44 = vadd.f32 %v5470_v52, %v1741_v22  ;;  %v1623_v26 = vld [vmem:[#allocation5 + $0x3c8] sm:$0xff]  ;;  %v1467_v19 = vadd.f32 %v1459_v27, %v5471_v13  ;;  %v5473_v63 = vld [vmem:[#allocation39_spill] sm:$0xff] }
 0x5a0   :  { %v1721_v21 = vld [vmem:[#allocation5 + $0x448] sm:$0xff]  ;;  %v1988_v35 = vadd.f32 %v1980_v56, %v1972_v42  ;;  %v1915_v12 = vadd.f32 %v5472_v38, %v1815_v28  ;;  %v1916_v0 = vadd.f32 %v5473_v63, %v1816_v23  ;;  %v1615_v60 = vsel %vm461_vm14, %v1602_v2, %v5474_v34  ;;  %v1870_v59 = vld [vmem:[#allocation5 + $0x5c0] sm:$0xff]  ;;  %v5481_v42 = vld [vmem:[#allocation89_spill] sm:$0xff]  ;;  %v2005_v34 = vpop.permute.xlu2 %2004 }
 0x5a1   :  { %v1617_v20 = vsel %vm461_vm14, %v4753_v11, %v1602_v2  ;;  %v1713_v51 = vsel %vm5476_vm15, %v1700_v5, %v5475_v39  ;;  %v1715_v27 = vsel %vm5403_vm1, %v4761_v58, %v1700_v5  ;;  %v1920_v55 = vld [vmem:[#allocation5 + $0x640] sm:$0xff]  ;;  %v1631_v15 = vmul.f32 %v1623_v26, %v1615_v60  ;;  %v5477_v53 = vld [vmem:[#allocation28_spill] sm:$0xff] }
 0x5a2   :  { %2098 = vmatpush.msrb.mxu3 %v1988_v35  ;;  %v1630_v31 = vmul.f32 %v1622_v46, %v1617_v20  ;;  %v1728_v4 = vmul.f32 %v1720_v41, %v1715_v27  ;;  %v1729_v18 = vmul.f32 %v1721_v21, %v1713_v51  ;;  %v1940_v11 = vadd.f32 %v4696_v14, %v1840_v57  ;;  %v5479_v6 = vld [vmem:[#allocation87_spill] sm:$0xff]  ;;  %v5480_v40 = vld [vmem:[#allocation84_spill] sm:$0xff]  ;;  %v5482_v46 = vld [vmem:[#allocation17_spill] sm:$0xff] }
 0x5a3   :  { %2262 = vmatmul.msk.f32.vlgmr.msrb.gmra.mxu3 %vm2007_vm12, %v4743_v16  ;;  %v1941_v1 = vadd.f32 %v5477_v53, %v1841_v44  ;;  %v1911_v37 = vadd.f32 %v4690_v17, %v1811_v24  ;;  %v1912_v56 = vadd.f32 %v5478_v36, %v1812_v50  ;;  %v1639_v58 = vadd.f32 %v1631_v15, %v1467_v19  ;;  %v5483_v45 = vld [vmem:[#allocation32_spill] sm:$0xff]  ;;  %v5484_v62 = vld [vmem:[#allocation67_spill] sm:$0xff]  ;;  %v5485_v50 = vld [vmem:[#allocation29_spill] sm:$0xff] }
 0x5a4   :  { %v1638_v48 = vadd.f32 %v1630_v31, %v4730_v30  ;;  %v1736_v7 = vadd.f32 %v1728_v4, %v4809_v25  ;;  %v1737_v61 = vadd.f32 %v1729_v18, %v1541_v47  ;;  %v1878_v22 = vmul.f32 %v1870_v59, %v5479_v6 }
 0x5a5   :  { %v1928_v28 = vmul.f32 %v1920_v55, %v5480_v40  ;;  %v1973_v43 = vadd.f32 %v1940_v11, %v1915_v12  ;;  %v1974_v23 = vadd.f32 %v1941_v1, %v1916_v0  ;;  %v1787_v10 = vadd.f32 %v5482_v46, %v1639_v58 }
 0x5a6   :  { %v1786_v14 = vadd.f32 %v5481_v42, %v1638_v48  ;;  %v1836_v17 = vadd.f32 %v5483_v45, %v1736_v7  ;;  %v1837_v24 = vadd.f32 %v5484_v62, %v1737_v61 }
 0x5a7   :  { %v1989_v30 = vadd.f32 %v4774_v54, %v1973_v43  ;;  %v1990_v8 = vadd.f32 %v4777_v3, %v1974_v23  ;;  %v1887_v33 = vadd.f32 %v5485_v50, %v1787_v10 }
 0x5a8   :  { %v1886_v25 = vadd.f32 %v1878_v22, %v1786_v14  ;;  %v1936_v47 = vadd.f32 %v1928_v28, %v1836_v17  ;;  %v1937_v57 = vadd.f32 %v4673_v49, %v1837_v24 }
 0x5a9   :  { %2028 = vmatpush.msrb.mxu0 %v1989_v30  ;;  %2051 = vmatpush.msrb.mxu1 %v1990_v8  ;;  %v1978_v41 = vadd.f32 %v4792_v9, %v1887_v33 }
 0x5aa   :  { %v1969_v52 = vadd.f32 %v1936_v47, %v1911_v37  ;;  %v1977_v44 = vadd.f32 %v4782_v29, %v1886_v25  ;;  %v1970_v26 = vadd.f32 %v1937_v57, %v1912_v56  ;;  %v2000_v29 = vpop.permute.xlu0 %1999 }
 0x5ab   :  { %2263 = vmatmul.msk.f32.gmra.mxu3 %vm2007_vm12, %v4800_v32 }
 0x5ac   :  { %v1985_v54 = vadd.f32 %v1977_v44, %v1969_v52  ;;  %v1986_v21 = vadd.f32 %v1978_v41, %v1970_v26  ;;  %v2192_v44 = vld [vmem:[%s4926_s10] sm:$0xff] }
 0x5ae   :  { %2029 = vmatpush.msrb.mxu0 %v1985_v54  ;;  %2052 = vmatpush.msrb.mxu1 %v1986_v21 }
 0x5af   :  { %2256 = vmatmul.msk.f32.vlgmr.msrb.gmra.mxu0 %vm2007_vm12, %v4743_v16  ;;  %2258 = vmatmul.msk.f32.vlgmr.msrb.gmra.mxu1 %vm2007_vm12, %v4743_v16 }
 0x5b7   :  { %2257 = vmatmul.msk.f32.gmra.mxu0 %vm2007_vm12, %v4800_v32  ;;  %2259 = vmatmul.msk.f32.gmra.mxu1 %vm2007_vm12, %v4800_v32 }
 0x613   :  { %v2077_v49 = vpop.f32.mrf.mxu2 }
 0x614   :  { %v2078_v19 = vadd.f32 %v2077_v49, %v2000_v29 }
 0x616   :  { %v2108_v63 = vmax.f32 %v2078_v19, 0.0 }
 0x61b   :  { %v2080_v16 = vpop.f32.mrf.mxu2 }
 0x61c   :  { %v2081_v27 = vadd.f32 %v2080_v16, %v2005_v34 }
 0x61e   :  { %v2112_v11 = vmax.f32 %v2081_v27, 0.0 }
 0x626   :  { %v2100_v3 = vpop.f32.mrf.mxu3 }
 0x627   :  { %v2101_v5 = vadd.f32 %v2100_v3, %v2000_v29 }
 0x629   :  { %v2109_v60 = vmax.f32 %v2101_v5, 0.0  ;;  %v2159_v5 = vld [vmem:[%s4925_s9] sm:$0xff] }
 0x62c   :  { %v2031_v9 = vpop.f32.mrf.mxu0  ;;  %v2054_v13 = vpop.f32.mrf.mxu1 }
 0x62d   :  { %v2032_v35 = vadd.f32 %v2031_v9, %v2000_v29  ;;  %v2055_v2 = vadd.f32 %v2054_v13, %v2000_v29 }
 0x62e   :  { %v2103_v20 = vpop.f32.mrf.mxu3 }
 0x62f   :  { %v2106_v38 = vmax.f32 %v2032_v35, 0.0  ;;  %v2107_v12 = vmax.f32 %v2055_v2, 0.0  ;;  %v2104_v15 = vadd.f32 %v2103_v20, %v2005_v34  ;;  %v2160_v2 = vld [vmem:[%s4925_s9 + $0x8] sm:$0xff]  ;;  %s2394_s9 = smov [#allocation7]  }
 0x631   :  { %v2114_v0 = vadd.f32 %v2107_v12, %v2106_v38  ;;  %v2113_v1 = vmax.f32 %v2104_v15, 0.0 }
 0x633   :  { %v2115_v39 = vadd.f32 %v2114_v0, %v2108_v63  ;;  %v2193_v0 = vld [vmem:[%s4926_s10 + $0x8] sm:$0xff]  ;;  %s2232_s10 = sshll.u32 %s2394_s9, 4  ;;  %s2233_s10 = int_to_ptr.vmem [resolvable:$true] %s2232_s10 }
 0x634   :  { %v2034_v51 = vpop.f32.mrf.mxu0  ;;  %v2057_v32 = vpop.f32.mrf.mxu1 }
 0x635   :  { %v2035_v59 = vadd.f32 %v2034_v51, %v2005_v34  ;;  %v2058_v55 = vadd.f32 %v2057_v32, %v2005_v34  ;;  %v2116_v31 = vadd.f32 %v2115_v39, %v2109_v60 }
 0x637   :  { %v2110_v4 = vmax.f32 %v2035_v59, 0.0  ;;  %v2111_v18 = vmax.f32 %v2058_v55, 0.0  ;;  %2117 = vadd.xlane.f32.xlu1 %v2116_v31 }
 0x639   :  { %v2119_v53 = vadd.f32 %v2111_v18, %v2110_v4 }
 0x63b   :  { %v2120_v37 = vadd.f32 %v2119_v53, %v2112_v11 }
 0x63d   :  { %v2121_v36 = vadd.f32 %v2120_v37, %v2113_v1 }
 0x63f   :  { %2122 = vadd.xlane.f32.xlu0 %v2121_v36 }
 0x6aa   :  { %v2118_v56 = vpop.xlane.xlu1 %2117 }
 0x6b2   :  { %v2123_v48 = vpop.xlane.xlu0 %2122 }
 0x6b3   :  { %v2124_v58 = vadd.f32 %v2123_v48, %v2118_v56 }
 0x6b5   :  { %v2125_v7 = vmul.f32 0.0009765625, %v2124_v58 }
 0x6b7   :  { %2128 = vperm.xlu2 %2287, %v2125_v7  }
 0x711   :  { %v2129_v61 = vpop.permute.xlu2 %2128 }
 0x712   :  { %v2135_v6 = vsub.f32 %v2110_v4, %v2129_v61  ;;  %v4888_v22 = vsub.f32 %v2111_v18, %v2129_v61  ;;  %v4890_v40 = vsub.f32 %v2112_v11, %v2129_v61  ;;  %v2131_v28 = vsub.f32 %v2106_v38, %v2129_v61 }
 0x713   :  { %v2132_v43 = vsub.f32 %v2107_v12, %v2129_v61  ;;  %v2133_v23 = vsub.f32 %v2108_v63, %v2129_v61  ;;  %v2138_v42 = vsub.f32 %v2113_v1, %v2129_v61  ;;  %v2134_v10 = vsub.f32 %v2109_v60, %v2129_v61 }
 0x714   :  { %v2143_v14 = vmul.f32 %v2135_v6, %v2135_v6  ;;  %v2144_v46 = vmul.f32 %v4888_v22, %v4888_v22  ;;  %v2139_v45 = vmul.f32 %v2131_v28, %v2131_v28  ;;  %v2145_v62 = vmul.f32 %v4890_v40, %v4890_v40 }
 0x715   :  { %v2140_v17 = vmul.f32 %v2132_v43, %v2132_v43  ;;  %v2141_v30 = vmul.f32 %v2133_v23, %v2133_v23  ;;  %v2146_v25 = vmul.f32 %v2138_v42, %v2138_v42  ;;  %v2142_v50 = vmul.f32 %v2134_v10, %v2134_v10 }
 0x716   :  { %v2152_v24 = vadd.f32 %v2144_v46, %v2143_v14 }
 0x717   :  { %v2147_v8 = vadd.f32 %v2140_v17, %v2139_v45 }
 0x718   :  { %v2153_v47 = vadd.f32 %v2152_v24, %v2145_v62 }
 0x719   :  { %v2148_v33 = vadd.f32 %v2147_v8, %v2141_v30 }
 0x71a   :  { %v2154_v57 = vadd.f32 %v2153_v47, %v2146_v25 }
 0x71b   :  { %v2149_v52 = vadd.f32 %v2148_v33, %v2142_v50 }
 0x71c   :  { %2155 = vadd.xlane.f32.xlu1 %v2154_v57 }
 0x71d   :  { %2150 = vadd.xlane.f32.xlu2 %v2149_v52 }
 0x735   :  { %2196 = vperm.xlu2 %2287, %v2192_v44  }
 0x78f   :  { %v2156_v26 = vpop.xlane.xlu1 %2155 }
 0x790   :  { %v2151_v41 = vpop.xlane.xlu2 %2150 }
 0x791   :  { %v2157_v54 = vadd.f32 %v2156_v26, %v2151_v41 }
 0x793   :  { %v2158_v21 = vmul.f32 0.0009765625, %v2157_v54 }
 0x795   :  { %v2161_v49 = vadd.f32 1e-05, %v2158_v21 }
 0x797   :  { %2292 = vrsqrt.f32 %v2161_v49  ;;  %vm2168_vm3 = vweird.f32 %v2161_v49 }
 0x798   :  { %v2197_v51 = vpop.permute.xlu2 %2196 }
 0x79d   :  { %v2293_v3 = vpop.eup %2292 }
 0x79e   :  { %v2163_v29 = vmul.f32 %v2293_v3, %v2161_v49  ;;  %vm2169_vm14 = vweird.f32 %v2293_v3 }
 0x79f   :  { %vm2170_vm4 = vmor %vm2168_vm3, %vm2169_vm14 }
 0x7a0   :  { %v2164_v9 = vmul.f32 %v2293_v3, %v2163_v29 }
 0x7a2   :  { %v2165_v13 = vmul.f32 0.5, %v2164_v9 }
 0x7a4   :  { %v2166_v19 = vsub.f32 1.5, %v2165_v13 }
 0x7a6   :  { %v2167_v35 = vmul.f32 %v2293_v3, %v2166_v19 }
 0x7a8   :  { %v2171_v38 = vsel %vm2170_vm4, %v2293_v3, %v2167_v35 }
 0x7a9   :  { %v2173_v12 = vmul.f32 %v2171_v38, %v2160_v2  ;;  %v2172_v63 = vmul.f32 %v2171_v38, %v2159_v5 }
 0x7ab   :  { %2181 = vperm.xlu1 %2289, %v2173_v12   ;;  %2176 = vperm.xlu0 %2288, %v2172_v63  }
 0x7b3   :  { %2201 = vperm.xlu0 %2288, %v2193_v0  }
 0x81d   :  { %v2177_v16 = vpop.permute.xlu0 %2176  ;;  %v2182_v32 = vpop.permute.xlu1 %2181 }
 0x81e   :  { %v2184_v34 = vmul.f32 %v2177_v16, %v2131_v28  ;;  %v2185_v60 = vmul.f32 %v2177_v16, %v2132_v43  ;;  %v2186_v20 = vmul.f32 %v2177_v16, %v2133_v23  ;;  %v2187_v39 = vmul.f32 %v2177_v16, %v2134_v10 }
 0x81f   :  { %v2188_v15 = vmul.f32 %v2182_v32, %v2135_v6  ;;  %v2189_v53 = vmul.f32 %v2182_v32, %v4888_v22  ;;  %v2190_v1 = vmul.f32 %v2182_v32, %v4890_v40  ;;  %v2191_v37 = vmul.f32 %v2182_v32, %v2138_v42 }
 0x820   :  { %v2204_v27 = vadd.f32 %v2197_v51, %v2184_v34  ;;  %v2205_v59 = vadd.f32 %v2197_v51, %v2185_v60  ;;  %v2206_v55 = vadd.f32 %v2197_v51, %v2186_v20  ;;  %v2207_v31 = vadd.f32 %v2197_v51, %v2187_v39 }
 0x822   :  { %v2212_v4 = vmax.f32 %v2204_v27, 0.0  ;;  %v2213_v18 = vmax.f32 %v2205_v59, 0.0  ;;  %v2214_v11 = vmax.f32 %v2206_v55, 0.0  ;;  %v2215_v36 = vmax.f32 %v2207_v31, 0.0 }
 0x824   :  { %2220 = vst [vmem:[#allocation7] sm:$0xff] %v2212_v4 }
 0x825   :  { %v2202_v56 = vpop.permute.xlu0 %2201  ;;  %2221 = vst [vmem:[#allocation7 + $0x8] sm:$0xff] %v2213_v18 }
 0x826   :  { %v2208_v48 = vadd.f32 %v2202_v56, %v2188_v15  ;;  %v2209_v58 = vadd.f32 %v2202_v56, %v2189_v53  ;;  %v2210_v7 = vadd.f32 %v2202_v56, %v2190_v1  ;;  %v2211_v61 = vadd.f32 %v2202_v56, %v2191_v37  ;;  %2222 = vst [vmem:[#allocation7 + $0x10] sm:$0xff] %v2214_v11 }
 0x827   :  { %2223 = vst [vmem:[#allocation7 + $0x18] sm:$0xff] %v2215_v36 }
 0x828   :  { %v2216_v28 = vmax.f32 %v2208_v48, 0.0  ;;  %v2217_v6 = vmax.f32 %v2209_v58, 0.0  ;;  %v2218_v43 = vmax.f32 %v2210_v7, 0.0  ;;  %v2219_v22 = vmax.f32 %v2211_v61, 0.0 }
 0x82a   :  { %2224 = vst [vmem:[#allocation7 + $0x20] sm:$0xff] %v2216_v28 }
 0x82b   :  { %2225 = vst [vmem:[#allocation7 + $0x28] sm:$0xff] %v2217_v6 }
 0x82c   :  { %2226 = vst [vmem:[#allocation7 + $0x30] sm:$0xff] %v2218_v43 }
 0x82d   :  { %2227 = vst [vmem:[#allocation7 + $0x38] sm:$0xff] %v2219_v22 }
 0x82e   :  { %2240 = dma.vmem_to_hbm [thread:$0]  %s2233_s10, 1024, %s2235_s14, [#allocation4], %s5486_s18, %s5486_s18, %s2374_s26  }
 0x82f   :  { %2370 = dma.done.wait [#allocation4], 1024  }
 0x830   :  { %2371 = vsyncadd [#allocation4], 4294966272 }
 0x831   :  { %2245 = vsyncpa [#allocation3], 1 }
 0x832   :  { %2246 = vsyncpa [#allocation6], 1 }
 0x833   :  { %2247 = vsyncpa [#allocation4], 1 }

</bundles_post_ra>
